<compile_context>
chip_gen: v7x
topology: tpu7x:2x2x1
jax: 0.10.0
libtpu: 0.0.40
codegen_flags: <defaults>
</compile_context>

<pallas_src>
import jax
import jax.numpy as jnp
from jax import lax
from jax.experimental import pallas as pl
from jax.experimental.pallas import tpu as pltpu

PAD = 0  # utils.PAD


# --------------------------------------------------------------------------- #
# helpers
# --------------------------------------------------------------------------- #
def _vmem_limit_bytes():
    """Generation-aware scoped-VMEM budget (~75% of physical, capped at 100 MiB)."""
    try:
        cap = pltpu.get_tpu_info().vmem_capacity_bytes
    except Exception:
        cap = 64 * 1024 * 1024  # conservative fallback (v7x-sized)
    return int(min(cap * 3 // 4, 100 * 1024 * 1024))


def _pick_block(n, preferred):
    for c in preferred:
        if n % c == 0:
            return c
    return n


# --------------------------------------------------------------------------- #
# K0: hoisted GRU input projection  gi = X @ W_ih + b_ih  (one big MXU matmul)
# --------------------------------------------------------------------------- #
def _dense_kernel(x_ref, w_ref, b_ref, o_ref):
    o_ref[...] = (
        jnp.dot(x_ref[...], w_ref[...], preferred_element_type=jnp.float32)
        + b_ref[...]
    )


def dense_proj(x_bf16, w_bf16, b_f32, *, block_rows=256):
    n, e = x_bf16.shape
    k = w_bf16.shape[1]
    grid_n = pl.cdiv(n, block_rows)
    n_pad = grid_n * block_rows
    if n_pad != n:  # padded tail block instead of "whole array" fallback
        x_bf16 = jnp.pad(x_bf16, ((0, n_pad - n), (0, 0)))
    out = pl.pallas_call(
        _dense_kernel,
        out_shape=jax.ShapeDtypeStruct((n_pad, k), jnp.float32),
        grid=(grid_n,),
        in_specs=[
            pl.BlockSpec((block_rows, e), lambda i: (i, 0)),
            pl.BlockSpec((e, k), lambda i: (0, 0)),
            pl.BlockSpec((1, k), lambda i: (0, 0)),
        ],
        out_specs=pl.BlockSpec((block_rows, k), lambda i: (i, 0)),
        compiler_params=pltpu.CompilerParams(
            dimension_semantics=("parallel",),
            vmem_limit_bytes=_vmem_limit_bytes(),
        ),
    )(x_bf16, w_bf16, b_f32)
    return out[:n] if n_pad != n else out


# --------------------------------------------------------------------------- #
# K1: time-gridded GRU recurrences (encoder, then decoder). Hidden carry lives
#     in a VMEM scratch that persists across the "arbitrary" time grid axis.
# --------------------------------------------------------------------------- #
def _gru_step(gi, gh, h):
    # PyTorch GRUCell semantics, gates ordered [r, z, n]; H multiple of 128 so
    # the gate slices are lane-tile aligned.
    H = h.shape[-1]
    r = jax.nn.sigmoid(gi[:, :H] + gh[:, :H])
    z = jax.nn.sigmoid(gi[:, H:2 * H] + gh[:, H:2 * H])
    n = jnp.tanh(gi[:, 2 * H:] + r * gh[:, 2 * H:])
    return n + z * (h - n)  # == (1-z)*n + z*h with one less multiply


def _enc_rec_kernel(gi_ref, whh_ref, bhh_ref, ctx_ref, h_ref):
    @pl.when(pl.program_id(1) == 0)
    def _():
        h_ref[...] = jnp.zeros_like(h_ref)

    h = h_ref[...]
    gh = jnp.dot(h, whh_ref[...], preferred_element_type=jnp.float32) + bhh_ref[...]
    h_new = _gru_step(gi_ref[0], gh, h)
    h_ref[...] = h_new
    ctx_ref[0] = h_new


def _dec_rec_kernel(h0_ref, gi_ref, whh_ref, bhh_ref, hdec_ref, h_ref):
    @pl.when(pl.program_id(1) == 0)
    def _():
        h_ref[...] = h0_ref[...]

    h = h_ref[...]
    gh = jnp.dot(h, whh_ref[...], preferred_element_type=jnp.float32) + bhh_ref[...]
    h_new = _gru_step(gi_ref[0], gh, h)
    h_ref[...] = h_new
    hdec_ref[0] = h_new


def _batch_block(B):
    # Split batch across v7x's two TensorCores when possible; keep sublane-aligned.
    return B // 2 if (B % 16 == 0) else B


def run_encoder(enc_gi, whh, bhh):
    S, B, G = enc_gi.shape
    H = whh.shape[0]
    bb = _batch_block(B)
    return pl.pallas_call(
        _enc_rec_kernel,
        out_shape=jax.ShapeDtypeStruct((S, B, H), jnp.float32),
        grid=(B // bb, S),
        in_specs=[
            pl.BlockSpec((1, bb, G), lambda b, t: (t, b, 0)),
            pl.BlockSpec((H, G), lambda b, t: (0, 0)),
            pl.BlockSpec((1, G), lambda b, t: (0, 0)),
        ],
        out_specs=pl.BlockSpec((1, bb, H), lambda b, t: (t, b, 0)),
        scratch_shapes=[pltpu.VMEM((bb, H), jnp.float32)],
        compiler_params=pltpu.CompilerParams(
            dimension_semantics=("parallel", "arbitrary"),
            vmem_limit_bytes=_vmem_limit_bytes(),
        ),
    )(enc_gi, whh, bhh)


def run_decoder(dec_gi, h0, whh, bhh):
    T, B, G = dec_gi.shape
    H = whh.shape[0]
    bb = _batch_block(B)
    return pl.pallas_call(
        _dec_rec_kernel,
        out_shape=jax.ShapeDtypeStruct((T, B, H), jnp.float32),
        grid=(B // bb, T),
        in_specs=[
            pl.BlockSpec((bb, H), lambda b, t: (b, 0)),
            pl.BlockSpec((1, bb, G), lambda b, t: (t, b, 0)),
            pl.BlockSpec((H, G), lambda b, t: (0, 0)),
            pl.BlockSpec((1, G), lambda b, t: (0, 0)),
        ],
        out_specs=pl.BlockSpec((1, bb, H), lambda b, t: (t, b, 0)),
        scratch_shapes=[pltpu.VMEM((bb, H), jnp.float32)],
        compiler_params=pltpu.CompilerParams(
            dimension_semantics=("parallel", "arbitrary"),
            vmem_limit_bytes=_vmem_limit_bytes(),
        ),
    )(h0, dec_gi, whh, bhh)


# --------------------------------------------------------------------------- #
# K2a: Luong "general" attention + tanh(W_c [c; h]) per batch row (all T steps).
# --------------------------------------------------------------------------- #
def _attn_kernel(h_ref, ctx_ref, wa_ref, wcc_ref, wch_ref, comb_ref):
    h = h_ref[0]                               # (T, H) f32
    ctx = ctx_ref[0]                           # (S, H) f32
    hb = h.astype(jnp.bfloat16)
    ctxb = ctx.astype(jnp.bfloat16)

    sa = jnp.dot(hb, wa_ref[...], preferred_element_type=jnp.float32)      # (T, H)
    # scores: contract last dims of both operands (no explicit ctx.T relayout)
    e = lax.dot_general(sa.astype(jnp.bfloat16), ctxb,
                        (((1,), (1,)), ((), ())),
                        preferred_element_type=jnp.float32)                # (T, S)
    e = e - jnp.max(e, axis=-1, keepdims=True)
    p = jnp.exp(e)
    alpha = p / jnp.sum(p, axis=-1, keepdims=True)                         # exact softmax
    c = jnp.dot(alpha.astype(jnp.bfloat16), ctxb,
                preferred_element_type=jnp.float32)                        # (T, H)

    # tanh(W_c [c; h]) without the lane-axis concat: wc split into halves.
    comb_ref[0] = jnp.tanh(
        jnp.dot(c.astype(jnp.bfloat16), wcc_ref[...], preferred_element_type=jnp.float32)
        + jnp.dot(hb, wch_ref[...], preferred_element_type=jnp.float32)
    )


def run_attention(hdec_b, ctx_b, wa_bf16, wcc_bf16, wch_bf16):
    B, T, H = hdec_b.shape
    S = ctx_b.shape[1]
    return pl.pallas_call(
        _attn_kernel,
        out_shape=jax.ShapeDtypeStruct((B, T, H), jnp.float32),
        grid=(B,),
        in_specs=[
            pl.BlockSpec((1, T, H), lambda b: (b, 0, 0)),
            pl.BlockSpec((1, S, H), lambda b: (b, 0, 0)),
            pl.BlockSpec((H, H), lambda b: (0, 0)),
            pl.BlockSpec((H, H), lambda b: (0, 0)),
            pl.BlockSpec((H, H), lambda b: (0, 0)),
        ],
        out_specs=pl.BlockSpec((1, T, H), lambda b: (b, 0, 0)),
        compiler_params=pltpu.CompilerParams(
            dimension_semantics=("parallel",),
            vmem_limit_bytes=_vmem_limit_bytes(),
        ),
    )(hdec_b, ctx_b, wa_bf16, wcc_bf16, wch_bf16)


# --------------------------------------------------------------------------- #
# K2b: vocab-tiled projection + CrossEntropy(ignore_index=PAD, reduction='none')
#      over the flattened (T*B, H) decoder features. Online logsumexp + target
#      logit accumulated across the "arbitrary" vocab axis in VMEM scratch.
# --------------------------------------------------------------------------- #
def _proj_ce_kernel(comb_ref, tgt_ref, wout_ref, bout_ref,
                    logits_ref, loss_ref, m_sc, l_sc, t_sc):
    j = pl.program_id(1)
    tv = wout_ref.shape[1]

    @pl.when(j == 0)
    def _():
        m_sc[...] = jnp.full_like(m_sc, -jnp.inf)
        l_sc[...] = jnp.zeros_like(l_sc)
        t_sc[...] = jnp.zeros_like(t_sc)

    logits = (jnp.dot(comb_ref[...].astype(jnp.bfloat16), wout_ref[...],
                      preferred_element_type=jnp.float32) + bout_ref[...])  # (tn, tv)
    logits_ref[...] = logits                                                # stream to HBM

    tgt = tgt_ref[...]                                                      # (tn, 1) int32
    vocab_ids = lax.broadcasted_iota(jnp.int32, logits.shape, 1) + j * tv
    # per-tile range check: only the tile containing the target contributes
    t_sc[...] += jnp.sum(jnp.where(vocab_ids == tgt, logits, 0.0),
                         axis=-1, keepdims=True)

    m_prev = m_sc[...]
    m_new = jnp.maximum(m_prev, jnp.max(logits, axis=-1, keepdims=True))
    l_sc[...] = (l_sc[...] * jnp.exp(m_prev - m_new)
                 + jnp.sum(jnp.exp(logits - m_new), axis=-1, keepdims=True))
    m_sc[...] = m_new

    @pl.when(j == pl.num_programs(1) - 1)
    def _():
        lse = m_sc[...] + jnp.log(l_sc[...])
        loss_ref[...] = jnp.where(tgt == PAD, 0.0, lse - t_sc[...])


def run_proj_ce(comb_flat, tgt_flat, wout_bf16, bout):
    N, H = comb_flat.shape
    V = wout_bf16.shape[1]

    tn = 256 if N >= 256 else ((N + 7) // 8) * 8     # fill MXU rows
    n_pad = pl.cdiv(N, tn) * tn
    if n_pad != N:                                   # padded tail rows -> PAD targets
        comb_flat = jnp.pad(comb_flat, ((0, n_pad - N), (0, 0)))
        tgt_flat = jnp.pad(tgt_flat, ((0, n_pad - N), (0, 0)), constant_values=PAD)
    tv = _pick_block(V, (512, 256, 128))             # vocab tile (bounded VMEM vs V)

    logits, loss = pl.pallas_call(
        _proj_ce_kernel,
        out_shape=(
            jax.ShapeDtypeStruct((n_pad, V), jnp.float32),
            jax.ShapeDtypeStruct((n_pad, 1), jnp.float32),
        ),
        grid=(n_pad // tn, V // tv),
        in_specs=[
            pl.BlockSpec((tn, H), lambda i, j: (i, 0)),
            pl.BlockSpec((tn, 1), lambda i, j: (i, 0)),
            pl.BlockSpec((H, tv), lambda i, j: (0, j)),
            pl.BlockSpec((1, tv), lambda i, j: (0, j)),
        ],
        out_specs=(
            pl.BlockSpec((tn, tv), lambda i, j: (i, j)),
            pl.BlockSpec((tn, 1), lambda i, j: (i, 0)),
        ),
        scratch_shapes=[pltpu.VMEM((tn, 1), jnp.float32)] * 3,
        compiler_params=pltpu.CompilerParams(
            dimension_semantics=("parallel", "arbitrary"),
            vmem_limit_bytes=_vmem_limit_bytes(),
        ),
    )(comb_flat, tgt_flat, wout_bf16, bout)
    if n_pad != N:
        logits, loss = logits[:N], loss[:N]
    return logits, loss


# --------------------------------------------------------------------------- #
# Wrapper: mirrors the PyTorch forward (src.t()/dec.t()/targets.t(), teacher
# forcing, torch.stack(outputs) time-major, loss = CE(scores.view(-1,V), ...)).
# --------------------------------------------------------------------------- #
def seq2seq_forward(src, dec, targets, params):
    """src, dec, targets: (B, L) int32 (batch-major, like the PyTorch call site)."""
    src_t = src.T                                     # (S, B) time-major
    dec_t = dec.T                                     # (T, B)
    src_emb = params["emb_src"][src_t]                # (S, B, E)
    dec_emb = params["emb_tgt"][dec_t]                # (T, B, E)

    S, B, E = src_emb.shape
    T = dec_emb.shape[0]
    H = params["enc_whh"].shape[0]
    V = params["wout"].shape[1]
    bf = jnp.bfloat16

    # K0: hoisted input projections (bf16 operands, f32 accumulation).
    enc_gi = dense_proj(src_emb.reshape(S * B, E).astype(bf),
                        params["enc_wih"].astype(bf),
                        params["enc_bih"]).reshape(S, B, 3 * H)
    dec_gi = dense_proj(dec_emb.reshape(T * B, E).astype(bf),
                        params["dec_wih"].astype(bf),
                        params["dec_bih"]).reshape(T, B, 3 * H)

    # K1: time-gridded GRU recurrences (f32 carries for accuracy).
    ctx = run_encoder(enc_gi, params["enc_whh"], params["enc_bhh"])      # (S, B, H)
    h0 = ctx[S - 1]                                                      # final encoder hidden
    hdec = run_decoder(dec_gi, h0, params["dec_whh"], params["dec_bhh"]) # (T, B, H)

    # K2a: attention over encoder contexts (batch-gridded; wrapper-side layout plumbing).
    hdec_b = hdec.transpose(1, 0, 2)                  # (B, T, H)
    ctx_b = ctx.transpose(1, 0, 2)                    # (B, S, H)
    wc_c = params["wc"][:H].astype(bf)                # split wc -> no in-kernel concat
    wc_h = params["wc"][H:].astype(bf)
    comb_b = run_attention(hdec_b, ctx_b, params["wa"].astype(bf), wc_c, wc_h)  # (B, T, H)

    # K2b: flattened time-major vocab projection + CE (matches scores.view(-1, V)).
    comb_flat = comb_b.transpose(1, 0, 2).reshape(T * B, H)
    tgt_flat = targets.T.reshape(T * B, 1).astype(jnp.int32)
    logits_flat, loss_flat = run_proj_ce(comb_flat, tgt_flat,
                                         params["wout"].astype(bf), params["bout"])

    outputs = logits_flat.reshape(T, B, V)            # == torch.stack(outputs)
    loss = loss_flat[:, 0]                            # (T*B,) time-major, like targets.t().view(-1)
    return loss, outputs


def make_params(key, V, E, H):
    ks = jax.random.split(key, 12)
    s = 0.1
    return {
        "emb_src": jax.random.normal(ks[0], (V, E), jnp.float32) * s,
        "emb_tgt": jax.random.normal(ks[1], (V, E), jnp.float32) * s,
        "enc_wih": jax.random.normal(ks[2], (E, 3 * H), jnp.float32) * s,
        "enc_whh": jax.random.normal(ks[3], (H, 3 * H), jnp.float32) * s,
        "enc_bih": jnp.zeros((1, 3 * H), jnp.float32),
        "enc_bhh": jnp.zeros((1, 3 * H), jnp.float32),
        "dec_wih": jax.random.normal(ks[4], (E, 3 * H), jnp.float32) * s,
        "dec_whh": jax.random.normal(ks[5], (H, 3 * H), jnp.float32) * s,
        "dec_bih": jnp.zeros((1, 3 * H), jnp.float32),
        "dec_bhh": jnp.zeros((1, 3 * H), jnp.float32),
        "wa": jax.random.normal(ks[6], (H, H), jnp.float32) * s,
        "wc": jax.random.normal(ks[7], (2 * H, H), jnp.float32) * s,
        "wout": jax.random.normal(ks[8], (H, V), jnp.float32) * s,
        "bout": jnp.zeros((1, V), jnp.float32),
    }


if __name__ == "__main__":
    # hardware-friendly small shapes: B multiple of 8, H multiple of 128,
    # V multiple of 128 (and > 128 so the vocab-tiled online-LSE path is exercised).
    B, S, T, E, H, V = 8, 16, 16, 64, 128, 384
    key = jax.random.PRNGKey(0)
    kp, k1, k2, k3 = jax.random.split(key, 4)

    params = make_params(kp, V, E, H)

    src = jax.random.randint(k1, (B, S), 1, V, dtype=jnp.int32)
    dec = jax.random.randint(k2, (B, T), 1, V, dtype=jnp.int32)
    targets = jax.random.randint(k3, (B, T), 1, V, dtype=jnp.int32)
    targets = targets.at[:, -2:].set(PAD)   # exercise ignore_index=PAD

    loss, outputs = jax.jit(seq2seq_forward)(src, dec, targets, params)
    jax.block_until_ready((loss, outputs))

    assert loss.shape == (T * B,)
    assert outputs.shape == (T, B, V)
    assert bool(jnp.all(jnp.isfinite(loss))) and bool(jnp.all(jnp.isfinite(outputs)))
    # PAD targets must contribute zero loss (time-major flattening: last 2 steps of each row)
    assert bool(jnp.all(loss.reshape(T, B)[-2:, :] == 0.0))
    print("KERNEL_OK")
</pallas_src>

<mosaic_0001>
module attributes {stable_mosaic.version = 11 : i64} {
  func.func @_dense_kernel(%arg0: i32, %arg1: memref<256x64xbf16, #tpu.memory_space<vmem>>, %arg2: memref<64x384xbf16, #tpu.memory_space<vmem>>, %arg3: memref<1x384xf32, #tpu.memory_space<vmem>>, %arg4: memref<256x384xf32, #tpu.memory_space<vmem>>) attributes {dimension_semantics = [#tpu.dimension_semantics<parallel>], iteration_bounds = array<i64: 1>, scalar_prefetch = 0 : i64, scratch_operands = 0 : i64, tpu.core_type = #tpu.core_type<tc>, window_params = [{transform_indices = @transform_0, window_bounds = array<i64: 256, 64>}, {pipeline_mode = #tpu.pipeline_mode<synchronous>, transform_indices = @transform_1, window_bounds = array<i64: 64, 384>}, {pipeline_mode = #tpu.pipeline_mode<synchronous>, transform_indices = @transform_2, window_bounds = array<i64: 1, 384>}, {transform_indices = @transform_3, window_bounds = array<i64: 256, 384>}]} {
    %c0 = arith.constant 0 : index
    %c0_0 = arith.constant 0 : index
    %0 = vector.load %arg1[%c0, %c0_0] : memref<256x64xbf16, #tpu.memory_space<vmem>>, vector<256x64xbf16>
    %c0_1 = arith.constant 0 : index
    %c0_2 = arith.constant 0 : index
    %1 = vector.load %arg2[%c0_1, %c0_2] : memref<64x384xbf16, #tpu.memory_space<vmem>>, vector<64x384xbf16>
    %cst = arith.constant dense<0.000000e+00> : vector<256x384xf32>
    %2 = tpu.matmul %0, %1, %cst {dimension_numbers = #tpu.dot_dimension_numbers<[1], [0], [0], [1], [0, 0, 1, 1], [], []>} : vector<256x64xbf16>, vector<64x384xbf16>, vector<256x384xf32> -> vector<256x384xf32>
    %c0_3 = arith.constant 0 : index
    %c0_4 = arith.constant 0 : index
    %3 = vector.load %arg3[%c0_3, %c0_4] : memref<1x384xf32, #tpu.memory_space<vmem>>, vector<1x384xf32>
    %4 = vector.broadcast %3 : vector<1x384xf32> to vector<256x384xf32>
    %5 = arith.addf %2, %4 : vector<256x384xf32>
    %c0_5 = arith.constant 0 : index
    %c0_6 = arith.constant 0 : index
    %6 = vector.load %arg4[%c0_5, %c0_6] : memref<256x384xf32, #tpu.memory_space<vmem>>, vector<256x384xf32>
    tpu.vector_store %arg4[%c0_5, %c0_6], %5 {strides = array<i32>} : memref<256x384xf32, #tpu.memory_space<vmem>>, vector<256x384xf32>,
    return
  }
  func.func @transform_0(%arg0: i32) -> (i32, i32) {
    %c0_i32 = arith.constant 0 : i32
    %c0_i32_0 = arith.constant 0 : i32
    return %arg0, %c0_i32 : i32, i32
  }
  func.func @transform_1(%arg0: i32) -> (i32, i32) {
    %c0_i32 = arith.constant 0 : i32
    %c0_i32_0 = arith.constant 0 : i32
    %c0_i32_1 = arith.constant 0 : i32
    return %c0_i32, %c0_i32_0 : i32, i32
  }
  func.func @transform_2(%arg0: i32) -> (i32, i32) {
    %c0_i32 = arith.constant 0 : i32
    %c0_i32_0 = arith.constant 0 : i32
    %c0_i32_1 = arith.constant 0 : i32
    return %c0_i32, %c0_i32_0 : i32, i32
  }
  func.func @transform_3(%arg0: i32) -> (i32, i32) {
    %c0_i32 = arith.constant 0 : i32
    %c0_i32_0 = arith.constant 0 : i32
    return %arg0, %c0_i32 : i32, i32
  }
}

module attributes {stable_mosaic.version = 11 : i64} {
  func.func @_enc_rec_kernel(%arg0: i32, %arg1: i32, %arg2: memref<1x8x384xf32, #tpu.memory_space<vmem>>, %arg3: memref<128x384xf32, #tpu.memory_space<vmem>>, %arg4: memref<1x384xf32, #tpu.memory_space<vmem>>, %arg5: memref<1x8x128xf32, #tpu.memory_space<vmem>>, %arg6: memref<8x128xf32, #tpu.memory_space<vmem>>) attributes {dimension_semantics = [#tpu.dimension_semantics<parallel>, #tpu.dimension_semantics<arbitrary>], iteration_bounds = array<i64: 1, 16>, scalar_prefetch = 0 : i64, scratch_operands = 1 : i64, tpu.core_type = #tpu.core_type<tc>, window_params = [{transform_indices = @transform_0, window_bounds = array<i64: 1, 8, 384>}, {pipeline_mode = #tpu.pipeline_mode<synchronous>, transform_indices = @transform_1, window_bounds = array<i64: 128, 384>}, {pipeline_mode = #tpu.pipeline_mode<synchronous>, transform_indices = @transform_2, window_bounds = array<i64: 1, 384>}, {transform_indices = @transform_3, window_bounds = array<i64: 1, 8, 128>}]} {
    %c0_i32 = arith.constant 0 : i32
    %0 = arith.cmpi eq, %arg1, %c0_i32 : i32
    %1 = arith.extui %0 : i1 to i32
    %c0_i32_0 = arith.constant 0 : i32
    %2 = arith.cmpi ne, %1, %c0_i32_0 : i32
    scf.if %2 {
      %cst_16 = arith.constant 0.000000e+00 : f32
      %39 = vector.broadcast %cst_16 : f32 to vector<8x128xf32>
      %c0_17 = arith.constant 0 : index
      %c0_18 = arith.constant 0 : index
      %40 = vector.load %arg6[%c0_17, %c0_18] : memref<8x128xf32, #tpu.memory_space<vmem>>, vector<8x128xf32>
      tpu.vector_store %arg6[%c0_17, %c0_18], %39 {strides = array<i32>} : memref<8x128xf32, #tpu.memory_space<vmem>>, vector<8x128xf32>,
    } else {
    }
    %c0 = arith.constant 0 : index
    %c0_1 = arith.constant 0 : index
    %3 = vector.load %arg6[%c0, %c0_1] : memref<8x128xf32, #tpu.memory_space<vmem>>, vector<8x128xf32>
    %c0_2 = arith.constant 0 : index
    %c0_3 = arith.constant 0 : index
    %4 = vector.load %arg3[%c0_2, %c0_3] : memref<128x384xf32, #tpu.memory_space<vmem>>, vector<128x384xf32>
    %cst = arith.constant dense<0.000000e+00> : vector<8x384xf32>
    %5 = tpu.matmul %3, %4, %cst {dimension_numbers = #tpu.dot_dimension_numbers<[1], [0], [0], [1], [0, 0, 1, 1], [], []>} : vector<8x128xf32>, vector<128x384xf32>, vector<8x384xf32> -> vector<8x384xf32>
    %c0_4 = arith.constant 0 : index
    %c0_5 = arith.constant 0 : index
    %6 = vector.load %arg4[%c0_4, %c0_5] : memref<1x384xf32, #tpu.memory_space<vmem>>, vector<1x384xf32>
    %7 = vector.broadcast %6 : vector<1x384xf32> to vector<8x384xf32>
    %8 = arith.addf %5, %7 : vector<8x384xf32>
    %c0_6 = arith.constant 0 : index
    %c0_7 = arith.constant 0 : index
    %c0_8 = arith.constant 0 : index
    %9 = vector.load %arg2[%c0_6, %c0_7, %c0_8] : memref<1x8x384xf32, #tpu.memory_space<vmem>>, vector<1x8x384xf32>
    %10 = vector.shape_cast %9 : vector<1x8x384xf32> to vector<8x384xf32>
    %11 = vector.extract_strided_slice %10 {offsets = [0, 0], sizes = [8, 128], strides = [1, 1]} : vector<8x384xf32> to vector<8x128xf32>
    %12 = vector.extract_strided_slice %8 {offsets = [0, 0], sizes = [8, 128], strides = [1, 1]} : vector<8x384xf32> to vector<8x128xf32>
    %13 = arith.addf %11, %12 : vector<8x128xf32>
    %14 = arith.negf %13 : vector<8x128xf32>
    %15 = math.exp %14 : vector<8x128xf32>
    %cst_9 = arith.constant 1.000000e+00 : f32
    %16 = vector.broadcast %cst_9 : f32 to vector<8x128xf32>
    %17 = arith.addf %16, %15 : vector<8x128xf32>
    %18 = arith.divf %16, %17 : vector<8x128xf32>
    %19 = vector.extract_strided_slice %10 {offsets = [0, 128], sizes = [8, 128], strides = [1, 1]} : vector<8x384xf32> to vector<8x128xf32>
    %20 = vector.extract_strided_slice %8 {offsets = [0, 128], sizes = [8, 128], strides = [1, 1]} : vector<8x384xf32> to vector<8x128xf32>
    %21 = arith.addf %19, %20 : vector<8x128xf32>
    %22 = arith.negf %21 : vector<8x128xf32>
    %23 = math.exp %22 : vector<8x128xf32>
    %cst_10 = arith.constant 1.000000e+00 : f32
    %24 = vector.broadcast %cst_10 : f32 to vector<8x128xf32>
    %25 = arith.addf %24, %23 : vector<8x128xf32>
    %26 = arith.divf %24, %25 : vector<8x128xf32>
    %27 = vector.extract_strided_slice %10 {offsets = [0, 256], sizes = [8, 128], strides = [1, 1]} : vector<8x384xf32> to vector<8x128xf32>
    %28 = vector.extract_strided_slice %8 {offsets = [0, 256], sizes = [8, 128], strides = [1, 1]} : vector<8x384xf32> to vector<8x128xf32>
    %29 = arith.mulf %18, %28 : vector<8x128xf32>
    %30 = arith.addf %27, %29 : vector<8x128xf32>
    %31 = math.tanh %30 : vector<8x128xf32>
    %32 = arith.subf %3, %31 : vector<8x128xf32>
    %33 = arith.mulf %26, %32 : vector<8x128xf32>
    %34 = arith.addf %31, %33 : vector<8x128xf32>
    %c0_11 = arith.constant 0 : index
    %c0_12 = arith.constant 0 : index
    %35 = vector.load %arg6[%c0_11, %c0_12] : memref<8x128xf32, #tpu.memory_space<vmem>>, vector<8x128xf32>
    tpu.vector_store %arg6[%c0_11, %c0_12], %34 {strides = array<i32>} : memref<8x128xf32, #tpu.memory_space<vmem>>, vector<8x128xf32>,
    %c0_13 = arith.constant 0 : index
    %c0_14 = arith.constant 0 : index
    %c0_15 = arith.constant 0 : index
    %36 = vector.load %arg5[%c0_13, %c0_14, %c0_15] : memref<1x8x128xf32, #tpu.memory_space<vmem>>, vector<1x8x128xf32>
    %37 = vector.shape_cast %36 : vector<1x8x128xf32> to vector<8x128xf32>
    %38 = vector.shape_cast %34 : vector<8x128xf32> to vector<1x8x128xf32>
    tpu.vector_store %arg5[%c0_13, %c0_14, %c0_15], %38 {strides = array<i32>} : memref<1x8x128xf32, #tpu.memory_space<vmem>>, vector<1x8x128xf32>,
    return
  }
  func.func @transform_0(%arg0: i32, %arg1: i32) -> (i32, i32, i32) {
    %c0_i32 = arith.constant 0 : i32
    %c0_i32_0 = arith.constant 0 : i32
    return %arg1, %arg0, %c0_i32 : i32, i32, i32
  }
  func.func @transform_1(%arg0: i32, %arg1: i32) -> (i32, i32) {
    %c0_i32 = arith.constant 0 : i32
    %c0_i32_0 = arith.constant 0 : i32
    %c0_i32_1 = arith.constant 0 : i32
    return %c0_i32, %c0_i32_0 : i32, i32
  }
  func.func @transform_2(%arg0: i32, %arg1: i32) -> (i32, i32) {
    %c0_i32 = arith.constant 0 : i32
    %c0_i32_0 = arith.constant 0 : i32
    %c0_i32_1 = arith.constant 0 : i32
    return %c0_i32, %c0_i32_0 : i32, i32
  }
  func.func @transform_3(%arg0: i32, %arg1: i32) -> (i32, i32, i32) {
    %c0_i32 = arith.constant 0 : i32
    %c0_i32_0 = arith.constant 0 : i32
    return %arg1, %arg0, %c0_i32 : i32, i32, i32
  }
}

module attributes {stable_mosaic.version = 11 : i64} {
  func.func @_dec_rec_kernel(%arg0: i32, %arg1: i32, %arg2: memref<8x128xf32, #tpu.memory_space<vmem>>, %arg3: memref<1x8x384xf32, #tpu.memory_space<vmem>>, %arg4: memref<128x384xf32, #tpu.memory_space<vmem>>, %arg5: memref<1x384xf32, #tpu.memory_space<vmem>>, %arg6: memref<1x8x128xf32, #tpu.memory_space<vmem>>, %arg7: memref<8x128xf32, #tpu.memory_space<vmem>>) attributes {dimension_semantics = [#tpu.dimension_semantics<parallel>, #tpu.dimension_semantics<arbitrary>], iteration_bounds = array<i64: 1, 16>, scalar_prefetch = 0 : i64, scratch_operands = 1 : i64, tpu.core_type = #tpu.core_type<tc>, window_params = [{transform_indices = @transform_0, window_bounds = array<i64: 8, 128>}, {transform_indices = @transform_1, window_bounds = array<i64: 1, 8, 384>}, {pipeline_mode = #tpu.pipeline_mode<synchronous>, transform_indices = @transform_2, window_bounds = array<i64: 128, 384>}, {pipeline_mode = #tpu.pipeline_mode<synchronous>, transform_indices = @transform_3, window_bounds = array<i64: 1, 384>}, {transform_indices = @transform_4, window_bounds = array<i64: 1, 8, 128>}]} {
    %c0_i32 = arith.constant 0 : i32
    %0 = arith.cmpi eq, %arg1, %c0_i32 : i32
    %1 = arith.extui %0 : i1 to i32
    %c0_i32_0 = arith.constant 0 : i32
    %2 = arith.cmpi ne, %1, %c0_i32_0 : i32
    scf.if %2 {
      %c0_16 = arith.constant 0 : index
      %c0_17 = arith.constant 0 : index
      %39 = vector.load %arg2[%c0_16, %c0_17] : memref<8x128xf32, #tpu.memory_space<vmem>>, vector<8x128xf32>
      %c0_18 = arith.constant 0 : index
      %c0_19 = arith.constant 0 : index
      %40 = vector.load %arg7[%c0_18, %c0_19] : memref<8x128xf32, #tpu.memory_space<vmem>>, vector<8x128xf32>
      tpu.vector_store %arg7[%c0_18, %c0_19], %39 {strides = array<i32>} : memref<8x128xf32, #tpu.memory_space<vmem>>, vector<8x128xf32>,
    } else {
    }
    %c0 = arith.constant 0 : index
    %c0_1 = arith.constant 0 : index
    %3 = vector.load %arg7[%c0, %c0_1] : memref<8x128xf32, #tpu.memory_space<vmem>>, vector<8x128xf32>
    %c0_2 = arith.constant 0 : index
    %c0_3 = arith.constant 0 : index
    %4 = vector.load %arg4[%c0_2, %c0_3] : memref<128x384xf32, #tpu.memory_space<vmem>>, vector<128x384xf32>
    %cst = arith.constant dense<0.000000e+00> : vector<8x384xf32>
    %5 = tpu.matmul %3, %4, %cst {dimension_numbers = #tpu.dot_dimension_numbers<[1], [0], [0], [1], [0, 0, 1, 1], [], []>} : vector<8x128xf32>, vector<128x384xf32>, vector<8x384xf32> -> vector<8x384xf32>
    %c0_4 = arith.constant 0 : index
    %c0_5 = arith.constant 0 : index
    %6 = vector.load %arg5[%c0_4, %c0_5] : memref<1x384xf32, #tpu.memory_space<vmem>>, vector<1x384xf32>
    %7 = vector.broadcast %6 : vector<1x384xf32> to vector<8x384xf32>
    %8 = arith.addf %5, %7 : vector<8x384xf32>
    %c0_6 = arith.constant 0 : index
    %c0_7 = arith.constant 0 : index
    %c0_8 = arith.constant 0 : index
    %9 = vector.load %arg3[%c0_6, %c0_7, %c0_8] : memref<1x8x384xf32, #tpu.memory_space<vmem>>, vector<1x8x384xf32>
    %10 = vector.shape_cast %9 : vector<1x8x384xf32> to vector<8x384xf32>
    %11 = vector.extract_strided_slice %10 {offsets = [0, 0], sizes = [8, 128], strides = [1, 1]} : vector<8x384xf32> to vector<8x128xf32>
    %12 = vector.extract_strided_slice %8 {offsets = [0, 0], sizes = [8, 128], strides = [1, 1]} : vector<8x384xf32> to vector<8x128xf32>
    %13 = arith.addf %11, %12 : vector<8x128xf32>
    %14 = arith.negf %13 : vector<8x128xf32>
    %15 = math.exp %14 : vector<8x128xf32>
    %cst_9 = arith.constant 1.000000e+00 : f32
    %16 = vector.broadcast %cst_9 : f32 to vector<8x128xf32>
    %17 = arith.addf %16, %15 : vector<8x128xf32>
    %18 = arith.divf %16, %17 : vector<8x128xf32>
    %19 = vector.extract_strided_slice %10 {offsets = [0, 128], sizes = [8, 128], strides = [1, 1]} : vector<8x384xf32> to vector<8x128xf32>
    %20 = vector.extract_strided_slice %8 {offsets = [0, 128], sizes = [8, 128], strides = [1, 1]} : vector<8x384xf32> to vector<8x128xf32>
    %21 = arith.addf %19, %20 : vector<8x128xf32>
    %22 = arith.negf %21 : vector<8x128xf32>
    %23 = math.exp %22 : vector<8x128xf32>
    %cst_10 = arith.constant 1.000000e+00 : f32
    %24 = vector.broadcast %cst_10 : f32 to vector<8x128xf32>
    %25 = arith.addf %24, %23 : vector<8x128xf32>
    %26 = arith.divf %24, %25 : vector<8x128xf32>
    %27 = vector.extract_strided_slice %10 {offsets = [0, 256], sizes = [8, 128], strides = [1, 1]} : vector<8x384xf32> to vector<8x128xf32>
    %28 = vector.extract_strided_slice %8 {offsets = [0, 256], sizes = [8, 128], strides = [1, 1]} : vector<8x384xf32> to vector<8x128xf32>
    %29 = arith.mulf %18, %28 : vector<8x128xf32>
    %30 = arith.addf %27, %29 : vector<8x128xf32>
    %31 = math.tanh %30 : vector<8x128xf32>
    %32 = arith.subf %3, %31 : vector<8x128xf32>
    %33 = arith.mulf %26, %32 : vector<8x128xf32>
    %34 = arith.addf %31, %33 : vector<8x128xf32>
    %c0_11 = arith.constant 0 : index
    %c0_12 = arith.constant 0 : index
    %35 = vector.load %arg7[%c0_11, %c0_12] : memref<8x128xf32, #tpu.memory_space<vmem>>, vector<8x128xf32>
    tpu.vector_store %arg7[%c0_11, %c0_12], %34 {strides = array<i32>} : memref<8x128xf32, #tpu.memory_space<vmem>>, vector<8x128xf32>,
    %c0_13 = arith.constant 0 : index
    %c0_14 = arith.constant 0 : index
    %c0_15 = arith.constant 0 : index
    %36 = vector.load %arg6[%c0_13, %c0_14, %c0_15] : memref<1x8x128xf32, #tpu.memory_space<vmem>>, vector<1x8x128xf32>
    %37 = vector.shape_cast %36 : vector<1x8x128xf32> to vector<8x128xf32>
    %38 = vector.shape_cast %34 : vector<8x128xf32> to vector<1x8x128xf32>
    tpu.vector_store %arg6[%c0_13, %c0_14, %c0_15], %38 {strides = array<i32>} : memref<1x8x128xf32, #tpu.memory_space<vmem>>, vector<1x8x128xf32>,
    return
  }
  func.func @transform_0(%arg0: i32, %arg1: i32) -> (i32, i32) {
    %c0_i32 = arith.constant 0 : i32
    %c0_i32_0 = arith.constant 0 : i32
    return %arg0, %c0_i32 : i32, i32
  }
  func.func @transform_1(%arg0: i32, %arg1: i32) -> (i32, i32, i32) {
    %c0_i32 = arith.constant 0 : i32
    %c0_i32_0 = arith.constant 0 : i32
    return %arg1, %arg0, %c0_i32 : i32, i32, i32
  }
  func.func @transform_2(%arg0: i32, %arg1: i32) -> (i32, i32) {
    %c0_i32 = arith.constant 0 : i32
    %c0_i32_0 = arith.constant 0 : i32
    %c0_i32_1 = arith.constant 0 : i32
    return %c0_i32, %c0_i32_0 : i32, i32
  }
  func.func @transform_3(%arg0: i32, %arg1: i32) -> (i32, i32) {
    %c0_i32 = arith.constant 0 : i32
    %c0_i32_0 = arith.constant 0 : i32
    %c0_i32_1 = arith.constant 0 : i32
    return %c0_i32, %c0_i32_0 : i32, i32
  }
  func.func @transform_4(%arg0: i32, %arg1: i32) -> (i32, i32, i32) {
    %c0_i32 = arith.constant 0 : i32
    %c0_i32_0 = arith.constant 0 : i32
    return %arg1, %arg0, %c0_i32 : i32, i32, i32
  }
}

module attributes {stable_mosaic.version = 11 : i64} {
  func.func @_attn_kernel(%arg0: i32, %arg1: memref<1x16x128xf32, #tpu.memory_space<vmem>>, %arg2: memref<1x16x128xf32, #tpu.memory_space<vmem>>, %arg3: memref<128x128xbf16, #tpu.memory_space<vmem>>, %arg4: memref<128x128xbf16, #tpu.memory_space<vmem>>, %arg5: memref<128x128xbf16, #tpu.memory_space<vmem>>, %arg6: memref<1x16x128xf32, #tpu.memory_space<vmem>>) attributes {dimension_semantics = [#tpu.dimension_semantics<parallel>], iteration_bounds = array<i64: 8>, scalar_prefetch = 0 : i64, scratch_operands = 0 : i64, tpu.core_type = #tpu.core_type<tc>, window_params = [{transform_indices = @transform_0, window_bounds = array<i64: 1, 16, 128>}, {transform_indices = @transform_1, window_bounds = array<i64: 1, 16, 128>}, {pipeline_mode = #tpu.pipeline_mode<synchronous>, transform_indices = @transform_2, window_bounds = array<i64: 128, 128>}, {pipeline_mode = #tpu.pipeline_mode<synchronous>, transform_indices = @transform_3, window_bounds = array<i64: 128, 128>}, {pipeline_mode = #tpu.pipeline_mode<synchronous>, transform_indices = @transform_4, window_bounds = array<i64: 128, 128>}, {transform_indices = @transform_5, window_bounds = array<i64: 1, 16, 128>}]} {
    %c0 = arith.constant 0 : index
    %c0_0 = arith.constant 0 : index
    %c0_1 = arith.constant 0 : index
    %0 = vector.load %arg1[%c0, %c0_0, %c0_1] : memref<1x16x128xf32, #tpu.memory_space<vmem>>, vector<1x16x128xf32>
    %1 = vector.shape_cast %0 : vector<1x16x128xf32> to vector<16x128xf32>
    %c0_2 = arith.constant 0 : index
    %c0_3 = arith.constant 0 : index
    %c0_4 = arith.constant 0 : index
    %2 = vector.load %arg2[%c0_2, %c0_3, %c0_4] : memref<1x16x128xf32, #tpu.memory_space<vmem>>, vector<1x16x128xf32>
    %3 = vector.shape_cast %2 : vector<1x16x128xf32> to vector<16x128xf32>
    %4 = arith.truncf %1 : vector<16x128xf32> to vector<16x128xbf16>
    %5 = arith.truncf %3 : vector<16x128xf32> to vector<16x128xbf16>
    %c0_5 = arith.constant 0 : index
    %c0_6 = arith.constant 0 : index
    %6 = vector.load %arg3[%c0_5, %c0_6] : memref<128x128xbf16, #tpu.memory_space<vmem>>, vector<128x128xbf16>
    %cst = arith.constant dense<0.000000e+00> : vector<16x128xf32>
    %7 = tpu.matmul %4, %6, %cst {dimension_numbers = #tpu.dot_dimension_numbers<[1], [0], [0], [1], [0, 0, 1, 1], [], []>} : vector<16x128xbf16>, vector<128x128xbf16>, vector<16x128xf32> -> vector<16x128xf32>
    %8 = arith.truncf %7 : vector<16x128xf32> to vector<16x128xbf16>
    %cst_7 = arith.constant dense<0.000000e+00> : vector<16x16xf32>
    %9 = tpu.matmul %8, %5, %cst_7 {dimension_numbers = #tpu.dot_dimension_numbers<[1], [1], [0], [0], [0, 0, 1, 0], [], []>} : vector<16x128xbf16>, vector<16x128xbf16>, vector<16x16xf32> -> vector<16x16xf32>
    %cst_8 = arith.constant dense<0xFF800000> : vector<16xf32>
    %10 = vector.multi_reduction <maximumf>, %9, %cst_8 [1] : vector<16x16xf32> to vector<16xf32>
    %11 = vector.shape_cast %10 : vector<16xf32> to vector<16x1xf32>
    %12 = vector.broadcast %11 : vector<16x1xf32> to vector<16x16xf32>
    %13 = arith.subf %9, %12 : vector<16x16xf32>
    %14 = math.exp %13 : vector<16x16xf32>
    %cst_9 = arith.constant dense<0.000000e+00> : vector<16xf32>
    %15 = vector.multi_reduction <add>, %14, %cst_9 [1] : vector<16x16xf32> to vector<16xf32>
    %16 = vector.shape_cast %15 : vector<16xf32> to vector<16x1xf32>
    %17 = vector.broadcast %16 : vector<16x1xf32> to vector<16x16xf32>
    %18 = arith.divf %14, %17 : vector<16x16xf32>
    %19 = arith.truncf %18 : vector<16x16xf32> to vector<16x16xbf16>
    %cst_10 = arith.constant dense<0.000000e+00> : vector<16x128xf32>
    %20 = tpu.matmul %19, %5, %cst_10 {dimension_numbers = #tpu.dot_dimension_numbers<[1], [0], [0], [1], [0, 0, 1, 1], [], []>} : vector<16x16xbf16>, vector<16x128xbf16>, vector<16x128xf32> -> vector<16x128xf32>
    %21 = arith.truncf %20 : vector<16x128xf32> to vector<16x128xbf16>
    %c0_11 = arith.constant 0 : index
    %c0_12 = arith.constant 0 : index
    %22 = vector.load %arg4[%c0_11, %c0_12] : memref<128x128xbf16, #tpu.memory_space<vmem>>, vector<128x128xbf16>
    %cst_13 = arith.constant dense<0.000000e+00> : vector<16x128xf32>
    %23 = tpu.matmul %21, %22, %cst_13 {dimension_numbers = #tpu.dot_dimension_numbers<[1], [0], [0], [1], [0, 0, 1, 1], [], []>} : vector<16x128xbf16>, vector<128x128xbf16>, vector<16x128xf32> -> vector<16x128xf32>
    %c0_14 = arith.constant 0 : index
    %c0_15 = arith.constant 0 : index
    %24 = vector.load %arg5[%c0_14, %c0_15] : memref<128x128xbf16, #tpu.memory_space<vmem>>, vector<128x128xbf16>
    %cst_16 = arith.constant dense<0.000000e+00> : vector<16x128xf32>
    %25 = tpu.matmul %4, %24, %cst_16 {dimension_numbers = #tpu.dot_dimension_numbers<[1], [0], [0], [1], [0, 0, 1, 1], [], []>} : vector<16x128xbf16>, vector<128x128xbf16>, vector<16x128xf32> -> vector<16x128xf32>
    %26 = arith.addf %23, %25 : vector<16x128xf32>
    %27 = math.tanh %26 : vector<16x128xf32>
    %c0_17 = arith.constant 0 : index
    %c0_18 = arith.constant 0 : index
    %c0_19 = arith.constant 0 : index
    %28 = vector.load %arg6[%c0_17, %c0_18, %c0_19] : memref<1x16x128xf32, #tpu.memory_space<vmem>>, vector<1x16x128xf32>
    %29 = vector.shape_cast %28 : vector<1x16x128xf32> to vector<16x128xf32>
    %30 = vector.shape_cast %27 : vector<16x128xf32> to vector<1x16x128xf32>
    tpu.vector_store %arg6[%c0_17, %c0_18, %c0_19], %30 {strides = array<i32>} : memref<1x16x128xf32, #tpu.memory_space<vmem>>, vector<1x16x128xf32>,
    return
  }
  func.func @transform_0(%arg0: i32) -> (i32, i32, i32) {
    %c0_i32 = arith.constant 0 : i32
    %c0_i32_0 = arith.constant 0 : i32
    %c0_i32_1 = arith.constant 0 : i32
    return %arg0, %c0_i32, %c0_i32_0 : i32, i32, i32
  }
  func.func @transform_1(%arg0: i32) -> (i32, i32, i32) {
    %c0_i32 = arith.constant 0 : i32
    %c0_i32_0 = arith.constant 0 : i32
    %c0_i32_1 = arith.constant 0 : i32
    return %arg0, %c0_i32, %c0_i32_0 : i32, i32, i32
  }
  func.func @transform_2(%arg0: i32) -> (i32, i32) {
    %c0_i32 = arith.constant 0 : i32
    %c0_i32_0 = arith.constant 0 : i32
    %c0_i32_1 = arith.constant 0 : i32
    return %c0_i32, %c0_i32_0 : i32, i32
  }
  func.func @transform_3(%arg0: i32) -> (i32, i32) {
    %c0_i32 = arith.constant 0 : i32
    %c0_i32_0 = arith.constant 0 : i32
    %c0_i32_1 = arith.constant 0 : i32
    return %c0_i32, %c0_i32_0 : i32, i32
  }
  func.func @transform_4(%arg0: i32) -> (i32, i32) {
    %c0_i32 = arith.constant 0 : i32
    %c0_i32_0 = arith.constant 0 : i32
    %c0_i32_1 = arith.constant 0 : i32
    return %c0_i32, %c0_i32_0 : i32, i32
  }
  func.func @transform_5(%arg0: i32) -> (i32, i32, i32) {
    %c0_i32 = arith.constant 0 : i32
    %c0_i32_0 = arith.constant 0 : i32
    %c0_i32_1 = arith.constant 0 : i32
    return %arg0, %c0_i32, %c0_i32_0 : i32, i32, i32
  }
}

module attributes {stable_mosaic.version = 11 : i64} {
  func.func @_proj_ce_kernel(%arg0: i32, %arg1: i32, %arg2: memref<128x128xf32, #tpu.memory_space<vmem>>, %arg3: memref<128x1xi32, #tpu.memory_space<vmem>>, %arg4: memref<128x128xbf16, #tpu.memory_space<vmem>>, %arg5: memref<1x128xf32, #tpu.memory_space<vmem>>, %arg6: memref<128x128xf32, #tpu.memory_space<vmem>>, %arg7: memref<128x1xf32, #tpu.memory_space<vmem>>, %arg8: memref<128x1xf32, #tpu.memory_space<vmem>>, %arg9: memref<128x1xf32, #tpu.memory_space<vmem>>, %arg10: memref<128x1xf32, #tpu.memory_space<vmem>>) attributes {dimension_semantics = [#tpu.dimension_semantics<parallel>, #tpu.dimension_semantics<arbitrary>], iteration_bounds = array<i64: 1, 3>, scalar_prefetch = 0 : i64, scratch_operands = 3 : i64, tpu.core_type = #tpu.core_type<tc>, window_params = [{transform_indices = @transform_0, window_bounds = array<i64: 128, 128>}, {transform_indices = @transform_1, window_bounds = array<i64: 128, 1>}, {transform_indices = @transform_2, window_bounds = array<i64: 128, 128>}, {transform_indices = @transform_3, window_bounds = array<i64: 1, 128>}, {transform_indices = @transform_4, window_bounds = array<i64: 128, 128>}, {transform_indices = @transform_5, window_bounds = array<i64: 128, 1>}]} {
    %c0_i32 = arith.constant 0 : i32
    %0 = arith.cmpi eq, %arg1, %c0_i32 : i32
    %1 = arith.extui %0 : i1 to i32
    %c0_i32_0 = arith.constant 0 : i32
    %2 = arith.cmpi ne, %1, %c0_i32_0 : i32
    scf.if %2 {
      %cst_27 = arith.constant 0xFF800000 : f32
      %44 = vector.broadcast %cst_27 : f32 to vector<128x1xf32>
      %c0_28 = arith.constant 0 : index
      %c0_29 = arith.constant 0 : index
      %45 = vector.load %arg8[%c0_28, %c0_29] : memref<128x1xf32, #tpu.memory_space<vmem>>, vector<128x1xf32>
      tpu.vector_store %arg8[%c0_28, %c0_29], %44 {strides = array<i32>} : memref<128x1xf32, #tpu.memory_space<vmem>>, vector<128x1xf32>,
      %cst_30 = arith.constant 0.000000e+00 : f32
      %46 = vector.broadcast %cst_30 : f32 to vector<128x1xf32>
      %c0_31 = arith.constant 0 : index
      %c0_32 = arith.constant 0 : index
      %47 = vector.load %arg9[%c0_31, %c0_32] : memref<128x1xf32, #tpu.memory_space<vmem>>, vector<128x1xf32>
      tpu.vector_store %arg9[%c0_31, %c0_32], %46 {strides = array<i32>} : memref<128x1xf32, #tpu.memory_space<vmem>>, vector<128x1xf32>,
      %cst_33 = arith.constant 0.000000e+00 : f32
      %48 = vector.broadcast %cst_33 : f32 to vector<128x1xf32>
      %c0_34 = arith.constant 0 : index
      %c0_35 = arith.constant 0 : index
      %49 = vector.load %arg10[%c0_34, %c0_35] : memref<128x1xf32, #tpu.memory_space<vmem>>, vector<128x1xf32>
      tpu.vector_store %arg10[%c0_34, %c0_35], %48 {strides = array<i32>} : memref<128x1xf32, #tpu.memory_space<vmem>>, vector<128x1xf32>,
    } else {
    }
    %c0 = arith.constant 0 : index
    %c0_1 = arith.constant 0 : index
    %3 = vector.load %arg2[%c0, %c0_1] : memref<128x128xf32, #tpu.memory_space<vmem>>, vector<128x128xf32>
    %4 = arith.truncf %3 : vector<128x128xf32> to vector<128x128xbf16>
    %c0_2 = arith.constant 0 : index
    %c0_3 = arith.constant 0 : index
    %5 = vector.load %arg4[%c0_2, %c0_3] : memref<128x128xbf16, #tpu.memory_space<vmem>>, vector<128x128xbf16>
    %cst = arith.constant dense<0.000000e+00> : vector<128x128xf32>
    %6 = tpu.matmul %4, %5, %cst {dimension_numbers = #tpu.dot_dimension_numbers<[1], [0], [0], [1], [0, 0, 1, 1], [], []>} : vector<128x128xbf16>, vector<128x128xbf16>, vector<128x128xf32> -> vector<128x128xf32>
    %c0_4 = arith.constant 0 : index
    %c0_5 = arith.constant 0 : index
    %7 = vector.load %arg5[%c0_4, %c0_5] : memref<1x128xf32, #tpu.memory_space<vmem>>, vector<1x128xf32>
    %8 = vector.broadcast %7 : vector<1x128xf32> to vector<128x128xf32>
    %9 = arith.addf %6, %8 : vector<128x128xf32>
    %c0_6 = arith.constant 0 : index
    %c0_7 = arith.constant 0 : index
    %10 = vector.load %arg6[%c0_6, %c0_7] : memref<128x128xf32, #tpu.memory_space<vmem>>, vector<128x128xf32>
    tpu.vector_store %arg6[%c0_6, %c0_7], %9 {strides = array<i32>} : memref<128x128xf32, #tpu.memory_space<vmem>>, vector<128x128xf32>,
    %c0_8 = arith.constant 0 : index
    %c0_9 = arith.constant 0 : index
    %11 = vector.load %arg3[%c0_8, %c0_9] : memref<128x1xi32, #tpu.memory_space<vmem>>, vector<128x1xi32>
    %12 = tpu.iota {dimensions = array<i32: 1>} : vector<128x128xi32>
    %c128_i32 = arith.constant 128 : i32
    %13 = arith.muli %arg1, %c128_i32 : i32
    %14 = vector.broadcast %13 : i32 to vector<128x128xi32>
    %15 = arith.addi %12, %14 : vector<128x128xi32>
    %c0_10 = arith.constant 0 : index
    %c0_11 = arith.constant 0 : index
    %16 = vector.load %arg10[%c0_10, %c0_11] : memref<128x1xf32, #tpu.memory_space<vmem>>, vector<128x1xf32>
    %17 = vector.broadcast %11 : vector<128x1xi32> to vector<128x128xi32>
    %18 = arith.cmpi eq, %15, %17 : vector<128x128xi32>
    %cst_12 = arith.constant 0.000000e+00 : f32
    %19 = vector.broadcast %cst_12 : f32 to vector<128x128xf32>
    %20 = arith.select %18, %9, %19 : vector<128x128xi1>, vector<128x128xf32>
    %cst_13 = arith.constant dense<0.000000e+00> : vector<128xf32>
    %21 = vector.multi_reduction <add>, %20, %cst_13 [1] : vector<128x128xf32> to vector<128xf32>
    %22 = vector.shape_cast %21 : vector<128xf32> to vector<128x1xf32>
    %23 = arith.addf %16, %22 : vector<128x1xf32>
    %c0_14 = arith.constant 0 : index
    %c0_15 = arith.constant 0 : index
    %24 = vector.load %arg10[%c0_14, %c0_15] : memref<128x1xf32, #tpu.memory_space<vmem>>, vector<128x1xf32>
    tpu.vector_store %arg10[%c0_14, %c0_15], %23 {strides = array<i32>} : memref<128x1xf32, #tpu.memory_space<vmem>>, vector<128x1xf32>,
    %c0_16 = arith.constant 0 : index
    %c0_17 = arith.constant 0 : index
    %25 = vector.load %arg8[%c0_16, %c0_17] : memref<128x1xf32, #tpu.memory_space<vmem>>, vector<128x1xf32>
    %cst_18 = arith.constant dense<0xFF800000> : vector<128xf32>
    %26 = vector.multi_reduction <maximumf>, %9, %cst_18 [1] : vector<128x128xf32> to vector<128xf32>
    %27 = vector.shape_cast %26 : vector<128xf32> to vector<128x1xf32>
    %28 = arith.maximumf %25, %27 : vector<128x1xf32>
    %c0_19 = arith.constant 0 : index
    %c0_20 = arith.constant 0 : index
    %29 = vector.load %arg9[%c0_19, %c0_20] : memref<128x1xf32, #tpu.memory_space<vmem>>, vector<128x1xf32>
    %30 = arith.subf %25, %28 : vector<128x1xf32>
    %31 = math.exp %30 : vector<128x1xf32>
    %32 = arith.mulf %29, %31 : vector<128x1xf32>
    %33 = vector.broadcast %28 : vector<128x1xf32> to vector<128x128xf32>
    %34 = arith.subf %9, %33 : vector<128x128xf32>
    %35 = math.exp %34 : vector<128x128xf32>
    %cst_21 = arith.constant dense<0.000000e+00> : vector<128xf32>
    %36 = vector.multi_reduction <add>, %35, %cst_21 [1] : vector<128x128xf32> to vector<128xf32>
    %37 = vector.shape_cast %36 : vector<128xf32> to vector<128x1xf32>
    %38 = arith.addf %32, %37 : vector<128x1xf32>
    %c0_22 = arith.constant 0 : index
    %c0_23 = arith.constant 0 : index
    %39 = vector.load %arg9[%c0_22, %c0_23] : memref<128x1xf32, #tpu.memory_space<vmem>>, vector<128x1xf32>
    tpu.vector_store %arg9[%c0_22, %c0_23], %38 {strides = array<i32>} : memref<128x1xf32, #tpu.memory_space<vmem>>, vector<128x1xf32>,
    %c0_24 = arith.constant 0 : index
    %c0_25 = arith.constant 0 : index
    %40 = vector.load %arg8[%c0_24, %c0_25] : memref<128x1xf32, #tpu.memory_space<vmem>>, vector<128x1xf32>
    tpu.vector_store %arg8[%c0_24, %c0_25], %28 {strides = array<i32>} : memref<128x1xf32, #tpu.memory_space<vmem>>, vector<128x1xf32>,
    %c2_i32 = arith.constant 2 : i32
    %41 = arith.cmpi eq, %arg1, %c2_i32 : i32
    %42 = arith.extui %41 : i1 to i32
    %c0_i32_26 = arith.constant 0 : i32
    %43 = arith.cmpi ne, %42, %c0_i32_26 : i32
    scf.if %43 {
      %c0_27 = arith.constant 0 : index
      %c0_28 = arith.constant 0 : index
      %44 = vector.load %arg8[%c0_27, %c0_28] : memref<128x1xf32, #tpu.memory_space<vmem>>, vector<128x1xf32>
      %c0_29 = arith.constant 0 : index
      %c0_30 = arith.constant 0 : index
      %45 = vector.load %arg9[%c0_29, %c0_30] : memref<128x1xf32, #tpu.memory_space<vmem>>, vector<128x1xf32>
      %46 = math.log %45 : vector<128x1xf32>
      %47 = arith.addf %44, %46 : vector<128x1xf32>
      %c0_i32_31 = arith.constant 0 : i32
      %48 = vector.broadcast %c0_i32_31 : i32 to vector<128x1xi32>
      %49 = arith.cmpi eq, %11, %48 : vector<128x1xi32>
      %c0_32 = arith.constant 0 : index
      %c0_33 = arith.constant 0 : index
      %50 = vector.load %arg10[%c0_32, %c0_33] : memref<128x1xf32, #tpu.memory_space<vmem>>, vector<128x1xf32>
      %51 = arith.subf %47, %50 : vector<128x1xf32>
      %cst_34 = arith.constant 0.000000e+00 : f32
      %52 = vector.broadcast %cst_34 : f32 to vector<128x1xf32>
      %53 = arith.select %49, %52, %51 : vector<128x1xi1>, vector<128x1xf32>
      %c0_35 = arith.constant 0 : index
      %c0_36 = arith.constant 0 : index
      %54 = vector.load %arg7[%c0_35, %c0_36] : memref<128x1xf32, #tpu.memory_space<vmem>>, vector<128x1xf32>
      tpu.vector_store %arg7[%c0_35, %c0_36], %53 {strides = array<i32>} : memref<128x1xf32, #tpu.memory_space<vmem>>, vector<128x1xf32>,
    } else {
    }
    return
  }
  func.func @transform_0(%arg0: i32, %arg1: i32) -> (i32, i32) {
    %c0_i32 = arith.constant 0 : i32
    %c0_i32_0 = arith.constant 0 : i32
    return %arg0, %c0_i32 : i32, i32
  }
  func.func @transform_1(%arg0: i32, %arg1: i32) -> (i32, i32) {
    %c0_i32 = arith.constant 0 : i32
    %c0_i32_0 = arith.constant 0 : i32
    return %arg0, %c0_i32 : i32, i32
  }
  func.func @transform_2(%arg0: i32, %arg1: i32) -> (i32, i32) {
    %c0_i32 = arith.constant 0 : i32
    %c0_i32_0 = arith.constant 0 : i32
    return %c0_i32, %arg1 : i32, i32
  }
  func.func @transform_3(%arg0: i32, %arg1: i32) -> (i32, i32) {
    %c0_i32 = arith.constant 0 : i32
    %c0_i32_0 = arith.constant 0 : i32
    return %c0_i32, %arg1 : i32, i32
  }
  func.func @transform_4(%arg0: i32, %arg1: i32) -> (i32, i32) {
    %c0_i32 = arith.constant 0 : i32
    return %arg0, %arg1 : i32, i32
  }
  func.func @transform_5(%arg0: i32, %arg1: i32) -> (i32, i32) {
    %c0_i32 = arith.constant 0 : i32
    %c0_i32_0 = arith.constant 0 : i32
    return %arg0, %c0_i32 : i32, i32
  }
}

</mosaic_0001>

<bundles_post_ra>
// kernel: seq2seq_forward.8
= control target key start
LH: loop header
LB: loop body
LE: loop exit
PB: predicated region body
PF: predicated region fallthrough
CT: control target
= control target key end

     0   :  { %s727_s12 = smov 0   ;;  %s729_s13 = smov 0   ;;  %s923_s0 = inlined_call_operand.vmem [shape: f32[16,8,384], index: 0, kind: input, shape index: {}]   ;;  %s924_s1 = inlined_call_operand.vmem [shape: f32[128,384], index: 1, kind: input, shape index: {}]   ;;  %s925_s2 = inlined_call_operand.vmem [shape: f32[1,384], index: 2, kind: input, shape index: {}]   ;;  %s926_s3 = inlined_call_operand.vmem [shape: f32[16,8,128], index: 3, kind: output, shape index: {}]  }
   0x1   :  { %s731_s14 = smov 0  }
   0x2 LB: > { %s22_s15 = sadd.s32 1, %s697_s13  ;;  %p524_p0 = scmp.ge.s32.totalorder %s701_s14, 1  ;;  %s701_s14 = sphi %s731_s14, %s13_s14   ;;  %s697_s13 = sphi %s729_s13, %s928_s13   ;;  %s693_s12 = sphi %s727_s12, %s927_s12  }
   0x3   : > { %p23_p1 = scmp.ge.s32.totalorder %s22_s15, 16  ;;  %p157_p2 = scmp.lt.s32.totalorder %s701_s14, 17 }
   0x5   : > { %s930_s15 = smov (%p23_p1, %s22_s15), 0  ;;  %p158_p3 = pnand %p524_p0, %p157_p2 }
   0x6   : > { %p187_p4 = scmp.lt.s32.totalorder (!%p158_p3), %s693_s12, 15  ;;  %p527_p5 = scmp.ne.s32.totalorder (!%p158_p3), %s693_s12, 0 }
   0x7   : > { %161 = sbr.rel (%p158_p3) target bundleno = 321 (0x141), region = 32 }
   0xe   : > { %s188_s16 = scalar_select %p187_p4, %s693_s12, 15 }
   0xf   : > { %206 = sbr.rel (%p527_p5) target bundleno = 22 (0x16), region = 36  ;;  %v703_v0 = vmov (!%p527_p5), 0.0  }
  0x10   : > { %s640_s17 = smul.u32 24, %s188_s16  ;;  %s526_s18 = sshll.u32 %s188_s16, 3  ;;  %207 = vst [vmem:[#allocation2] sm:$0xff] (!%p527_p5), %v703_v0 }
  0x11   : > { %s748_s21 = scalar_lea.vmem %s926_s3, %s526_s18 }
  0x12   : > { %s753_s24 = scalar_lea.vmem %s923_s0, %s640_s17 }
  0x16 PF: > { %v210_v1 = vld [vmem:[%s924_s1 + $0x8] sm:$0xff]  ;;  %v213_v2 = vld [vmem:[%s924_s1 + $0x20] sm:$0xff]  ;;  %v212_v5 = vld [vmem:[%s924_s1 + $0x18] sm:$0xff]  ;;  %v704_v8 = vmov 0.0|0.0   ;;  %v705_v9 = vmov 0.0   ;;  %vm706_vm0 = vmmov 0  }
  0x17   : > { %v209_v3 = vld [vmem:[%s924_s1] sm:$0xff]  ;;  %v584_v4 = vpack.c.bf16 %v213_v2, %v210_v1  ;;  %v216_v6 = vld [vmem:[%s924_s1 + $0x38] sm:$0xff]  ;;  %v219_v7 = vld [vmem:[%s924_s1 + $0x50] sm:$0xff]  ;;  %616 = vmatprep.subr.bf16.mxu1 %v704_v8  ;;  %338 = vmatprep.mubr.f32.mxu0 %v705_v9 }
  0x18   : > { %v586_v10 = vpack.c.bf16 %v212_v5, %v209_v3  ;;  %v588_v11 = vpack.c.bf16 %v219_v7, %v216_v6  ;;  %v215_v12 = vld [vmem:[%s924_s1 + $0x30] sm:$0xff]  ;;  %v218_v13 = vld [vmem:[%s924_s1 + $0x48] sm:$0xff]  ;;  %581 = vmatprep.mubr.msk.f32.mxu1 %vm706_vm0, %v705_v9  ;;  %v225_v15 = vld [vmem:[%s924_s1 + $0x80] sm:$0xff] }
  0x19   : > { %v222_v14 = vld [vmem:[%s924_s1 + $0x68] sm:$0xff]  ;;  %585 = vmatprep.subr.bf16.mxu0 %v584_v4  ;;  %v590_v16 = vpack.c.bf16 %v218_v13, %v215_v12  ;;  %v221_v18 = vld [vmem:[%s924_s1 + $0x60] sm:$0xff]  ;;  %v224_v19 = vld [vmem:[%s924_s1 + $0x78] sm:$0xff]  ;;  %v259_v13 = vlaneseq }
  0x1a   : > { %587 = vmatpush1.bf16.msra.mxu0 %v586_v10  ;;  %v592_v17 = vpack.c.bf16 %v225_v15, %v222_v14  ;;  %v228_v20 = vld [vmem:[%s924_s1 + $0x98] sm:$0xff]  ;;  %v231_v21 = vld [vmem:[%s924_s1 + $0xb0] sm:$0xff]  ;;  %v594_v22 = vpack.c.bf16 %v224_v19, %v221_v18  ;;  %v230_v25 = vld [vmem:[%s924_s1 + $0xa8] sm:$0xff] }
  0x1b   : > { %589 = vmatprep.subr.bf16.mxu0 %v588_v11  ;;  %v596_v23 = vpack.c.bf16 %v231_v21, %v228_v20  ;;  %v227_v24 = vld [vmem:[%s924_s1 + $0x90] sm:$0xff]  ;;  %v234_v26 = vld [vmem:[%s924_s1 + $0xc8] sm:$0xff]  ;;  %v237_v27 = vld [vmem:[%s924_s1 + $0xe0] sm:$0xff]  ;;  %v260_v14 = vshrl.u32 %v259_v13, 7 }
  0x1c   : > { %v211_v28 = vld [vmem:[%s924_s1 + $0x10] sm:$0xff]  ;;  %v214_v29 = vld [vmem:[%s924_s1 + $0x28] sm:$0xff]  ;;  %v217_v31 = vld [vmem:[%s924_s1 + $0x40] sm:$0xff]  ;;  %v598_v32 = vpack.c.bf16 %v230_v25, %v227_v24  ;;  %v600_v34 = vpack.c.bf16 %v237_v27, %v234_v26 }
  0x1d   : > { %v617_v30 = vpack.c.bf16 %v214_v29, %v211_v28  ;;  %v220_v33 = vld [vmem:[%s924_s1 + $0x58] sm:$0xff]  ;;  %v233_v35 = vld [vmem:[%s924_s1 + $0xc0] sm:$0xff]  ;;  %v243_v39 = vld [vmem:[%s924_s1 + $0x110] sm:$0xff]  ;;  %v261_v15 = vsub.s32 0, %v260_v14  ;;  %v265_v18 = vsub.s32 1, %v260_v14 }
  0x1e   : > { %591 = vmatpush1.bf16.msra.mxu0 %v590_v16  ;;  %v236_v36 = vld [vmem:[%s924_s1 + $0xd8] sm:$0xff]  ;;  %v620_v38 = vpack.c.bf16 %v220_v33, %v217_v31  ;;  %v223_v40 = vld [vmem:[%s924_s1 + $0x70] sm:$0xff]  ;;  %v226_v41 = vld [vmem:[%s924_s1 + $0x88] sm:$0xff]  ;;  %v269_v33 = vsub.s32 2, %v260_v14 }
  0x1f   : > { %593 = vmatprep.subr.bf16.mxu0 %v592_v17  ;;  %v240_v37 = vld [vmem:[%s924_s1 + $0xf8] sm:$0xff]  ;;  %618 = vmatpush3.bf16.msra.mxu1 %v617_v30  ;;  %v602_v42 = vpack.c.bf16 %v236_v36, %v233_v35  ;;  %v239_v44 = vld [vmem:[%s924_s1 + $0xf0] sm:$0xff]  ;;  %v242_v45 = vld [vmem:[%s924_s1 + $0x108] sm:$0xff]  ;;  %v623_v47 = vpack.c.bf16 %v226_v41, %v223_v40 }
  0x20   : > { %619 = vmatprep.subr.bf16.mxu1 %v704_v8  ;;  %v604_v43 = vpack.c.bf16 %v243_v39, %v240_v37  ;;  %v246_v46 = vld [vmem:[%s924_s1 + $0x128] sm:$0xff]  ;;  %v249_v48 = vld [vmem:[%s924_s1 + $0x140] sm:$0xff]  ;;  %v232_v50 = vld [vmem:[%s924_s1 + $0xb8] sm:$0xff]  ;;  %v606_v51 = vpack.c.bf16 %v242_v45, %v239_v44 }
  0x21   : > { %v229_v49 = vld [vmem:[%s924_s1 + $0xa0] sm:$0xff]  ;;  %v608_v52 = vpack.c.bf16 %v249_v48, %v246_v46  ;;  %v248_v54 = vld [vmem:[%s924_s1 + $0x138] sm:$0xff]  ;;  %v255_v57 = vld [vmem:[%s924_s1 + $0x170] sm:$0xff] }
  0x22   : > { %595 = vmatpush1.bf16.msra.mxu0 %v594_v22  ;;  %v245_v53 = vld [vmem:[%s924_s1 + $0x120] sm:$0xff]  ;;  %v252_v55 = vld [vmem:[%s924_s1 + $0x158] sm:$0xff]  ;;  %v626_v56 = vpack.c.bf16 %v232_v50, %v229_v49  ;;  %v235_v58 = vld [vmem:[%s924_s1 + $0xd0] sm:$0xff] }
  0x23   : > { %597 = vmatprep.subr.bf16.mxu0 %v596_v23  ;;  %621 = vmatpush3.bf16.msra.mxu1 %v620_v38  ;;  %v238_v59 = vld [vmem:[%s924_s1 + $0xe8] sm:$0xff]  ;;  %v610_v60 = vpack.c.bf16 %v248_v54, %v245_v53  ;;  %v612_v61 = vpack.c.bf16 %v255_v57, %v252_v55  ;;  %v251_v62 = vld [vmem:[%s924_s1 + $0x150] sm:$0xff]  ;;  %v241_v1 = vld [vmem:[%s924_s1 + $0x100] sm:$0xff] }
  0x24   : > { %622 = vmatprep.subr.bf16.mxu1 %v704_v8  ;;  %v254_v63 = vld [vmem:[%s924_s1 + $0x168] sm:$0xff]  ;;  %v629_v0 = vpack.c.bf16 %v238_v59, %v235_v58  ;;  %v244_v2 = vld [vmem:[%s924_s1 + $0x118] sm:$0xff]  ;;  %v247_v5 = vld [vmem:[%s924_s1 + $0x130] sm:$0xff] }
  0x25   : > { %v614_v3 = vpack.c.bf16 %v254_v63, %v251_v62  ;;  %v632_v4 = vpack.c.bf16 %v244_v2, %v241_v1  ;;  %v250_v6 = vld [vmem:[%s924_s1 + $0x148] sm:$0xff]  ;;  %v208_v7 = vld [vmem:[#allocation2] sm:$0xff]  ;;  %v256_v11 = vld [vmem:[%s924_s1 + $0x178] sm:$0xff] }
  0x26   : > { %599 = vmatpush1.bf16.msra.mxu0 %v598_v32  ;;  %v635_v9 = vpack.c.bf16 %v250_v6, %v247_v5  ;;  %v253_v10 = vld [vmem:[%s924_s1 + $0x160] sm:$0xff]  ;;  %v416_v26 = vld [vmem:[%s753_s24 + $0x8] sm:$0xff]  ;;  %v417_v38 = vld [vmem:[%s753_s24 + $0x10] sm:$0xff] }
  0x27   : > { %601 = vmatprep.subr.bf16.mxu0 %v600_v34  ;;  %624 = vmatpush3.bf16.msra.mxu1 %v623_v47  ;;  %v638_v12 = vpack.c.bf16 %v256_v11, %v253_v10  ;;  %v257_v16 = vld [vmem:[%s925_s2] sm:$0x7] }
  0x28   : > { %625 = vmatprep.subr.bf16.mxu1 %v704_v8  ;;  %v262_v17 = vrot.slane %v257_v16, %v261_v15  ;;  %v415_v20 = vld [vmem:[%s753_s24] sm:$0xff]  ;;  %v266_v24 = vrot.slane %v257_v16, %v265_v18  ;;  %v270_v34 = vrot.slane %v257_v16, %v269_v33 }
  0x2a   : > { %603 = vmatpush1.bf16.msra.mxu0 %v602_v42 }
  0x2b   : > { %605 = vmatprep.subr.bf16.mxu0 %v604_v43  ;;  %627 = vmatpush3.bf16.msra.mxu1 %v626_v56 }
  0x2c   : > { %628 = vmatprep.subr.bf16.mxu1 %v704_v8 }
  0x2e   : > { %607 = vmatpush1.bf16.msra.mxu0 %v606_v51 }
  0x2f   : > { %609 = vmatprep.subr.bf16.mxu0 %v608_v52  ;;  %630 = vmatpush3.bf16.msra.mxu1 %v629_v0 }
  0x30   : > { %631 = vmatprep.subr.bf16.mxu1 %v704_v8 }
  0x32   : > { %611 = vmatpush1.bf16.msra.mxu0 %v610_v60 }
  0x33   : > { %613 = vmatprep.subr.bf16.mxu0 %v612_v61  ;;  %633 = vmatpush3.bf16.msra.mxu1 %v632_v4 }
  0x34   : > { %634 = vmatprep.subr.bf16.mxu1 %v704_v8 }
  0x36   : > { %615 = vmatpush1.bf16.msra.mxu0 %v614_v3 }
  0x37   : > { %636 = vmatpush3.bf16.msra.mxu1 %v635_v9 }
  0x38   : > { %637 = vmatprep.subr.bf16.mxu1 %v704_v8 }
  0x39   : > { %339 = vmatmul.mubr.f32.vlgmr.msra.gmra.mrb[0].mxu0 %v208_v7 }
  0x3b   : > { %639 = vmatpush3.bf16.msra.mxu1 %v638_v12 }
  0x3e   : > { %582 = vmatmul.mubr.f32.vlgmr.msra.gmra.mrb[0].mxu1 %v208_v7 }
 0x10c   : > { %v340_v19 = vpop.f32.mrb[0].mxu0 }
 0x10d   : > { %v341_v21 = vadd.f32 %v340_v19, %v262_v17  ;;  %v342_v22 = vpop.f32.mrb[1].mxu0 }
 0x10e   : > { %v343_v8 = vadd.f32 %v342_v22, %v266_v24 }
 0x10f   : > { %v418_v23 = vadd.f32 %v415_v20, %v341_v21 }
 0x110   : > { %v425_v29 = vadd.f32 %v416_v26, %v343_v8 }
 0x111   : > { %v528_v25 = vmul.f32 -1.442695, %v418_v23  ;;  %v411_v27 = vpop.f32.mrb[0].mxu1 }
 0x112   : > { %v583_v28 = vpop.f32.mrb[1].mxu1  ;;  %v529_v30 = vmul.f32 -1.442695, %v425_v29  ;;  %v412_v35 = vadd.f32 %v411_v27, %v270_v34 }
 0x113   : > { %669 = vpow2.f32 %v528_v25 }
 0x114   : > { %671 = vpow2.f32 %v529_v30 }
 0x11d   : > { %v670_v31 = vpop.eup %669 }
 0x11e   : > { %v422_v32 = vadd.f32 1.0, %v670_v31  ;;  %v672_v36 = vpop.eup %671 }
 0x11f   : > { %v429_v40 = vadd.f32 1.0, %v672_v36 }
 0x120   : > { %673 = vrcp.f32 %v422_v32 }
 0x12a   : > { %v674_v37 = vpop.eup %673 }
 0x12b   : > { %v432_v39 = vmul.f32 %v674_v37, %v412_v35 }
 0x12d   : > { %v433_v41 = vadd.f32 %v432_v39, %v417_v38 }
 0x12f   : > { %675 = vtanh.f32 %v433_v41 }
 0x130   : > { %677 = vrcp.f32 %v429_v40 }
 0x139   : > { %v676_v42 = vpop.eup %675 }
 0x13a   : > { %v435_v43 = vsub.f32 %v208_v7, %v676_v42  ;;  %v678_v44 = vpop.eup %677 }
 0x13c   : > { %v436_v45 = vmul.f32 %v678_v44, %v435_v43 }
 0x13e   : > { %v437_v46 = vadd.f32 %v676_v42, %v436_v45 }
 0x140   : > { %438 = vst [vmem:[#allocation2] sm:$0xff] %v437_v46  ;;  %439 = vst [vmem:[%s748_s21] sm:$0xff] %v437_v46 }
 0x141 PF: > { %s13_s14 = sadd.s32 1, %s701_s14   ;;  %s927_s12 = smov %s697_s13 }
 0x142   : > { %p10_p6 = scmp.ge.s32.totalorder %s13_s14, 18   ;;  %s928_s13 = smov %s930_s15 }
 0x144   :  { %12 = sbr.rel (!%p10_p6) target bundleno = 2 (0x2), region = 66 }

// kernel: seq2seq_forward.9
= control target key start
LH: loop header
LB: loop body
LE: loop exit
PB: predicated region body
PF: predicated region fallthrough
CT: control target
= control target key end

     0   :  { %s792_s15 = smov 0   ;;  %s794_s16 = smov 0   ;;  %s991_s0 = inlined_call_operand.vmem [shape: f32[8,128], index: 0, kind: input, shape index: {}]   ;;  %s992_s1 = inlined_call_operand.vmem [shape: f32[16,8,384], index: 1, kind: input, shape index: {}]   ;;  %s993_s2 = inlined_call_operand.vmem [shape: f32[128,384], index: 2, kind: input, shape index: {}]   ;;  %s994_s3 = inlined_call_operand.vmem [shape: f32[1,384], index: 3, kind: input, shape index: {}]   ;;  %s995_s4 = inlined_call_operand.vmem [shape: f32[16,8,128], index: 4, kind: output, shape index: {}]  }
   0x1   :  { %s796_s17 = smov 0  }
   0x2 LB: > { %s23_s18 = sadd.s32 1, %s758_s16  ;;  %p586_p0 = scmp.ge.s32.totalorder %s762_s17, 1  ;;  %s762_s17 = sphi %s796_s17, %s14_s17   ;;  %s758_s16 = sphi %s794_s16, %s997_s16   ;;  %s754_s15 = sphi %s792_s15, %s996_s15  }
   0x3   : > { %p24_p1 = scmp.ge.s32.totalorder %s23_s18, 16  ;;  %p191_p2 = scmp.lt.s32.totalorder %s762_s17, 17 }
   0x5   : > { %s999_s18 = smov (%p24_p1, %s23_s18), 0  ;;  %p192_p3 = pnand %p586_p0, %p191_p2 }
   0x6   : > { %p231_p4 = scmp.lt.s32.totalorder (!%p192_p3), %s754_s15, 15  ;;  %p589_p5 = scmp.ne.s32.totalorder (!%p192_p3), %s754_s15, 0 }
   0x7   : > { %195 = sbr.rel (%p192_p3) target bundleno = 321 (0x141), region = 36 }
   0xe   : > { %s232_s19 = scalar_select %p231_p4, %s754_s15, 15 }
   0xf   : > { %250 = sbr.rel (%p589_p5) target bundleno = 22 (0x16), region = 40  ;;  %v251_v0 = vld [vmem:[%s991_s0] sm:$0xff] (!%p589_p5) }
  0x10   : > { %s702_s20 = smul.u32 24, %s232_s19  ;;  %s588_s21 = sshll.u32 %s232_s19, 3  ;;  %252 = vst [vmem:[#allocation2] sm:$0xff] (!%p589_p5), %v251_v0 }
  0x11   : > { %s813_s24 = scalar_lea.vmem %s995_s4, %s588_s21 }
  0x12   : > { %s818_s27 = scalar_lea.vmem %s992_s1, %s702_s20 }
  0x16 PF: > { %v255_v1 = vld [vmem:[%s993_s2 + $0x8] sm:$0xff]  ;;  %v258_v2 = vld [vmem:[%s993_s2 + $0x20] sm:$0xff]  ;;  %v257_v5 = vld [vmem:[%s993_s2 + $0x18] sm:$0xff]  ;;  %v764_v8 = vmov 0.0|0.0   ;;  %v765_v9 = vmov 0.0   ;;  %vm766_vm0 = vmmov 0  }
  0x17   : > { %v254_v3 = vld [vmem:[%s993_s2] sm:$0xff]  ;;  %v646_v4 = vpack.c.bf16 %v258_v2, %v255_v1  ;;  %v261_v6 = vld [vmem:[%s993_s2 + $0x38] sm:$0xff]  ;;  %v264_v7 = vld [vmem:[%s993_s2 + $0x50] sm:$0xff]  ;;  %678 = vmatprep.subr.bf16.mxu1 %v764_v8  ;;  %383 = vmatprep.mubr.f32.mxu0 %v765_v9 }
  0x18   : > { %v648_v10 = vpack.c.bf16 %v257_v5, %v254_v3  ;;  %v650_v11 = vpack.c.bf16 %v264_v7, %v261_v6  ;;  %v260_v12 = vld [vmem:[%s993_s2 + $0x30] sm:$0xff]  ;;  %v263_v13 = vld [vmem:[%s993_s2 + $0x48] sm:$0xff]  ;;  %643 = vmatprep.mubr.msk.f32.mxu1 %vm766_vm0, %v765_v9  ;;  %v270_v15 = vld [vmem:[%s993_s2 + $0x80] sm:$0xff] }
  0x19   : > { %v267_v14 = vld [vmem:[%s993_s2 + $0x68] sm:$0xff]  ;;  %647 = vmatprep.subr.bf16.mxu0 %v646_v4  ;;  %v652_v16 = vpack.c.bf16 %v263_v13, %v260_v12  ;;  %v266_v18 = vld [vmem:[%s993_s2 + $0x60] sm:$0xff]  ;;  %v269_v19 = vld [vmem:[%s993_s2 + $0x78] sm:$0xff]  ;;  %v304_v13 = vlaneseq }
  0x1a   : > { %649 = vmatpush1.bf16.msra.mxu0 %v648_v10  ;;  %v654_v17 = vpack.c.bf16 %v270_v15, %v267_v14  ;;  %v273_v20 = vld [vmem:[%s993_s2 + $0x98] sm:$0xff]  ;;  %v276_v21 = vld [vmem:[%s993_s2 + $0xb0] sm:$0xff]  ;;  %v656_v22 = vpack.c.bf16 %v269_v19, %v266_v18  ;;  %v275_v25 = vld [vmem:[%s993_s2 + $0xa8] sm:$0xff] }
  0x1b   : > { %651 = vmatprep.subr.bf16.mxu0 %v650_v11  ;;  %v658_v23 = vpack.c.bf16 %v276_v21, %v273_v20  ;;  %v272_v24 = vld [vmem:[%s993_s2 + $0x90] sm:$0xff]  ;;  %v279_v26 = vld [vmem:[%s993_s2 + $0xc8] sm:$0xff]  ;;  %v282_v27 = vld [vmem:[%s993_s2 + $0xe0] sm:$0xff]  ;;  %v305_v14 = vshrl.u32 %v304_v13, 7 }
  0x1c   : > { %v256_v28 = vld [vmem:[%s993_s2 + $0x10] sm:$0xff]  ;;  %v259_v29 = vld [vmem:[%s993_s2 + $0x28] sm:$0xff]  ;;  %v262_v31 = vld [vmem:[%s993_s2 + $0x40] sm:$0xff]  ;;  %v660_v32 = vpack.c.bf16 %v275_v25, %v272_v24  ;;  %v662_v34 = vpack.c.bf16 %v282_v27, %v279_v26 }
  0x1d   : > { %v679_v30 = vpack.c.bf16 %v259_v29, %v256_v28  ;;  %v265_v33 = vld [vmem:[%s993_s2 + $0x58] sm:$0xff]  ;;  %v278_v35 = vld [vmem:[%s993_s2 + $0xc0] sm:$0xff]  ;;  %v288_v39 = vld [vmem:[%s993_s2 + $0x110] sm:$0xff]  ;;  %v306_v15 = vsub.s32 0, %v305_v14  ;;  %v310_v18 = vsub.s32 1, %v305_v14 }
  0x1e   : > { %653 = vmatpush1.bf16.msra.mxu0 %v652_v16  ;;  %v281_v36 = vld [vmem:[%s993_s2 + $0xd8] sm:$0xff]  ;;  %v682_v38 = vpack.c.bf16 %v265_v33, %v262_v31  ;;  %v268_v40 = vld [vmem:[%s993_s2 + $0x70] sm:$0xff]  ;;  %v271_v41 = vld [vmem:[%s993_s2 + $0x88] sm:$0xff]  ;;  %v314_v33 = vsub.s32 2, %v305_v14 }
  0x1f   : > { %655 = vmatprep.subr.bf16.mxu0 %v654_v17  ;;  %v285_v37 = vld [vmem:[%s993_s2 + $0xf8] sm:$0xff]  ;;  %680 = vmatpush3.bf16.msra.mxu1 %v679_v30  ;;  %v664_v42 = vpack.c.bf16 %v281_v36, %v278_v35  ;;  %v284_v44 = vld [vmem:[%s993_s2 + $0xf0] sm:$0xff]  ;;  %v287_v45 = vld [vmem:[%s993_s2 + $0x108] sm:$0xff]  ;;  %v685_v47 = vpack.c.bf16 %v271_v41, %v268_v40 }
  0x20   : > { %681 = vmatprep.subr.bf16.mxu1 %v764_v8  ;;  %v666_v43 = vpack.c.bf16 %v288_v39, %v285_v37  ;;  %v291_v46 = vld [vmem:[%s993_s2 + $0x128] sm:$0xff]  ;;  %v294_v48 = vld [vmem:[%s993_s2 + $0x140] sm:$0xff]  ;;  %v277_v50 = vld [vmem:[%s993_s2 + $0xb8] sm:$0xff]  ;;  %v668_v51 = vpack.c.bf16 %v287_v45, %v284_v44 }
  0x21   : > { %v274_v49 = vld [vmem:[%s993_s2 + $0xa0] sm:$0xff]  ;;  %v670_v52 = vpack.c.bf16 %v294_v48, %v291_v46  ;;  %v293_v54 = vld [vmem:[%s993_s2 + $0x138] sm:$0xff]  ;;  %v300_v57 = vld [vmem:[%s993_s2 + $0x170] sm:$0xff] }
  0x22   : > { %657 = vmatpush1.bf16.msra.mxu0 %v656_v22  ;;  %v290_v53 = vld [vmem:[%s993_s2 + $0x120] sm:$0xff]  ;;  %v297_v55 = vld [vmem:[%s993_s2 + $0x158] sm:$0xff]  ;;  %v688_v56 = vpack.c.bf16 %v277_v50, %v274_v49  ;;  %v280_v58 = vld [vmem:[%s993_s2 + $0xd0] sm:$0xff] }
  0x23   : > { %659 = vmatprep.subr.bf16.mxu0 %v658_v23  ;;  %683 = vmatpush3.bf16.msra.mxu1 %v682_v38  ;;  %v283_v59 = vld [vmem:[%s993_s2 + $0xe8] sm:$0xff]  ;;  %v672_v60 = vpack.c.bf16 %v293_v54, %v290_v53  ;;  %v674_v61 = vpack.c.bf16 %v300_v57, %v297_v55  ;;  %v296_v62 = vld [vmem:[%s993_s2 + $0x150] sm:$0xff]  ;;  %v286_v1 = vld [vmem:[%s993_s2 + $0x100] sm:$0xff] }
  0x24   : > { %684 = vmatprep.subr.bf16.mxu1 %v764_v8  ;;  %v299_v63 = vld [vmem:[%s993_s2 + $0x168] sm:$0xff]  ;;  %v691_v0 = vpack.c.bf16 %v283_v59, %v280_v58  ;;  %v289_v2 = vld [vmem:[%s993_s2 + $0x118] sm:$0xff]  ;;  %v292_v5 = vld [vmem:[%s993_s2 + $0x130] sm:$0xff] }
  0x25   : > { %v676_v3 = vpack.c.bf16 %v299_v63, %v296_v62  ;;  %v694_v4 = vpack.c.bf16 %v289_v2, %v286_v1  ;;  %v295_v6 = vld [vmem:[%s993_s2 + $0x148] sm:$0xff]  ;;  %v253_v7 = vld [vmem:[#allocation2] sm:$0xff]  ;;  %v301_v11 = vld [vmem:[%s993_s2 + $0x178] sm:$0xff] }
  0x26   : > { %661 = vmatpush1.bf16.msra.mxu0 %v660_v32  ;;  %v697_v9 = vpack.c.bf16 %v295_v6, %v292_v5  ;;  %v298_v10 = vld [vmem:[%s993_s2 + $0x160] sm:$0xff]  ;;  %v461_v26 = vld [vmem:[%s818_s27 + $0x8] sm:$0xff]  ;;  %v462_v38 = vld [vmem:[%s818_s27 + $0x10] sm:$0xff] }
  0x27   : > { %663 = vmatprep.subr.bf16.mxu0 %v662_v34  ;;  %686 = vmatpush3.bf16.msra.mxu1 %v685_v47  ;;  %v700_v12 = vpack.c.bf16 %v301_v11, %v298_v10  ;;  %v302_v16 = vld [vmem:[%s994_s3] sm:$0x7] }
  0x28   : > { %687 = vmatprep.subr.bf16.mxu1 %v764_v8  ;;  %v307_v17 = vrot.slane %v302_v16, %v306_v15  ;;  %v460_v20 = vld [vmem:[%s818_s27] sm:$0xff]  ;;  %v311_v24 = vrot.slane %v302_v16, %v310_v18  ;;  %v315_v34 = vrot.slane %v302_v16, %v314_v33 }
  0x2a   : > { %665 = vmatpush1.bf16.msra.mxu0 %v664_v42 }
  0x2b   : > { %667 = vmatprep.subr.bf16.mxu0 %v666_v43  ;;  %689 = vmatpush3.bf16.msra.mxu1 %v688_v56 }
  0x2c   : > { %690 = vmatprep.subr.bf16.mxu1 %v764_v8 }
  0x2e   : > { %669 = vmatpush1.bf16.msra.mxu0 %v668_v51 }
  0x2f   : > { %671 = vmatprep.subr.bf16.mxu0 %v670_v52  ;;  %692 = vmatpush3.bf16.msra.mxu1 %v691_v0 }
  0x30   : > { %693 = vmatprep.subr.bf16.mxu1 %v764_v8 }
  0x32   : > { %673 = vmatpush1.bf16.msra.mxu0 %v672_v60 }
  0x33   : > { %675 = vmatprep.subr.bf16.mxu0 %v674_v61  ;;  %695 = vmatpush3.bf16.msra.mxu1 %v694_v4 }
  0x34   : > { %696 = vmatprep.subr.bf16.mxu1 %v764_v8 }
  0x36   : > { %677 = vmatpush1.bf16.msra.mxu0 %v676_v3 }
  0x37   : > { %698 = vmatpush3.bf16.msra.mxu1 %v697_v9 }
  0x38   : > { %699 = vmatprep.subr.bf16.mxu1 %v764_v8 }
  0x39   : > { %384 = vmatmul.mubr.f32.vlgmr.msra.gmra.mrb[0].mxu0 %v253_v7 }
  0x3b   : > { %701 = vmatpush3.bf16.msra.mxu1 %v700_v12 }
  0x3e   : > { %644 = vmatmul.mubr.f32.vlgmr.msra.gmra.mrb[0].mxu1 %v253_v7 }
 0x10c   : > { %v385_v19 = vpop.f32.mrb[0].mxu0 }
 0x10d   : > { %v386_v21 = vadd.f32 %v385_v19, %v307_v17  ;;  %v387_v22 = vpop.f32.mrb[1].mxu0 }
 0x10e   : > { %v388_v8 = vadd.f32 %v387_v22, %v311_v24 }
 0x10f   : > { %v463_v23 = vadd.f32 %v460_v20, %v386_v21 }
 0x110   : > { %v470_v29 = vadd.f32 %v461_v26, %v388_v8 }
 0x111   : > { %v590_v25 = vmul.f32 -1.442695, %v463_v23  ;;  %v456_v27 = vpop.f32.mrb[0].mxu1 }
 0x112   : > { %v645_v28 = vpop.f32.mrb[1].mxu1  ;;  %v591_v30 = vmul.f32 -1.442695, %v470_v29  ;;  %v457_v35 = vadd.f32 %v456_v27, %v315_v34 }
 0x113   : > { %730 = vpow2.f32 %v590_v25 }
 0x114   : > { %732 = vpow2.f32 %v591_v30 }
 0x11d   : > { %v731_v31 = vpop.eup %730 }
 0x11e   : > { %v467_v32 = vadd.f32 1.0, %v731_v31  ;;  %v733_v36 = vpop.eup %732 }
 0x11f   : > { %v474_v40 = vadd.f32 1.0, %v733_v36 }
 0x120   : > { %734 = vrcp.f32 %v467_v32 }
 0x12a   : > { %v735_v37 = vpop.eup %734 }
 0x12b   : > { %v477_v39 = vmul.f32 %v735_v37, %v457_v35 }
 0x12d   : > { %v478_v41 = vadd.f32 %v477_v39, %v462_v38 }
 0x12f   : > { %736 = vtanh.f32 %v478_v41 }
 0x130   : > { %738 = vrcp.f32 %v474_v40 }
 0x139   : > { %v737_v42 = vpop.eup %736 }
 0x13a   : > { %v480_v43 = vsub.f32 %v253_v7, %v737_v42  ;;  %v739_v44 = vpop.eup %738 }
 0x13c   : > { %v481_v45 = vmul.f32 %v739_v44, %v480_v43 }
 0x13e   : > { %v482_v46 = vadd.f32 %v737_v42, %v481_v45 }
 0x140   : > { %483 = vst [vmem:[#allocation2] sm:$0xff] %v482_v46  ;;  %484 = vst [vmem:[%s813_s24] sm:$0xff] %v482_v46 }
 0x141 PF: > { %s14_s17 = sadd.s32 1, %s762_s17   ;;  %s996_s15 = smov %s758_s16 }
 0x142   : > { %p11_p6 = scmp.ge.s32.totalorder %s14_s17, 18   ;;  %s997_s16 = smov %s999_s18 }
 0x144   :  { %13 = sbr.rel (!%p11_p6) target bundleno = 2 (0x2), region = 73 }

// kernel: seq2seq_forward.6
= control target key start
LH: loop header
LB: loop body
LE: loop exit
PB: predicated region body
PF: predicated region fallthrough
CT: control target
= control target key end

     0   :  { %v888_v1 = vmov 0   ;;  %vm224_vm0 = vcmask 523264   ;;  %v65_v29 = vlaneseq  ;;  %s1448_s1 = inlined_call_operand.vmem [shape: bf16[64,384], index: 1, kind: input, shape index: {}]   ;;  %s1449_s0 = inlined_call_operand.vmem [shape: bf16[256,64], index: 0, kind: input, shape index: {}]   ;;  %s1450_s2 = inlined_call_operand.vmem [shape: f32[1,384], index: 2, kind: input, shape index: {}]   ;;  %s1451_s3 = inlined_call_operand.vmem [shape: f32[256,384], index: 3, kind: output, shape index: {}]  }
   0x1   :  { %v856_v0 = vld [vmem:[%s1448_s1 + $0x4] ss:$12 sps:$4 sm:$0xff]   ;;  %305 = vmatprep.mubr.bf16.mxu0 %v888_v1  ;;  %425 = vmatprep.mubr.bf16.mxu1 %v888_v1  ;;  %v858_v2 = vld [vmem:[%s1448_s1] ss:$12 sps:$4 sm:$0xff]   ;;  %v859_v3 = vld [vmem:[%s1448_s1 + $0x1c] ss:$12 sps:$4 sm:$0xff]  }
   0x2   :  { %273 = vmatprep.subr.bf16.mxu0 %v856_v0  ;;  %847 = vmatprep.subr.bf16.mxu1 %v856_v0  ;;  %v861_v4 = vld [vmem:[%s1448_s1 + $0x18] ss:$12 sps:$4 sm:$0xff]   ;;  %v862_v5 = vld [vmem:[%s1448_s1 + $0x34] ss:$12 sps:$4 sm:$0xff]   ;;  %v864_v6 = vld [vmem:[%s1448_s1 + $0x30] ss:$12 sps:$4 sm:$0xff]  }
   0x3   :  { %274 = vmatpush1.bf16.msra.mxu0 %v858_v2  ;;  %851 = vmatpush1.bf16.msra.mxu1 %v858_v2  ;;  %v865_v7 = vld [vmem:[%s1448_s1 + $0x4c] ss:$12 sps:$4 sm:$0xff]   ;;  %v867_v8 = vld [vmem:[%s1448_s1 + $0x48] ss:$12 sps:$4 sm:$0xff]   ;;  %v868_v10 = vld [vmem:[%s1449_s0] sm:$0xff]   ;;  %v1045_v30 = vshrl.u32 %v65_v29, 7 }
   0x4   :  { %275 = vmatprep.subr.bf16.mxu0 %v859_v3  ;;  %848 = vmatprep.subr.bf16.mxu1 %v859_v3  ;;  %v870_v9 = vld [vmem:[%s1448_s1 + $0x8] ss:$12 sps:$4 sm:$0xff]   ;;  %v944_v11 = vld [vmem:[%s1449_s0 + $0x60] sm:$0xff]   ;;  %v879_v16 = vld [vmem:[%s1448_s1 + $0x50] ss:$12 sps:$4 sm:$0xff]  }
   0x5   :  { %v873_v12 = vld [vmem:[%s1448_s1 + $0x20] ss:$12 sps:$4 sm:$0xff]   ;;  %v876_v13 = vld [vmem:[%s1448_s1 + $0x38] ss:$12 sps:$4 sm:$0xff]   ;;  %v874_v17 = vld [vmem:[%s1449_s0 + $0x10] sm:$0xff]   ;;  %v67_v31 = vsub.s32 0, %v1045_v30 }
   0x6   :  { %v871_v14 = vld [vmem:[%s1449_s0 + $0x8] sm:$0xff]   ;;  %v875_v18 = vld [vmem:[%s1449_s0 + $0x70] sm:$0xff]   ;;  %v877_v19 = vld [vmem:[%s1449_s0 + $0x18] sm:$0xff]   ;;  %v71_v33 = vsub.s32 1, %v1045_v30 }
   0x7   :  { %276 = vmatpush1.bf16.msra.mxu0 %v861_v4  ;;  %852 = vmatpush1.bf16.msra.mxu1 %v861_v4  ;;  %v872_v15 = vld [vmem:[%s1449_s0 + $0x68] sm:$0xff]   ;;  %v878_v20 = vld [vmem:[%s1449_s0 + $0x78] sm:$0xff]   ;;  %v880_v21 = vld [vmem:[%s1449_s0 + $0x20] sm:$0xff]  }
   0x8   :  { %277 = vmatprep.subr.bf16.mxu0 %v862_v5  ;;  %849 = vmatprep.subr.bf16.mxu1 %v862_v5  ;;  %v881_v22 = vld [vmem:[%s1449_s0 + $0x28] sm:$0xff]   ;;  %v882_v23 = vld [vmem:[%s1449_s0 + $0x30] sm:$0xff]   ;;  %v883_v24 = vld [vmem:[%s1449_s0 + $0x38] sm:$0xff]  }
   0x9   :  { %v884_v25 = vld [vmem:[%s1449_s0 + $0x40] sm:$0xff]   ;;  %v885_v26 = vld [vmem:[%s1449_s0 + $0x48] sm:$0xff]   ;;  %v886_v27 = vld [vmem:[%s1449_s0 + $0x50] sm:$0xff]  }
   0xa   :  { %v887_v28 = vld [vmem:[%s1449_s0 + $0x58] sm:$0xff]   ;;  %v1051_v32 = vld [vmem:[%s1450_s2] sm:$0x7] }
   0xb   :  { %278 = vmatpush1.bf16.msra.mxu0 %v864_v6  ;;  %853 = vmatpush1.bf16.msra.mxu1 %v864_v6  ;;  %v1055_v34 = vrot.slane %v1051_v32, %v67_v31  ;;  %v1058_v35 = vrot.slane %v1051_v32, %v71_v33 }
   0xc   :  { %279 = vmatprep.subr.bf16.mxu0 %v865_v7  ;;  %850 = vmatprep.subr.bf16.mxu1 %v865_v7 }
   0xf   :  { %280 = vmatpush1.bf16.msra.mxu0 %v867_v8  ;;  %854 = vmatpush1.bf16.msra.mxu1 %v867_v8 }
  0x10   :  { %807 = vmatprep.subr.bf16.mxu1 %v870_v9 }
  0x12   :  { %755 = vmatmul.mubr.msk.bf16.vlgmr.msra.gmra.mrb[0].mxu0 %vm224_vm0, %v868_v10  ;;  %767 = vmatmul.mubr.msk.bf16.vlgmr.msra.gmra.mrb[0].mxu1 %vm224_vm0, %v944_v11 }
  0x13   :  { %808 = vmatpush3.bf16.msra.mxu1 %v870_v9  ;;  %315 = vmatprep.mubr.bf16.mxu0 %v888_v1 }
  0x14   :  { %435 = vmatprep.mubr.bf16.mxu1 %v888_v1  ;;  %809 = vmatprep.subr.bf16.mxu1 %v873_v12 }
  0x17   :  { %810 = vmatpush3.bf16.msra.mxu1 %v873_v12 }
  0x18   :  { %811 = vmatprep.subr.bf16.mxu1 %v876_v13 }
  0x1a   :  { %756 = vmatmul.mubr.msk.bf16.gmra.mrb[4].mxu0 %vm224_vm0, %v871_v14  ;;  %768 = vmatmul.mubr.msk.bf16.gmra.mrb[4].mxu1 %vm224_vm0, %v872_v15 }
  0x1b   :  { %325 = vmatprep.mubr.bf16.mxu0 %v888_v1  ;;  %445 = vmatprep.mubr.bf16.mxu1 %v888_v1 }
  0x1c   :  { %812 = vmatpush3.bf16.msra.mxu1 %v876_v13 }
  0x1d   :  { %813 = vmatprep.subr.bf16.mxu1 %v879_v16 }
  0x20   :  { %814 = vmatpush3.bf16.msra.mxu1 %v879_v16 }
  0x22   :  { %757 = vmatmul.mubr.msk.bf16.gmra.mrb[8].mxu0 %vm224_vm0, %v874_v17  ;;  %769 = vmatmul.mubr.msk.bf16.gmra.mrb[8].mxu1 %vm224_vm0, %v875_v18 }
  0x23   :  { %335 = vmatprep.mubr.bf16.mxu0 %v888_v1  ;;  %455 = vmatprep.mubr.bf16.mxu1 %v888_v1 }
  0x2a   :  { %758 = vmatmul.mubr.msk.bf16.gmra.mrb[12].mxu0 %vm224_vm0, %v877_v19  ;;  %770 = vmatmul.mubr.msk.bf16.gmra.mrb[12].mxu1 %vm224_vm0, %v878_v20 }
  0x2b   :  { %345 = vmatprep.mubr.bf16.mxu0 %v888_v1  ;;  %815 = vmatprep.mubr.msk.bf16.mxu1 %vm224_vm0, %v868_v10 }
  0x32   :  { %759 = vmatmul.mubr.msk.bf16.gmra.mrb[16].mxu0 %vm224_vm0, %v880_v21  ;;  %816 = vmatmul.mubr.msk.bf16.vlgmr.msra.gmra.mrb[16].mxu1 %vm224_vm0, %v871_v14 }
  0x33   :  { %355 = vmatprep.mubr.bf16.mxu0 %v888_v1  ;;  %819 = vmatprep.mubr.msk.bf16.mxu1 %vm224_vm0, %v874_v17 }
  0x3a   :  { %760 = vmatmul.mubr.msk.bf16.gmra.mrb[20].mxu0 %vm224_vm0, %v881_v22  ;;  %820 = vmatmul.mubr.msk.bf16.gmra.mrb[20].mxu1 %vm224_vm0, %v877_v19 }
  0x3b   :  { %365 = vmatprep.mubr.bf16.mxu0 %v888_v1  ;;  %823 = vmatprep.mubr.msk.bf16.mxu1 %vm224_vm0, %v880_v21 }
  0x42   :  { %761 = vmatmul.mubr.msk.bf16.gmra.mrb[24].mxu0 %vm224_vm0, %v882_v23  ;;  %824 = vmatmul.mubr.msk.bf16.gmra.mrb[24].mxu1 %vm224_vm0, %v881_v22 }
  0x43   :  { %375 = vmatprep.mubr.bf16.mxu0 %v888_v1  ;;  %827 = vmatprep.mubr.msk.bf16.mxu1 %vm224_vm0, %v882_v23 }
  0x4a   :  { %762 = vmatmul.mubr.msk.bf16.gmra.mrb[28].mxu0 %vm224_vm0, %v883_v24  ;;  %828 = vmatmul.mubr.msk.bf16.gmra.mrb[28].mxu1 %vm224_vm0, %v883_v24 }
  0x4b   :  { %385 = vmatprep.mubr.bf16.mxu0 %v888_v1  ;;  %831 = vmatprep.mubr.msk.bf16.mxu1 %vm224_vm0, %v884_v25 }
  0x52   :  { %763 = vmatmul.mubr.msk.bf16.gmra.mrb[32].mxu0 %vm224_vm0, %v884_v25  ;;  %832 = vmatmul.mubr.msk.bf16.gmra.mrb[32].mxu1 %vm224_vm0, %v885_v26 }
  0x53   :  { %395 = vmatprep.mubr.bf16.mxu0 %v888_v1  ;;  %835 = vmatprep.mubr.msk.bf16.mxu1 %vm224_vm0, %v886_v27 }
  0x5a   :  { %764 = vmatmul.mubr.msk.bf16.gmra.mrb[36].mxu0 %vm224_vm0, %v885_v26  ;;  %836 = vmatmul.mubr.msk.bf16.gmra.mrb[36].mxu1 %vm224_vm0, %v887_v28  ;;  %v75_v26 = vsub.s32 2, %v1045_v30 }
  0x5b   :  { %405 = vmatprep.mubr.bf16.mxu0 %v888_v1  ;;  %839 = vmatprep.mubr.msk.bf16.mxu1 %vm224_vm0, %v944_v11 }
  0x62   :  { %765 = vmatmul.mubr.msk.bf16.gmra.mrb[40].mxu0 %vm224_vm0, %v886_v27  ;;  %840 = vmatmul.mubr.msk.bf16.gmra.mrb[40].mxu1 %vm224_vm0, %v872_v15 }
  0x63   :  { %415 = vmatprep.mubr.bf16.mxu0 %v888_v1  ;;  %843 = vmatprep.mubr.msk.bf16.mxu1 %vm224_vm0, %v875_v18 }
  0x6a   :  { %766 = vmatmul.mubr.msk.bf16.gmra.mrb[44].mxu0 %vm224_vm0, %v887_v28  ;;  %844 = vmatmul.mubr.msk.bf16.gmra.mrb[44].mxu1 %vm224_vm0, %v878_v20 }
  0xe5   :  { %v307_v36 = vpop.f32.mrb[0].mxu0  ;;  %v427_v37 = vpop.f32.mrb[0].mxu1 }
  0xe6   :  { %v308_v38 = vadd.f32 %v307_v36, %v1055_v34  ;;  %v428_v39 = vadd.f32 %v427_v37, %v1055_v34  ;;  %v309_v40 = vpop.f32.mrb[1].mxu0  ;;  %v429_v41 = vpop.f32.mrb[1].mxu1 }
  0xe7   :  { %v310_v42 = vadd.f32 %v309_v40, %v1058_v35  ;;  %v430_v43 = vadd.f32 %v429_v41, %v1058_v35  ;;  %v311_v44 = vpop.f32.mrb[2].mxu0  ;;  %v431_v45 = vpop.f32.mrb[2].mxu1  ;;  %v1184_v40 = vrot.slane %v1051_v32, %v75_v26 }
  0xe8   :  { %627 = vst [vmem:[%s1451_s3] sm:$0xff] %v308_v38  ;;  %699 = vst [vmem:[%s1451_s3 + $0x240] sm:$0xff] %v428_v39  ;;  %v312_v46 = vadd.f32 %v311_v44, %v1055_v34  ;;  %v432_v47 = vadd.f32 %v431_v45, %v1055_v34  ;;  %v313_v48 = vpop.f32.mrb[3].mxu0  ;;  %v433_v49 = vpop.f32.mrb[3].mxu1 }
  0xe9   :  { %628 = vst [vmem:[%s1451_s3 + $0x8] sm:$0xff] %v310_v42  ;;  %700 = vst [vmem:[%s1451_s3 + $0x248] sm:$0xff] %v430_v43  ;;  %v314_v50 = vadd.f32 %v313_v48, %v1058_v35  ;;  %v434_v51 = vadd.f32 %v433_v49, %v1058_v35 }
  0xea   :  { %630 = vst [vmem:[%s1451_s3 + $0x18] sm:$0xff] %v312_v46  ;;  %702 = vst [vmem:[%s1451_s3 + $0x258] sm:$0xff] %v432_v47 }
  0xeb   :  { %631 = vst [vmem:[%s1451_s3 + $0x20] sm:$0xff] %v314_v50  ;;  %703 = vst [vmem:[%s1451_s3 + $0x260] sm:$0xff] %v434_v51 }
  0xed   :  { %v317_v52 = vpop.f32.mrb[4].mxu0  ;;  %v437_v53 = vpop.f32.mrb[4].mxu1 }
  0xee   :  { %v318_v54 = vadd.f32 %v317_v52, %v1055_v34  ;;  %v438_v55 = vadd.f32 %v437_v53, %v1055_v34  ;;  %v319_v56 = vpop.f32.mrb[5].mxu0  ;;  %v439_v57 = vpop.f32.mrb[5].mxu1 }
  0xef   :  { %v320_v58 = vadd.f32 %v319_v56, %v1058_v35  ;;  %v440_v59 = vadd.f32 %v439_v57, %v1058_v35  ;;  %v321_v60 = vpop.f32.mrb[6].mxu0  ;;  %v441_v61 = vpop.f32.mrb[6].mxu1 }
  0xf0   :  { %633 = vst [vmem:[%s1451_s3 + $0x30] sm:$0xff] %v318_v54  ;;  %705 = vst [vmem:[%s1451_s3 + $0x270] sm:$0xff] %v438_v55  ;;  %v322_v62 = vadd.f32 %v321_v60, %v1055_v34  ;;  %v442_v63 = vadd.f32 %v441_v61, %v1055_v34  ;;  %v323_v0 = vpop.f32.mrb[7].mxu0  ;;  %v443_v1 = vpop.f32.mrb[7].mxu1 }
  0xf1   :  { %634 = vst [vmem:[%s1451_s3 + $0x38] sm:$0xff] %v320_v58  ;;  %706 = vst [vmem:[%s1451_s3 + $0x278] sm:$0xff] %v440_v59  ;;  %v324_v2 = vadd.f32 %v323_v0, %v1058_v35  ;;  %v444_v3 = vadd.f32 %v443_v1, %v1058_v35 }
  0xf2   :  { %636 = vst [vmem:[%s1451_s3 + $0x48] sm:$0xff] %v322_v62  ;;  %708 = vst [vmem:[%s1451_s3 + $0x288] sm:$0xff] %v442_v63 }
  0xf3   :  { %637 = vst [vmem:[%s1451_s3 + $0x50] sm:$0xff] %v324_v2  ;;  %709 = vst [vmem:[%s1451_s3 + $0x290] sm:$0xff] %v444_v3 }
  0xf5   :  { %v327_v4 = vpop.f32.mrb[8].mxu0  ;;  %v447_v5 = vpop.f32.mrb[8].mxu1 }
  0xf6   :  { %v328_v6 = vadd.f32 %v327_v4, %v1055_v34  ;;  %v448_v7 = vadd.f32 %v447_v5, %v1055_v34  ;;  %v329_v8 = vpop.f32.mrb[9].mxu0  ;;  %v449_v9 = vpop.f32.mrb[9].mxu1 }
  0xf7   :  { %v330_v10 = vadd.f32 %v329_v8, %v1058_v35  ;;  %v450_v11 = vadd.f32 %v449_v9, %v1058_v35  ;;  %v331_v12 = vpop.f32.mrb[10].mxu0  ;;  %v451_v13 = vpop.f32.mrb[10].mxu1 }
  0xf8   :  { %639 = vst [vmem:[%s1451_s3 + $0x60] sm:$0xff] %v328_v6  ;;  %711 = vst [vmem:[%s1451_s3 + $0x2a0] sm:$0xff] %v448_v7  ;;  %v332_v14 = vadd.f32 %v331_v12, %v1055_v34  ;;  %v452_v15 = vadd.f32 %v451_v13, %v1055_v34  ;;  %v333_v16 = vpop.f32.mrb[11].mxu0  ;;  %v453_v17 = vpop.f32.mrb[11].mxu1 }
  0xf9   :  { %640 = vst [vmem:[%s1451_s3 + $0x68] sm:$0xff] %v330_v10  ;;  %712 = vst [vmem:[%s1451_s3 + $0x2a8] sm:$0xff] %v450_v11  ;;  %v334_v18 = vadd.f32 %v333_v16, %v1058_v35  ;;  %v454_v19 = vadd.f32 %v453_v17, %v1058_v35 }
  0xfa   :  { %642 = vst [vmem:[%s1451_s3 + $0x78] sm:$0xff] %v332_v14  ;;  %714 = vst [vmem:[%s1451_s3 + $0x2b8] sm:$0xff] %v452_v15 }
  0xfb   :  { %643 = vst [vmem:[%s1451_s3 + $0x80] sm:$0xff] %v334_v18  ;;  %715 = vst [vmem:[%s1451_s3 + $0x2c0] sm:$0xff] %v454_v19 }
  0xfd   :  { %v337_v20 = vpop.f32.mrb[12].mxu0  ;;  %v457_v21 = vpop.f32.mrb[12].mxu1 }
  0xfe   :  { %v338_v22 = vadd.f32 %v337_v20, %v1055_v34  ;;  %v458_v23 = vadd.f32 %v457_v21, %v1055_v34  ;;  %v339_v24 = vpop.f32.mrb[13].mxu0  ;;  %v459_v25 = vpop.f32.mrb[13].mxu1 }
  0xff   :  { %v340_v27 = vadd.f32 %v339_v24, %v1058_v35  ;;  %v460_v28 = vadd.f32 %v459_v25, %v1058_v35  ;;  %v341_v29 = vpop.f32.mrb[14].mxu0  ;;  %v461_v31 = vpop.f32.mrb[14].mxu1 }
 0x100   :  { %645 = vst [vmem:[%s1451_s3 + $0x90] sm:$0xff] %v338_v22  ;;  %717 = vst [vmem:[%s1451_s3 + $0x2d0] sm:$0xff] %v458_v23  ;;  %v342_v33 = vadd.f32 %v341_v29, %v1055_v34  ;;  %v462_v36 = vadd.f32 %v461_v31, %v1055_v34  ;;  %v343_v37 = vpop.f32.mrb[15].mxu0  ;;  %v463_v30 = vpop.f32.mrb[15].mxu1 }
 0x101   :  { %646 = vst [vmem:[%s1451_s3 + $0x98] sm:$0xff] %v340_v27  ;;  %718 = vst [vmem:[%s1451_s3 + $0x2d8] sm:$0xff] %v460_v28  ;;  %v344_v38 = vadd.f32 %v343_v37, %v1058_v35  ;;  %v464_v39 = vadd.f32 %v463_v30, %v1058_v35 }
 0x102   :  { %648 = vst [vmem:[%s1451_s3 + $0xa8] sm:$0xff] %v342_v33  ;;  %720 = vst [vmem:[%s1451_s3 + $0x2e8] sm:$0xff] %v462_v36 }
 0x103   :  { %649 = vst [vmem:[%s1451_s3 + $0xb0] sm:$0xff] %v344_v38  ;;  %721 = vst [vmem:[%s1451_s3 + $0x2f0] sm:$0xff] %v464_v39 }
 0x105   :  { %v347_v41 = vpop.f32.mrb[16].mxu0  ;;  %v817_v42 = vpop.f32.mrb[16].mxu1 }
 0x106   :  { %v348_v43 = vadd.f32 %v347_v41, %v1055_v34  ;;  %v509_v44 = vadd.f32 %v817_v42, %v1184_v40  ;;  %v349_v45 = vpop.f32.mrb[17].mxu0  ;;  %v500_v46 = vpop.f32.mrb[17].mxu1 }
 0x107   :  { %v350_v47 = vadd.f32 %v349_v45, %v1058_v35  ;;  %v501_v32 = vadd.f32 %v500_v46, %v1184_v40  ;;  %v351_v48 = vpop.f32.mrb[18].mxu0  ;;  %v818_v49 = vpop.f32.mrb[18].mxu1 }
 0x108   :  { %651 = vst [vmem:[%s1451_s3 + $0xc0] sm:$0xff] %v348_v43  ;;  %635 = vst [vmem:[%s1451_s3 + $0x40] sm:$0xff] %v509_v44  ;;  %v352_v50 = vadd.f32 %v351_v48, %v1055_v34  ;;  %v512_v51 = vadd.f32 %v818_v49, %v1184_v40  ;;  %v353_v52 = vpop.f32.mrb[19].mxu0  ;;  %v503_v53 = vpop.f32.mrb[19].mxu1 }
 0x109   :  { %652 = vst [vmem:[%s1451_s3 + $0xc8] sm:$0xff] %v350_v47  ;;  %629 = vst [vmem:[%s1451_s3 + $0x10] sm:$0xff] %v501_v32  ;;  %v354_v54 = vadd.f32 %v353_v52, %v1058_v35  ;;  %v504_v55 = vadd.f32 %v503_v53, %v1184_v40 }
 0x10a   :  { %654 = vst [vmem:[%s1451_s3 + $0xd8] sm:$0xff] %v352_v50  ;;  %638 = vst [vmem:[%s1451_s3 + $0x58] sm:$0xff] %v512_v51 }
 0x10b   :  { %655 = vst [vmem:[%s1451_s3 + $0xe0] sm:$0xff] %v354_v54  ;;  %632 = vst [vmem:[%s1451_s3 + $0x28] sm:$0xff] %v504_v55 }
 0x10d   :  { %v357_v56 = vpop.f32.mrb[20].mxu0  ;;  %v821_v57 = vpop.f32.mrb[20].mxu1 }
 0x10e   :  { %v358_v58 = vadd.f32 %v357_v56, %v1055_v34  ;;  %v525_v59 = vadd.f32 %v821_v57, %v1184_v40  ;;  %v359_v60 = vpop.f32.mrb[21].mxu0  ;;  %v516_v61 = vpop.f32.mrb[21].mxu1 }
 0x10f   :  { %v360_v62 = vadd.f32 %v359_v60, %v1058_v35  ;;  %v517_v63 = vadd.f32 %v516_v61, %v1184_v40  ;;  %v361_v0 = vpop.f32.mrb[22].mxu0  ;;  %v822_v1 = vpop.f32.mrb[22].mxu1 }
 0x110   :  { %657 = vst [vmem:[%s1451_s3 + $0xf0] sm:$0xff] %v358_v58  ;;  %647 = vst [vmem:[%s1451_s3 + $0xa0] sm:$0xff] %v525_v59  ;;  %v362_v2 = vadd.f32 %v361_v0, %v1055_v34  ;;  %v528_v3 = vadd.f32 %v822_v1, %v1184_v40  ;;  %v363_v4 = vpop.f32.mrb[23].mxu0  ;;  %v519_v5 = vpop.f32.mrb[23].mxu1 }
 0x111   :  { %658 = vst [vmem:[%s1451_s3 + $0xf8] sm:$0xff] %v360_v62  ;;  %641 = vst [vmem:[%s1451_s3 + $0x70] sm:$0xff] %v517_v63  ;;  %v364_v6 = vadd.f32 %v363_v4, %v1058_v35  ;;  %v520_v7 = vadd.f32 %v519_v5, %v1184_v40 }
 0x112   :  { %660 = vst [vmem:[%s1451_s3 + $0x108] sm:$0xff] %v362_v2  ;;  %650 = vst [vmem:[%s1451_s3 + $0xb8] sm:$0xff] %v528_v3 }
 0x113   :  { %661 = vst [vmem:[%s1451_s3 + $0x110] sm:$0xff] %v364_v6  ;;  %644 = vst [vmem:[%s1451_s3 + $0x88] sm:$0xff] %v520_v7 }
 0x115   :  { %v367_v8 = vpop.f32.mrb[24].mxu0  ;;  %v825_v9 = vpop.f32.mrb[24].mxu1 }
 0x116   :  { %v368_v10 = vadd.f32 %v367_v8, %v1055_v34  ;;  %v541_v11 = vadd.f32 %v825_v9, %v1184_v40  ;;  %v369_v12 = vpop.f32.mrb[25].mxu0  ;;  %v532_v13 = vpop.f32.mrb[25].mxu1 }
 0x117   :  { %v370_v14 = vadd.f32 %v369_v12, %v1058_v35  ;;  %v533_v15 = vadd.f32 %v532_v13, %v1184_v40  ;;  %v371_v16 = vpop.f32.mrb[26].mxu0  ;;  %v826_v17 = vpop.f32.mrb[26].mxu1 }
 0x118   :  { %663 = vst [vmem:[%s1451_s3 + $0x120] sm:$0xff] %v368_v10  ;;  %659 = vst [vmem:[%s1451_s3 + $0x100] sm:$0xff] %v541_v11  ;;  %v372_v18 = vadd.f32 %v371_v16, %v1055_v34  ;;  %v544_v19 = vadd.f32 %v826_v17, %v1184_v40  ;;  %v373_v20 = vpop.f32.mrb[27].mxu0  ;;  %v535_v21 = vpop.f32.mrb[27].mxu1 }
 0x119   :  { %664 = vst [vmem:[%s1451_s3 + $0x128] sm:$0xff] %v370_v14  ;;  %653 = vst [vmem:[%s1451_s3 + $0xd0] sm:$0xff] %v533_v15  ;;  %v374_v22 = vadd.f32 %v373_v20, %v1058_v35  ;;  %v536_v23 = vadd.f32 %v535_v21, %v1184_v40 }
 0x11a   :  { %666 = vst [vmem:[%s1451_s3 + $0x138] sm:$0xff] %v372_v18  ;;  %662 = vst [vmem:[%s1451_s3 + $0x118] sm:$0xff] %v544_v19 }
 0x11b   :  { %667 = vst [vmem:[%s1451_s3 + $0x140] sm:$0xff] %v374_v22  ;;  %656 = vst [vmem:[%s1451_s3 + $0xe8] sm:$0xff] %v536_v23 }
 0x11d   :  { %v377_v24 = vpop.f32.mrb[28].mxu0  ;;  %v829_v25 = vpop.f32.mrb[28].mxu1 }
 0x11e   :  { %v378_v26 = vadd.f32 %v377_v24, %v1055_v34  ;;  %v557_v27 = vadd.f32 %v829_v25, %v1184_v40  ;;  %v379_v28 = vpop.f32.mrb[29].mxu0  ;;  %v548_v29 = vpop.f32.mrb[29].mxu1 }
 0x11f   :  { %v380_v31 = vadd.f32 %v379_v28, %v1058_v35  ;;  %v549_v33 = vadd.f32 %v548_v29, %v1184_v40  ;;  %v381_v36 = vpop.f32.mrb[30].mxu0  ;;  %v830_v37 = vpop.f32.mrb[30].mxu1 }
 0x120   :  { %669 = vst [vmem:[%s1451_s3 + $0x150] sm:$0xff] %v378_v26  ;;  %671 = vst [vmem:[%s1451_s3 + $0x160] sm:$0xff] %v557_v27  ;;  %v382_v30 = vadd.f32 %v381_v36, %v1055_v34  ;;  %v560_v38 = vadd.f32 %v830_v37, %v1184_v40  ;;  %v383_v39 = vpop.f32.mrb[31].mxu0  ;;  %v551_v41 = vpop.f32.mrb[31].mxu1 }
 0x121   :  { %670 = vst [vmem:[%s1451_s3 + $0x158] sm:$0xff] %v380_v31  ;;  %665 = vst [vmem:[%s1451_s3 + $0x130] sm:$0xff] %v549_v33  ;;  %v384_v42 = vadd.f32 %v383_v39, %v1058_v35  ;;  %v552_v43 = vadd.f32 %v551_v41, %v1184_v40 }
 0x122   :  { %672 = vst [vmem:[%s1451_s3 + $0x168] sm:$0xff] %v382_v30  ;;  %674 = vst [vmem:[%s1451_s3 + $0x178] sm:$0xff] %v560_v38 }
 0x123   :  { %673 = vst [vmem:[%s1451_s3 + $0x170] sm:$0xff] %v384_v42  ;;  %668 = vst [vmem:[%s1451_s3 + $0x148] sm:$0xff] %v552_v43 }
 0x125   :  { %v387_v44 = vpop.f32.mrb[32].mxu0  ;;  %v833_v45 = vpop.f32.mrb[32].mxu1 }
 0x126   :  { %v388_v46 = vadd.f32 %v387_v44, %v1055_v34  ;;  %v573_v47 = vadd.f32 %v833_v45, %v1184_v40  ;;  %v389_v32 = vpop.f32.mrb[33].mxu0  ;;  %v564_v48 = vpop.f32.mrb[33].mxu1 }
 0x127   :  { %v390_v49 = vadd.f32 %v389_v32, %v1058_v35  ;;  %v565_v50 = vadd.f32 %v564_v48, %v1184_v40  ;;  %v391_v51 = vpop.f32.mrb[34].mxu0  ;;  %v834_v52 = vpop.f32.mrb[34].mxu1 }
 0x128   :  { %675 = vst [vmem:[%s1451_s3 + $0x180] sm:$0xff] %v388_v46  ;;  %683 = vst [vmem:[%s1451_s3 + $0x1c0] sm:$0xff] %v573_v47  ;;  %v392_v53 = vadd.f32 %v391_v51, %v1055_v34  ;;  %v576_v54 = vadd.f32 %v834_v52, %v1184_v40  ;;  %v393_v55 = vpop.f32.mrb[35].mxu0  ;;  %v567_v56 = vpop.f32.mrb[35].mxu1 }
 0x129   :  { %676 = vst [vmem:[%s1451_s3 + $0x188] sm:$0xff] %v390_v49  ;;  %677 = vst [vmem:[%s1451_s3 + $0x190] sm:$0xff] %v565_v50  ;;  %v394_v57 = vadd.f32 %v393_v55, %v1058_v35  ;;  %v568_v58 = vadd.f32 %v567_v56, %v1184_v40 }
 0x12a   :  { %678 = vst [vmem:[%s1451_s3 + $0x198] sm:$0xff] %v392_v53  ;;  %686 = vst [vmem:[%s1451_s3 + $0x1d8] sm:$0xff] %v576_v54 }
 0x12b   :  { %679 = vst [vmem:[%s1451_s3 + $0x1a0] sm:$0xff] %v394_v57  ;;  %680 = vst [vmem:[%s1451_s3 + $0x1a8] sm:$0xff] %v568_v58 }
 0x12d   :  { %v397_v59 = vpop.f32.mrb[36].mxu0  ;;  %v837_v60 = vpop.f32.mrb[36].mxu1 }
 0x12e   :  { %v398_v61 = vadd.f32 %v397_v59, %v1055_v34  ;;  %v589_v62 = vadd.f32 %v837_v60, %v1184_v40  ;;  %v399_v63 = vpop.f32.mrb[37].mxu0  ;;  %v580_v0 = vpop.f32.mrb[37].mxu1 }
 0x12f   :  { %v400_v1 = vadd.f32 %v399_v63, %v1058_v35  ;;  %v581_v2 = vadd.f32 %v580_v0, %v1184_v40  ;;  %v401_v3 = vpop.f32.mrb[38].mxu0  ;;  %v838_v4 = vpop.f32.mrb[38].mxu1 }
 0x130   :  { %681 = vst [vmem:[%s1451_s3 + $0x1b0] sm:$0xff] %v398_v61  ;;  %695 = vst [vmem:[%s1451_s3 + $0x220] sm:$0xff] %v589_v62  ;;  %v402_v5 = vadd.f32 %v401_v3, %v1055_v34  ;;  %v592_v6 = vadd.f32 %v838_v4, %v1184_v40  ;;  %v403_v7 = vpop.f32.mrb[39].mxu0  ;;  %v583_v8 = vpop.f32.mrb[39].mxu1 }
 0x131   :  { %682 = vst [vmem:[%s1451_s3 + $0x1b8] sm:$0xff] %v400_v1  ;;  %689 = vst [vmem:[%s1451_s3 + $0x1f0] sm:$0xff] %v581_v2  ;;  %v404_v9 = vadd.f32 %v403_v7, %v1058_v35  ;;  %v584_v10 = vadd.f32 %v583_v8, %v1184_v40 }
 0x132   :  { %684 = vst [vmem:[%s1451_s3 + $0x1c8] sm:$0xff] %v402_v5  ;;  %698 = vst [vmem:[%s1451_s3 + $0x238] sm:$0xff] %v592_v6 }
 0x133   :  { %685 = vst [vmem:[%s1451_s3 + $0x1d0] sm:$0xff] %v404_v9  ;;  %692 = vst [vmem:[%s1451_s3 + $0x208] sm:$0xff] %v584_v10 }
 0x135   :  { %v407_v11 = vpop.f32.mrb[40].mxu0  ;;  %v841_v12 = vpop.f32.mrb[40].mxu1 }
 0x136   :  { %v408_v13 = vadd.f32 %v407_v11, %v1055_v34  ;;  %v605_v14 = vadd.f32 %v841_v12, %v1184_v40  ;;  %v409_v15 = vpop.f32.mrb[41].mxu0  ;;  %v596_v16 = vpop.f32.mrb[41].mxu1 }
 0x137   :  { %v410_v17 = vadd.f32 %v409_v15, %v1058_v35  ;;  %v597_v18 = vadd.f32 %v596_v16, %v1184_v40  ;;  %v411_v19 = vpop.f32.mrb[42].mxu0  ;;  %v842_v20 = vpop.f32.mrb[42].mxu1 }
 0x138   :  { %687 = vst [vmem:[%s1451_s3 + $0x1e0] sm:$0xff] %v408_v13  ;;  %707 = vst [vmem:[%s1451_s3 + $0x280] sm:$0xff] %v605_v14  ;;  %v412_v21 = vadd.f32 %v411_v19, %v1055_v34  ;;  %v608_v22 = vadd.f32 %v842_v20, %v1184_v40  ;;  %v413_v23 = vpop.f32.mrb[43].mxu0  ;;  %v599_v24 = vpop.f32.mrb[43].mxu1 }
 0x139   :  { %688 = vst [vmem:[%s1451_s3 + $0x1e8] sm:$0xff] %v410_v17  ;;  %701 = vst [vmem:[%s1451_s3 + $0x250] sm:$0xff] %v597_v18  ;;  %v414_v25 = vadd.f32 %v413_v23, %v1058_v35  ;;  %v600_v26 = vadd.f32 %v599_v24, %v1184_v40 }
 0x13a   :  { %690 = vst [vmem:[%s1451_s3 + $0x1f8] sm:$0xff] %v412_v21  ;;  %710 = vst [vmem:[%s1451_s3 + $0x298] sm:$0xff] %v608_v22 }
 0x13b   :  { %691 = vst [vmem:[%s1451_s3 + $0x200] sm:$0xff] %v414_v25  ;;  %704 = vst [vmem:[%s1451_s3 + $0x268] sm:$0xff] %v600_v26 }
 0x13d   :  { %v417_v27 = vpop.f32.mrb[44].mxu0  ;;  %v845_v28 = vpop.f32.mrb[44].mxu1 }
 0x13e   :  { %v418_v29 = vadd.f32 %v417_v27, %v1055_v34  ;;  %v621_v31 = vadd.f32 %v845_v28, %v1184_v40  ;;  %v419_v33 = vpop.f32.mrb[45].mxu0  ;;  %v612_v36 = vpop.f32.mrb[45].mxu1 }
 0x13f   :  { %v420_v37 = vadd.f32 %v419_v33, %v1058_v35  ;;  %v613_v30 = vadd.f32 %v612_v36, %v1184_v40  ;;  %v421_v38 = vpop.f32.mrb[46].mxu0  ;;  %v846_v39 = vpop.f32.mrb[46].mxu1 }
 0x140   :  { %693 = vst [vmem:[%s1451_s3 + $0x210] sm:$0xff] %v418_v29  ;;  %719 = vst [vmem:[%s1451_s3 + $0x2e0] sm:$0xff] %v621_v31  ;;  %v422_v41 = vadd.f32 %v421_v38, %v1055_v34  ;;  %v624_v42 = vadd.f32 %v846_v39, %v1184_v40  ;;  %v423_v43 = vpop.f32.mrb[47].mxu0  ;;  %v615_v44 = vpop.f32.mrb[47].mxu1 }
 0x141   :  { %694 = vst [vmem:[%s1451_s3 + $0x218] sm:$0xff] %v420_v37  ;;  %713 = vst [vmem:[%s1451_s3 + $0x2b0] sm:$0xff] %v613_v30  ;;  %v424_v45 = vadd.f32 %v423_v43, %v1058_v35  ;;  %v616_v46 = vadd.f32 %v615_v44, %v1184_v40 }
 0x142   :  { %696 = vst [vmem:[%s1451_s3 + $0x228] sm:$0xff] %v422_v41  ;;  %722 = vst [vmem:[%s1451_s3 + $0x2f8] sm:$0xff] %v624_v42 }
 0x143   :  { %697 = vst [vmem:[%s1451_s3 + $0x230] sm:$0xff] %v424_v45  ;;  %716 = vst [vmem:[%s1451_s3 + $0x2c8] sm:$0xff] %v616_v46 }

// kernel: seq2seq_forward.10
= control target key start
LH: loop header
LB: loop body
LE: loop exit
PB: predicated region body
PF: predicated region fallthrough
CT: control target
= control target key end

     0   :  { %s981_s18 = smov 0   ;;  %s1119_s0 = inlined_call_operand.vmem [shape: f32[8,16,128], index: 0, kind: input, shape index: {}]   ;;  %s1120_s1 = inlined_call_operand.vmem [shape: f32[8,16,128], index: 1, kind: input, shape index: {}]   ;;  %s1121_s2 = inlined_call_operand.vmem [shape: bf16[128,128], index: 2, kind: input, shape index: {}]   ;;  %s1122_s3 = inlined_call_operand.vmem [shape: bf16[128,128], index: 3, kind: input, shape index: {}]   ;;  %s1123_s4 = inlined_call_operand.vmem [shape: bf16[128,128], index: 4, kind: input, shape index: {}]   ;;  %s1124_s5 = inlined_call_operand.vmem [shape: f32[8,16,128], index: 5, kind: output, shape index: {}]  }
   0x1 LB: > { %s749_s19 = sadd.s32 4294967295, %s947_s18   ;;  %p753_p0 = scmp.ge.s32.totalorder %s947_s18, 1  ;;  %s947_s18 = sphi %s981_s18, %s15_s18  }
   0x2   : > { %p197_p1 = scmp.lt.s32.totalorder %s947_s18, 9 }
   0x4   : > { %p198_p2 = pnand %p753_p0, %p197_p1 }
   0x5   : > { %v905_v0 = vld [vmem:[%s1121_s2] sm:$0xff] (!%p198_p2)   ;;  %v949_v1 = vmov (!%p198_p2), 0.0   ;;  %v906_v2 = vld [vmem:[%s1121_s2 + $0x8] sm:$0xff] (!%p198_p2)   ;;  %vm950_vm0 = vmmov (!%p198_p2), 0   ;;  %p230_p3 = scmp.lt.s32.totalorder (!%p198_p2), %s749_s19, 7  ;;  %v907_v3 = vld [vmem:[%s1121_s2 + $0x10] sm:$0xff] (!%p198_p2)  }
   0x6   : > { %201 = sbr.rel (%p198_p2) target bundleno = 1230 (0x4ce), region = 40  ;;  %821 = vmatprep.subr.bf16.mxu0 (!%p198_p2), %v949_v1  ;;  %841 = vmatprep.subr.bf16.mxu1 (!%p198_p2), %v949_v1  ;;  %v908_v4 = vld [vmem:[%s1121_s2 + $0x18] sm:$0xff] (!%p198_p2)   ;;  %v909_v8 = vld [vmem:[%s1121_s2 + $0x20] sm:$0xff] (!%p198_p2)   ;;  %v910_v9 = vld [vmem:[%s1121_s2 + $0x28] sm:$0xff] (!%p198_p2)   ;;  %vm399_vm1 = vcmask (!%p198_p2), 130048  }
   0x7   : > { %822 = vmatpush3.bf16.msra.mxu0 (!%p198_p2), %v905_v0  ;;  %837 = vmatprep.mubr.msk.bf16.mxu0 (!%p198_p2), %vm950_vm0, %v949_v1  ;;  %v911_v10 = vld [vmem:[%s1121_s2 + $0x30] sm:$0xff] (!%p198_p2)   ;;  %v912_v11 = vld [vmem:[%s1121_s2 + $0x38] sm:$0xff] (!%p198_p2)   ;;  %v913_v36 = vld [vmem:[%s1123_s4] sm:$0xff] (!%p198_p2)  }
   0x8   : > { %823 = vmatprep.subr.bf16.mxu0 (!%p198_p2), %v949_v1  ;;  %843 = vmatprep.mubr.msk.bf16.mxu1 (!%p198_p2), %vm950_vm0, %v949_v1  ;;  %v915_v37 = vld [vmem:[%s1123_s4 + $0x8] sm:$0xff] (!%p198_p2)   ;;  %v917_v38 = vld [vmem:[%s1123_s4 + $0x10] sm:$0xff] (!%p198_p2)   ;;  %v919_v39 = vld [vmem:[%s1123_s4 + $0x18] sm:$0xff] (!%p198_p2)  }
   0x9   : > { %v921_v40 = vld [vmem:[%s1123_s4 + $0x20] sm:$0xff] (!%p198_p2)   ;;  %v923_v41 = vld [vmem:[%s1123_s4 + $0x28] sm:$0xff] (!%p198_p2)   ;;  %v925_v42 = vld [vmem:[%s1123_s4 + $0x30] sm:$0xff] (!%p198_p2)  }
   0xa   : > { %v927_v43 = vld [vmem:[%s1123_s4 + $0x38] sm:$0xff] (!%p198_p2)   ;;  %v914_v50 = vld [vmem:[%s1122_s3] sm:$0xff] (!%p198_p2)   ;;  %v916_v52 = vld [vmem:[%s1122_s3 + $0x8] sm:$0xff] (!%p198_p2)  }
   0xb   : > { %824 = vmatpush3.bf16.msra.mxu0 (!%p198_p2), %v906_v2  ;;  %v918_v53 = vld [vmem:[%s1122_s3 + $0x10] sm:$0xff] (!%p198_p2)   ;;  %v920_v54 = vld [vmem:[%s1122_s3 + $0x18] sm:$0xff] (!%p198_p2)   ;;  %v922_v55 = vld [vmem:[%s1122_s3 + $0x20] sm:$0xff] (!%p198_p2)  }
   0xc   : > { %825 = vmatprep.subr.bf16.mxu0 (!%p198_p2), %v949_v1  ;;  %v924_v56 = vld [vmem:[%s1122_s3 + $0x28] sm:$0xff] (!%p198_p2)   ;;  %v926_v57 = vld [vmem:[%s1122_s3 + $0x30] sm:$0xff] (!%p198_p2)   ;;  %v928_v58 = vld [vmem:[%s1122_s3 + $0x38] sm:$0xff] (!%p198_p2)  }
   0xd   : > { %s1126_s19 = smov (!%p230_p3, %s749_s19), 7 }
   0xe   : > { %s1006_s26 = sshll.u32 %s1126_s19, 4 }
   0xf   : > { %s239_s6 = scalar_lea.vmem %s1120_s1, %s1006_s26  ;;  %826 = vmatpush3.bf16.msra.mxu0 %v907_v3  ;;  %s234_s15 = scalar_lea.vmem %s1119_s0, %s1006_s26 }
  0x10   : > { %v248_v5 = vld [vmem:[%s239_s6] sm:$0xff]  ;;  %v249_v6 = vld [vmem:[%s239_s6 + $0x8] sm:$0xff]  ;;  %827 = vmatprep.subr.bf16.mxu0 %v949_v1  ;;  %s244_s6 = scalar_lea.vmem %s1124_s5, %s1006_s26 }
  0x11   : > { %v251_v7 = vpack.c.bf16 %v249_v6, %v248_v5  ;;  %v246_v12 = vld [vmem:[%s234_s15] sm:$0xff]  ;;  %v247_v13 = vld [vmem:[%s234_s15 + $0x8] sm:$0xff] }
  0x12   : > { %v250_v14 = vpack.c.bf16 %v247_v13, %v246_v12 }
  0x13   : > { %842 = vmatpush3.bf16.xpose.msra.mxu1 %v251_v7  ;;  %828 = vmatpush3.bf16.msra.mxu0 %v908_v4 }
  0x14   : > { %847 = vmatprep.subr.bf16.mxu1 %v949_v1  ;;  %829 = vmatprep.subr.bf16.mxu0 %v949_v1 }
  0x17   : > { %830 = vmatpush3.bf16.msra.mxu0 %v909_v8 }
  0x18   : > { %831 = vmatprep.subr.bf16.mxu0 %v949_v1 }
  0x1b   : > { %832 = vmatpush3.bf16.msra.mxu0 %v910_v9 }
  0x1c   : > { %833 = vmatprep.subr.bf16.mxu0 %v949_v1 }
  0x1f   : > { %834 = vmatpush3.bf16.msra.mxu0 %v911_v10 }
  0x20   : > { %835 = vmatprep.subr.bf16.mxu0 %v949_v1 }
  0x23   : > { %836 = vmatpush3.bf16.msra.mxu0 %v912_v11 }
  0x24   : > { %853 = vmatprep.subr.bf16.mxu0 %v949_v1 }
  0x26   : > { %838 = vmatmul.mubr.bf16.vlgmr.msra.gmra.mrb[0].mxu0 %v250_v14 }
  0x27   : > { %869 = vmatprep.mubr.msk.bf16.mxu0 %vm950_vm0, %v949_v1  ;;  %854 = vmatpush3.bf16.msra.mxu0 %v913_v36 }
  0x28   : > { %855 = vmatprep.subr.bf16.mxu0 %v949_v1 }
  0x2b   : > { %856 = vmatpush3.bf16.msra.mxu0 %v915_v37 }
  0x2c   : > { %857 = vmatprep.subr.bf16.mxu0 %v949_v1 }
  0x2f   : > { %858 = vmatpush3.bf16.msra.mxu0 %v917_v38 }
  0x30   : > { %859 = vmatprep.subr.bf16.mxu0 %v949_v1 }
  0x33   : > { %860 = vmatpush3.bf16.msra.mxu0 %v919_v39 }
  0x34   : > { %861 = vmatprep.subr.bf16.mxu0 %v949_v1 }
  0x37   : > { %862 = vmatpush3.bf16.msra.mxu0 %v921_v40 }
  0x38   : > { %863 = vmatprep.subr.bf16.mxu0 %v949_v1 }
  0x3b   : > { %864 = vmatpush3.bf16.msra.mxu0 %v923_v41 }
  0x3c   : > { %865 = vmatprep.subr.bf16.mxu0 %v949_v1 }
  0x3f   : > { %866 = vmatpush3.bf16.msra.mxu0 %v925_v42 }
  0x40   : > { %867 = vmatprep.subr.bf16.mxu0 %v949_v1 }
  0x43   : > { %868 = vmatpush3.bf16.msra.mxu0 %v927_v43 }
  0x46   : > { %870 = vmatmul.mubr.bf16.vlgmr.msra.gmra.mrb[4].mxu0 %v250_v14 }
  0xf9   : > { %v350_v15 = vpop.f32.mrb[0].mxu0 }
  0xfa   : > { %v839_v16 = vpop.f32.mrb[1].mxu0 }
  0xfb   : > { %v353_v17 = vpop.f32.mrb[2].mxu0 }
  0xfc   : > { %v357_v18 = vpack.c.bf16 %v353_v17, %v350_v15  ;;  %v840_v19 = vpop.f32.mrb[3].mxu0 }
  0xfe   : > { %844 = vmatmul.mubr.bf16.vlgmr.msra.gmra.mrb[0].mxu1 %v357_v18 }
  0xff   : > { %848 = vmatpush3.bf16.msra.mxu1 %v251_v7  ;;  %849 = vmatprep.mubr.msk.bf16.mxu1 %vm950_vm0, %v949_v1 }
 0x100   : > { %873 = vmatprep.subr.bf16.mxu1 %v949_v1 }
 0x119   : > { %v582_v59 = vpop.f32.mrb[4].mxu0 }
 0x11a   : > { %v871_v60 = vpop.f32.mrb[5].mxu0 }
 0x11b   : > { %v585_v61 = vpop.f32.mrb[6].mxu0 }
 0x11c   : > { %v872_v62 = vpop.f32.mrb[7].mxu0 }
 0x1d1   : > { %v392_v20 = vpop.f32.mrb[0].mxu1 }
 0x1d2   : > { %v845_v21 = vpop.f32.mrb[1].mxu1  ;;  %v400_v22 = vsel %vm399_vm1, %v392_v20, -inf }
 0x1d3   : > { %401 = vmax.xlane.f32.xlu0 %v400_v22  ;;  %v395_v23 = vpop.f32.mrb[2].mxu1 }
 0x1d4   : > { %v846_v24 = vpop.f32.mrb[3].mxu1  ;;  %v403_v25 = vsel %vm399_vm1, %v395_v23, -inf }
 0x1d7   : > { %404 = vmax.xlane.f32.xlu0 %v403_v25 }
 0x260   : > { %v402_v26 = vpop.xlane.xlu0 %401 }
 0x261   : > { %v406_v27 = vsub.f32 %v392_v20, %v402_v26 }
 0x263   : > { %v408_v28 = vmul.f32 1.442695, %v406_v27 }
 0x264   : > { %v405_v29 = vpop.xlane.xlu0 %404 }
 0x265   : > { %929 = vpow2.f32 %v408_v28  ;;  %v407_v30 = vsub.f32 %v395_v23, %v405_v29 }
 0x267   : > { %v410_v31 = vmul.f32 1.442695, %v407_v30 }
 0x269   : > { %931 = vpow2.f32 %v410_v31 }
 0x26f   : > { %v930_v32 = vpop.eup %929 }
 0x270   : > { %v412_v33 = vsel %vm399_vm1, %v930_v32, 0.0 }
 0x271   : > { %413 = vadd.xlane.f32.xlu1 %v412_v33 }
 0x273   : > { %v932_v34 = vpop.eup %931 }
 0x274   : > { %v415_v35 = vsel %vm399_vm1, %v932_v34, 0.0 }
 0x275   : > { %416 = vadd.xlane.f32.xlu1 %v415_v35 }
 0x2fe   : > { %v414_v44 = vpop.xlane.xlu1 %413 }
 0x2ff   : > { %933 = vrcp.f32 %v414_v44 }
 0x302   : > { %v417_v45 = vpop.xlane.xlu1 %416 }
 0x303   : > { %935 = vrcp.f32 %v417_v45 }
 0x309   : > { %v934_v46 = vpop.eup %933 }
 0x30a   : > { %v419_v48 = vmul.f32 %v934_v46, %v930_v32 }
 0x30d   : > { %v936_v47 = vpop.eup %935 }
 0x30e   : > { %v421_v49 = vmul.f32 %v936_v47, %v932_v34 }
 0x310   : > { %v422_v51 = vpack.c.bf16 %v421_v49, %v419_v48 }
 0x312   : > { %850 = vmatmul.mubr.msk.bf16.vlgmr.msra.gmra.mrb[4].mxu1 %vm399_vm1, %v422_v51 }
 0x313   : > { %874 = vmatpush3.bf16.msra.mxu1 %v914_v50  ;;  %889 = vmatprep.mubr.msk.bf16.mxu1 %vm950_vm0, %v949_v1 }
 0x314   : > { %875 = vmatprep.subr.bf16.mxu1 %v949_v1 }
 0x317   : > { %876 = vmatpush3.bf16.msra.mxu1 %v916_v52 }
 0x318   : > { %877 = vmatprep.subr.bf16.mxu1 %v949_v1 }
 0x31b   : > { %878 = vmatpush3.bf16.msra.mxu1 %v918_v53 }
 0x31c   : > { %879 = vmatprep.subr.bf16.mxu1 %v949_v1 }
 0x31f   : > { %880 = vmatpush3.bf16.msra.mxu1 %v920_v54 }
 0x320   : > { %881 = vmatprep.subr.bf16.mxu1 %v949_v1 }
 0x323   : > { %882 = vmatpush3.bf16.msra.mxu1 %v922_v55 }
 0x324   : > { %883 = vmatprep.subr.bf16.mxu1 %v949_v1 }
 0x327   : > { %884 = vmatpush3.bf16.msra.mxu1 %v924_v56 }
 0x328   : > { %885 = vmatprep.subr.bf16.mxu1 %v949_v1 }
 0x32b   : > { %886 = vmatpush3.bf16.msra.mxu1 %v926_v57 }
 0x32c   : > { %887 = vmatprep.subr.bf16.mxu1 %v949_v1 }
 0x32f   : > { %888 = vmatpush3.bf16.msra.mxu1 %v928_v58 }
 0x3e5   : > { %v460_v63 = vpop.f32.mrb[4].mxu1 }
 0x3e6   : > { %v851_v0 = vpop.f32.mrb[5].mxu1 }
 0x3e7   : > { %v463_v2 = vpop.f32.mrb[6].mxu1 }
 0x3e8   : > { %v467_v3 = vpack.c.bf16 %v463_v2, %v460_v63  ;;  %v852_v4 = vpop.f32.mrb[7].mxu1 }
 0x3ea   : > { %890 = vmatmul.mubr.bf16.vlgmr.msra.gmra.mrb[8].mxu1 %v467_v3 }
 0x4bd   : > { %v671_v5 = vpop.f32.mrb[8].mxu1 }
 0x4be   : > { %v672_v6 = vadd.f32 %v671_v5, %v582_v59  ;;  %v891_v7 = vpop.f32.mrb[9].mxu1 }
 0x4bf   : > { %v674_v1 = vpop.f32.mrb[10].mxu1 }
 0x4c0   : > { %937 = vtanh.f32 %v672_v6  ;;  %v675_v8 = vadd.f32 %v674_v1, %v585_v61  ;;  %v892_v9 = vpop.f32.mrb[11].mxu1 }
 0x4c2   : > { %939 = vtanh.f32 %v675_v8 }
 0x4ca   : > { %v938_v10 = vpop.eup %937 }
 0x4cb   : > { %680 = vst [vmem:[%s244_s6] sm:$0xff] %v938_v10 }
 0x4cc   : > { %v940_v11 = vpop.eup %939 }
 0x4cd   : > { %681 = vst [vmem:[%s244_s6 + $0x8] sm:$0xff] %v940_v11 }
 0x4ce PF: > { %s15_s18 = sadd.s32 1, %s947_s18  }
 0x4cf   : > { %p12_p4 = scmp.ge.s32.totalorder %s15_s18, 10  }
 0x4d1   :  { %14 = sbr.rel (!%p12_p4) target bundleno = 1 (0x1), region = 73 }

// kernel: seq2seq_forward.11
= control target key start
LH: loop header
LB: loop body
LE: loop exit
PB: predicated region body
PF: predicated region fallthrough
CT: control target
= control target key end

     0   :  { %11 = vsyncpa [#allocation7], 0  ;;  %s2763_s0 = inlined_call_operand.vmem [shape: f32[128,128], index: 0, kind: input, shape index: {}]   ;;  %s2764_s1 = inlined_call_operand.vmem [shape: s32[128,1], index: 1, kind: input, shape index: {}]   ;;  %s2765_s2 = inlined_call_operand.vmem [shape: bf16[128,384], index: 2, kind: input, shape index: {}]   ;;  %s2766_s3 = inlined_call_operand.vmem [shape: f32[1,384], index: 3, kind: input, shape index: {}]   ;;  %s2767_s4 = inlined_call_operand.hbm [shape: f32[128,384], index: 4, kind: output, shape index: {0}]   ;;  %s2768_s5 = inlined_call_operand.vmem [shape: f32[128,1], index: 5, kind: output, shape index: {1}]  }
   0x1   :  { %13 = vsyncpa [#allocation7 + $0x1], 0  ;;  %s1912_s18 = smov 0   ;;  %s1914_s19 = smov 0  }
   0x2   :  { %s1916_s20 = smov 0   ;;  %s1918_s21 = smov 0  }
   0x3   :  { %s1920_s22 = smov 0   ;;  %s1922_s23 = smov 0  }
   0x4 LB: > { %s1535_s24 = sadd.s32 4294967295, %s1873_s23   ;;  %s1536_s25 = sadd.s32 4294967294, %s1873_s23   ;;  %s1873_s23 = sphi %s1922_s23, %s19_s23   ;;  %s1869_s22 = sphi %s1920_s22, %s2868_s22   ;;  %s1865_s21 = sphi %s1918_s21, %s2867_s21   ;;  %s1861_s20 = sphi %s1916_s20, %s2866_s20   ;;  %s1857_s19 = sphi %s1914_s19, %s2865_s19   ;;  %s1853_s18 = sphi %s1912_s18, %s2864_s18  }
   0x5   : > { %s28_s26 = sadd.s32 1, %s1869_s22  ;;  %s90_s27 = sadd.s32 1, %s1861_s20 }
   0x6   : > { %p29_p0 = scmp.ge.s32.totalorder %s28_s26, 3  ;;  %p97_p1 = scmp.ne.s32.totalorder %s1861_s20, %s1857_s19 }
   0x7   : > { %p98_p2 = scmp.eq.s32.totalorder %s1873_s23, 0  ;;  %p155_p3 = scmp.eq.s32.totalorder %s1535_s24, 2 }
   0x8   : > { %s2870_s26 = smov (%p29_p0, %s28_s26), 0  ;;  %p160_p6 = scmp.ne.s32.totalorder %s1857_s19, %s1853_s18 }
   0x9   : > { %p99_p4 = por %p98_p2, %p97_p1  ;;  %p1951_p5 = por %p155_p3, %p97_p1 }
   0xa   : > { %s87_s29 = ssub.s32 %s1869_s22, %s2870_s26  ;;  %p161_p8 = scmp.eq.s32.totalorder %s1536_s25, 2 }
   0xb   : > { %p88_p7 = scmp.eq.s32.totalorder %s87_s29, 0  ;;  %p1540_p10 = scmp.ge.s32.totalorder %s1873_s23, 3 }
   0xc   : > { %p1962_p9 = por %p161_p8, %p160_p6 }
   0xd   : > { %s1960_s30 = scalar_select %p88_p7, %s1861_s20, %s90_s27  }
   0xe   : > { %221 = sbr.rel (%p1540_p10) target bundleno = 35 (0x23), region = 24 }
  0x15   : > { %224 = sbr.rel (!%p99_p4) target bundleno = 35 (0x23), region = 28  ;;  %s226_s7 = sand.u32 (%p99_p4), 1, %s1861_s20  }
  0x16   : > { %s1542_s8 = sshll.u32 (%p99_p4), %s1869_s22, 2  ;;  %s1541_s9 = sshll.u32 (%p99_p4), %s226_s7, 6 }
  0x17   : > { %s1972_s12 = scalar_lea.vmem (%p99_p4), %s2765_s2, %s1542_s8  ;;  %s228_s13 = scalar_lea.vmem (%p99_p4), [#allocation5], %s1541_s9 }
  0x18   : > { %v246_v0 = vld [vmem:[%s1972_s12] sm:$0xf] (%p99_p4)  ;;  %v248_v1 = vld [vmem:[%s1972_s12 + $0xc] sm:$0xf] (%p99_p4)  ;;  %v250_v2 = vld [vmem:[%s1972_s12 + $0x18] sm:$0xf] (%p99_p4) }
  0x19   : > { %247 = vst [vmem:[%s228_s13] sm:$0xf] (%p99_p4), %v246_v0  ;;  %249 = vst [vmem:[%s228_s13 + $0x4] sm:$0xf] (%p99_p4), %v248_v1  ;;  %v252_v3 = vld [vmem:[%s1972_s12 + $0x24] sm:$0xf] (%p99_p4) }
  0x1a   : > { %v254_v4 = vld [vmem:[%s1972_s12 + $0x30] sm:$0xf] (%p99_p4)  ;;  %251 = vst [vmem:[%s228_s13 + $0x8] sm:$0xf] (%p99_p4), %v250_v2  ;;  %253 = vst [vmem:[%s228_s13 + $0xc] sm:$0xf] (%p99_p4), %v252_v3 }
  0x1b   : > { %255 = vst [vmem:[%s228_s13 + $0x10] sm:$0xf] (%p99_p4), %v254_v4  ;;  %v256_v5 = vld [vmem:[%s1972_s12 + $0x3c] sm:$0xf] (%p99_p4)  ;;  %v258_v6 = vld [vmem:[%s1972_s12 + $0x48] sm:$0xf] (%p99_p4) }
  0x1c   : > { %v260_v7 = vld [vmem:[%s1972_s12 + $0x54] sm:$0xf]  ;;  %257 = vst [vmem:[%s228_s13 + $0x14] sm:$0xf] %v256_v5  ;;  %259 = vst [vmem:[%s228_s13 + $0x18] sm:$0xf] %v258_v6 }
  0x1d   : > { %261 = vst [vmem:[%s228_s13 + $0x1c] sm:$0xf] %v260_v7  ;;  %v262_v8 = vld [vmem:[%s1972_s12 + $0x60] sm:$0xf]  ;;  %v264_v9 = vld [vmem:[%s1972_s12 + $0x6c] sm:$0xf] }
  0x1e   : > { %v266_v10 = vld [vmem:[%s1972_s12 + $0x78] sm:$0xf]  ;;  %263 = vst [vmem:[%s228_s13 + $0x20] sm:$0xf] %v262_v8  ;;  %265 = vst [vmem:[%s228_s13 + $0x24] sm:$0xf] %v264_v9 }
  0x1f   : > { %267 = vst [vmem:[%s228_s13 + $0x28] sm:$0xf] %v266_v10  ;;  %v268_v11 = vld [vmem:[%s1972_s12 + $0x84] sm:$0xf]  ;;  %v270_v12 = vld [vmem:[%s1972_s12 + $0x90] sm:$0xf] }
  0x20   : > { %v272_v13 = vld [vmem:[%s1972_s12 + $0x9c] sm:$0xf]  ;;  %269 = vst [vmem:[%s228_s13 + $0x2c] sm:$0xf] %v268_v11  ;;  %271 = vst [vmem:[%s228_s13 + $0x30] sm:$0xf] %v270_v12 }
  0x21   : > { %273 = vst [vmem:[%s228_s13 + $0x34] sm:$0xf] %v272_v13  ;;  %v274_v14 = vld [vmem:[%s1972_s12 + $0xa8] sm:$0xf]  ;;  %v276_v15 = vld [vmem:[%s1972_s12 + $0xb4] sm:$0xf] }
  0x22   : > { %275 = vst [vmem:[%s228_s13 + $0x38] sm:$0xf] %v274_v14  ;;  %277 = vst [vmem:[%s228_s13 + $0x3c] sm:$0xf] %v276_v15 }
  0x23 PF: > { %p1543_p11 = scmp.ge.s32.totalorder %s1873_s23, 1  ;;  %p337_p12 = scmp.lt.s32.totalorder %s1873_s23, 4 }
  0x25   : > { %p338_p13 = pnand %p1543_p11, %p337_p12 }
  0x27   : > { %341 = sbr.rel (%p338_p13) target bundleno = 909 (0x38d), region = 73 }
  0x2e   : > { %s1993_s14 = sand.u32 1, %s1857_s19   ;;  %p401_p0 = scmp.lt.s32.totalorder %s1865_s21, 2 }
  0x2f   : > { %s1544_s15 = sshll.u32 %s1993_s14, 6  ;;  %s1545_s16 = sshll.u32 %s1993_s14, 7 }
  0x30   : > { %s1999_s17 = scalar_select %p401_p0, %s1865_s21, 2 }
  0x31   : > { %s2005_s29 = scalar_lea.vmem [#allocation5], %s1544_s15  ;;  %s2007_s7 = scalar_lea.vmem [#allocation6], %s1545_s16 }
  0x32   : > { %s403_s27 = scalar_lea.vmem %s2766_s3, %s1999_s17  ;;  %p1546_p1 = scmp.ne.s32.totalorder %s1865_s21, 0 }
  0x33   : > { %vm416_vm0 = vcmask (!%p1546_p1), 7168   ;;  %v1875_v16 = vmov (!%p1546_p1), -inf   ;;  %v1876_v17 = vmov (!%p1546_p1), 0.0  }
  0x34   : > { %415 = sbr.rel (%p1546_p1) target bundleno = 76 (0x4c), region = 81  ;;  %417 = vst.msk [vmem:[#allocation2] sm:$0xff] (!%p1546_p1), %vm416_vm0, %v1875_v16  ;;  %418 = vst.msk [vmem:[#allocation2 + $0x8] sm:$0xff] (!%p1546_p1), %vm416_vm0, %v1875_v16 }
  0x35   : > { %419 = vst.msk [vmem:[#allocation2 + $0x10] sm:$0xff] (!%p1546_p1), %vm416_vm0, %v1875_v16  ;;  %420 = vst.msk [vmem:[#allocation2 + $0x18] sm:$0xff] (!%p1546_p1), %vm416_vm0, %v1875_v16 }
  0x36   : > { %421 = vst.msk [vmem:[#allocation2 + $0x20] sm:$0xff] (!%p1546_p1), %vm416_vm0, %v1875_v16  ;;  %422 = vst.msk [vmem:[#allocation2 + $0x28] sm:$0xff] (!%p1546_p1), %vm416_vm0, %v1875_v16 }
  0x37   : > { %423 = vst.msk [vmem:[#allocation2 + $0x30] sm:$0xff] (!%p1546_p1), %vm416_vm0, %v1875_v16  ;;  %424 = vst.msk [vmem:[#allocation2 + $0x38] sm:$0xff] (!%p1546_p1), %vm416_vm0, %v1875_v16 }
  0x38   : > { %425 = vst.msk [vmem:[#allocation2 + $0x40] sm:$0xff] (!%p1546_p1), %vm416_vm0, %v1875_v16  ;;  %426 = vst.msk [vmem:[#allocation2 + $0x48] sm:$0xff] (!%p1546_p1), %vm416_vm0, %v1875_v16 }
  0x39   : > { %427 = vst.msk [vmem:[#allocation2 + $0x50] sm:$0xff] (!%p1546_p1), %vm416_vm0, %v1875_v16  ;;  %428 = vst.msk [vmem:[#allocation2 + $0x58] sm:$0xff] (!%p1546_p1), %vm416_vm0, %v1875_v16 }
  0x3a   : > { %429 = vst.msk [vmem:[#allocation2 + $0x60] sm:$0xff] (!%p1546_p1), %vm416_vm0, %v1875_v16  ;;  %430 = vst.msk [vmem:[#allocation2 + $0x68] sm:$0xff] (!%p1546_p1), %vm416_vm0, %v1875_v16 }
  0x3b   : > { %431 = vst.msk [vmem:[#allocation2 + $0x70] sm:$0xff] %vm416_vm0, %v1875_v16  ;;  %432 = vst.msk [vmem:[#allocation2 + $0x78] sm:$0xff] %vm416_vm0, %v1875_v16 }
  0x3c   : > { %433 = vst.msk [vmem:[#allocation3] sm:$0xff] %vm416_vm0, %v1876_v17  ;;  %434 = vst.msk [vmem:[#allocation3 + $0x8] sm:$0xff] %vm416_vm0, %v1876_v17 }
  0x3d   : > { %435 = vst.msk [vmem:[#allocation3 + $0x10] sm:$0xff] %vm416_vm0, %v1876_v17  ;;  %436 = vst.msk [vmem:[#allocation3 + $0x18] sm:$0xff] %vm416_vm0, %v1876_v17 }
  0x3e   : > { %437 = vst.msk [vmem:[#allocation3 + $0x20] sm:$0xff] %vm416_vm0, %v1876_v17  ;;  %438 = vst.msk [vmem:[#allocation3 + $0x28] sm:$0xff] %vm416_vm0, %v1876_v17 }
  0x3f   : > { %439 = vst.msk [vmem:[#allocation3 + $0x30] sm:$0xff] %vm416_vm0, %v1876_v17  ;;  %440 = vst.msk [vmem:[#allocation3 + $0x38] sm:$0xff] %vm416_vm0, %v1876_v17 }
  0x40   : > { %441 = vst.msk [vmem:[#allocation3 + $0x40] sm:$0xff] %vm416_vm0, %v1876_v17  ;;  %442 = vst.msk [vmem:[#allocation3 + $0x48] sm:$0xff] %vm416_vm0, %v1876_v17 }
  0x41   : > { %443 = vst.msk [vmem:[#allocation3 + $0x50] sm:$0xff] %vm416_vm0, %v1876_v17  ;;  %444 = vst.msk [vmem:[#allocation3 + $0x58] sm:$0xff] %vm416_vm0, %v1876_v17 }
  0x42   : > { %445 = vst.msk [vmem:[#allocation3 + $0x60] sm:$0xff] %vm416_vm0, %v1876_v17  ;;  %446 = vst.msk [vmem:[#allocation3 + $0x68] sm:$0xff] %vm416_vm0, %v1876_v17 }
  0x43   : > { %447 = vst.msk [vmem:[#allocation3 + $0x70] sm:$0xff] %vm416_vm0, %v1876_v17  ;;  %448 = vst.msk [vmem:[#allocation3 + $0x78] sm:$0xff] %vm416_vm0, %v1876_v17 }
  0x44   : > { %449 = vst.msk [vmem:[#allocation4] sm:$0xff] %vm416_vm0, %v1876_v17  ;;  %450 = vst.msk [vmem:[#allocation4 + $0x8] sm:$0xff] %vm416_vm0, %v1876_v17 }
  0x45   : > { %451 = vst.msk [vmem:[#allocation4 + $0x10] sm:$0xff] %vm416_vm0, %v1876_v17  ;;  %452 = vst.msk [vmem:[#allocation4 + $0x18] sm:$0xff] %vm416_vm0, %v1876_v17 }
  0x46   : > { %453 = vst.msk [vmem:[#allocation4 + $0x20] sm:$0xff] %vm416_vm0, %v1876_v17  ;;  %454 = vst.msk [vmem:[#allocation4 + $0x28] sm:$0xff] %vm416_vm0, %v1876_v17 }
  0x47   : > { %455 = vst.msk [vmem:[#allocation4 + $0x30] sm:$0xff] %vm416_vm0, %v1876_v17  ;;  %456 = vst.msk [vmem:[#allocation4 + $0x38] sm:$0xff] %vm416_vm0, %v1876_v17 }
  0x48   : > { %457 = vst.msk [vmem:[#allocation4 + $0x40] sm:$0xff] %vm416_vm0, %v1876_v17  ;;  %458 = vst.msk [vmem:[#allocation4 + $0x48] sm:$0xff] %vm416_vm0, %v1876_v17 }
  0x49   : > { %459 = vst.msk [vmem:[#allocation4 + $0x50] sm:$0xff] %vm416_vm0, %v1876_v17  ;;  %460 = vst.msk [vmem:[#allocation4 + $0x58] sm:$0xff] %vm416_vm0, %v1876_v17 }
  0x4a   : > { %461 = vst.msk [vmem:[#allocation4 + $0x60] sm:$0xff] %vm416_vm0, %v1876_v17  ;;  %462 = vst.msk [vmem:[#allocation4 + $0x68] sm:$0xff] %vm416_vm0, %v1876_v17 }
  0x4b   : > { %463 = vst.msk [vmem:[#allocation4 + $0x70] sm:$0xff] %vm416_vm0, %v1876_v17  ;;  %464 = vst.msk [vmem:[#allocation4 + $0x78] sm:$0xff] %vm416_vm0, %v1876_v17 }
  0x4c PF: > { %v1691_v18 = vld [vmem:[%s2005_s29] sm:$0xff]   ;;  %v1692_v19 = vld [vmem:[%s2005_s29 + $0x8] sm:$0xff]   ;;  %v1877_v20 = vmov 0   ;;  %v1693_v21 = vld [vmem:[%s2005_s29 + $0x10] sm:$0xff]   ;;  %s1556_s13 = sshll.u32 %s1865_s21, 7  ;;  %vm838_vm5 = vcmask 7168  }
  0x4d   : > { %1689 = vset.pattern.permute.xlu0 %v1877_v20  ;;  %1690 = vset.pattern.permute.xlu1 %v1877_v20  ;;  %v1694_v22 = vld [vmem:[%s2005_s29 + $0x18] sm:$0xff]   ;;  %v465_v23 = vld [vmem:[%s2763_s0] sm:$0xff]  ;;  %v466_v24 = vld [vmem:[%s2763_s0 + $0x8] sm:$0xff]  ;;  %p1557_p2 = scmp.ne.s32.totalorder %s1865_s21, 2 }
  0x4e   : > { %1580 = vmatprep.subr.bf16.mxu0 %v1691_v18  ;;  %1612 = vmatprep.subr.bf16.mxu1 %v1691_v18  ;;  %v481_v25 = vpack.c.bf16 %v466_v24, %v465_v23  ;;  %v473_v26 = vld [vmem:[%s2763_s0 + $0x40] sm:$0xff]  ;;  %v474_v27 = vld [vmem:[%s2763_s0 + $0x48] sm:$0xff]  ;;  %v2084_v31 = vld [vmem:[%s2764_s1 + $0x10] sm:$0xff] }
  0x4f   : > { %1581 = vmatpush3.bf16.msra.mxu0 %v1691_v18  ;;  %1620 = vmatpush3.bf16.msra.mxu1 %v1691_v18  ;;  %v485_v28 = vpack.c.bf16 %v474_v27, %v473_v26  ;;  %v1695_v29 = vld [vmem:[%s2005_s29 + $0x20] sm:$0xff]   ;;  %2808 = vst [vmem:[#allocation10_spill] sm:$0xff] %v2084_v31  ;;  %v2089_v32 = vld [vmem:[%s2764_s1 + $0x8] sm:$0xff]  ;;  %v2097_v34 = vld [vmem:[%s2764_s1 + $0x18] sm:$0xff] }
  0x50   : > { %1582 = vmatprep.subr.bf16.mxu0 %v1692_v19  ;;  %1613 = vmatprep.subr.bf16.mxu1 %v1692_v19  ;;  %v2078_v30 = vld [vmem:[%s2764_s1] sm:$0xff]  ;;  %2809 = vst [vmem:[#allocation11_spill] sm:$0xff] %v2089_v32  ;;  %v1696_v33 = vld [vmem:[%s2005_s29 + $0x28] sm:$0xff]   ;;  %2810 = vst [vmem:[#allocation12_spill] sm:$0xff] %v2097_v34 }
  0x51   : > { %1596 = vmatprep.mubr.bf16.mxu0 %v481_v25  ;;  %1604 = vmatprep.mubr.bf16.mxu1 %v485_v28  ;;  %2807 = vst [vmem:[#allocation9_spill] sm:$0xff] %v2078_v30  ;;  %v2102_v35 = vld [vmem:[%s2764_s1 + $0x20] sm:$0xff]  ;;  %v1697_v36 = vld [vmem:[%s2005_s29 + $0x30] sm:$0xff]   ;;  %v2110_v37 = vld [vmem:[%s2764_s1 + $0x28] sm:$0xff] }
  0x52   : > { %711 = vperm.xlu0 %1689, %v2078_v30   ;;  %717 = vperm.xlu1 %1690, %v2084_v31   ;;  %2811 = vst [vmem:[#allocation13_spill] sm:$0xff] %v2102_v35  ;;  %2812 = vst [vmem:[#allocation14_spill] sm:$0xff] %v2110_v37  ;;  %v2115_v38 = vld [vmem:[%s2764_s1 + $0x30] sm:$0xff]  ;;  %v1698_v39 = vld [vmem:[%s2005_s29 + $0x38] sm:$0xff]  }
  0x53   : > { %1583 = vmatpush3.bf16.msra.mxu0 %v1692_v19  ;;  %1621 = vmatpush3.bf16.msra.mxu1 %v1692_v19  ;;  %2813 = vst [vmem:[#allocation15_spill] sm:$0xff] %v2115_v38  ;;  %v467_v40 = vld [vmem:[%s2763_s0 + $0x10] sm:$0xff]  ;;  %v468_v41 = vld [vmem:[%s2763_s0 + $0x18] sm:$0xff]  ;;  %v469_v44 = vld [vmem:[%s2763_s0 + $0x20] sm:$0xff] }
  0x54   : > { %1584 = vmatprep.subr.bf16.mxu0 %v1693_v21  ;;  %1614 = vmatprep.subr.bf16.mxu1 %v1693_v21  ;;  %v475_v42 = vld [vmem:[%s2763_s0 + $0x50] sm:$0xff]  ;;  %v476_v43 = vld [vmem:[%s2763_s0 + $0x58] sm:$0xff]  ;;  %v2138_v45 = vld [vmem:[%s2764_s1 + $0x40] sm:$0xff]  ;;  %v482_v49 = vpack.c.bf16 %v468_v41, %v467_v40  ;;  %v689_v40 = vlaneseq }
  0x55   : > { %2814 = vst [vmem:[#allocation16_spill] sm:$0xff] %v2138_v45  ;;  %v470_v46 = vld [vmem:[%s2763_s0 + $0x28] sm:$0xff]  ;;  %v477_v47 = vld [vmem:[%s2763_s0 + $0x60] sm:$0xff]  ;;  %v486_v50 = vpack.c.bf16 %v476_v43, %v475_v42  ;;  %v2153_v53 = vld [vmem:[%s2764_s1 + $0x50] sm:$0xff]  ;;  %v692_v42 = vstv %s1556_s13 }
  0x56   : > { %714 = vperm.xlu0 %1689, %v2089_v32   ;;  %720 = vperm.xlu1 %1690, %v2097_v34   ;;  %v478_v48 = vld [vmem:[%s2763_s0 + $0x68] sm:$0xff]  ;;  %v483_v51 = vpack.c.bf16 %v470_v46, %v469_v44  ;;  %2815 = vst [vmem:[#allocation17_spill] sm:$0xff] %v2153_v53  ;;  %v471_v54 = vld [vmem:[%s2763_s0 + $0x30] sm:$0xff]  ;;  %v472_v55 = vld [vmem:[%s2763_s0 + $0x38] sm:$0xff]  ;;  %v690_v41 = vand.u32 127, %v689_v40 }
  0x57   : > { %1585 = vmatpush3.bf16.msra.mxu0 %v1693_v21  ;;  %1622 = vmatpush3.bf16.msra.mxu1 %v1693_v21  ;;  %v487_v52 = vpack.c.bf16 %v478_v48, %v477_v47  ;;  %v479_v56 = vld [vmem:[%s2763_s0 + $0x70] sm:$0xff]  ;;  %v480_v57 = vld [vmem:[%s2763_s0 + $0x78] sm:$0xff]  ;;  %v484_v58 = vpack.c.bf16 %v472_v55, %v471_v54  ;;  %v1547_v60 = vld [vmem:[%s403_s27] ss:$0 sm:$0xff] }
  0x58   : > { %1586 = vmatprep.subr.bf16.mxu0 %v1694_v22  ;;  %1615 = vmatprep.subr.bf16.mxu1 %v1694_v22  ;;  %v488_v59 = vpack.c.bf16 %v480_v57, %v479_v56  ;;  %v2280_v43 = vadd.s32 %v692_v42, %v690_v41  ;;  %v701_v31 = vld [vmem:[#allocation4 + $0x38] sm:$0xff] }
  0x5a   : > { %723 = vperm.xlu0 %1689, %v2102_v35   ;;  %726 = vperm.xlu1 %1690, %v2110_v37  }
  0x5b   : > { %1587 = vmatpush3.bf16.msra.mxu0 %v1694_v22  ;;  %1623 = vmatpush3.bf16.msra.mxu1 %v1694_v22 }
  0x5c   : > { %1588 = vmatprep.subr.bf16.mxu0 %v1695_v29  ;;  %1616 = vmatprep.subr.bf16.mxu1 %v1695_v29 }
  0x5e   : > { %729 = vperm.xlu0 %1689, %v2115_v38  }
  0x5f   : > { %1589 = vmatpush3.bf16.msra.mxu0 %v1695_v29  ;;  %1624 = vmatpush3.bf16.msra.mxu1 %v1695_v29  ;;  %v2256_v29 = vld [vmem:[%s2764_s1 + $0x38] sm:$0xff] }
  0x60   : > { %1590 = vmatprep.subr.bf16.mxu0 %v1696_v33  ;;  %1617 = vmatprep.subr.bf16.mxu1 %v1696_v33  ;;  %2816 = vst [vmem:[#allocation18_spill] sm:$0xff] %v2256_v29 }
  0x62   : > { %735 = vperm.xlu0 %1689, %v2138_v45  }
  0x63   : > { %1591 = vmatpush3.bf16.msra.mxu0 %v1696_v33  ;;  %1625 = vmatpush3.bf16.msra.mxu1 %v1696_v33  ;;  %v2262_v33 = vld [vmem:[%s2764_s1 + $0x58] sm:$0xff] }
  0x64   : > { %1592 = vmatprep.subr.bf16.mxu0 %v1697_v36  ;;  %1618 = vmatprep.subr.bf16.mxu1 %v1697_v36  ;;  %2817 = vst [vmem:[#allocation19_spill] sm:$0xff] %v2262_v33 }
  0x66   : > { %741 = vperm.xlu0 %1689, %v2153_v53   ;;  %v2418_v53 = vld [vmem:[#allocation2 + $0x60] sm:$0xff] }
  0x67   : > { %1593 = vmatpush3.bf16.msra.mxu0 %v1697_v36  ;;  %1626 = vmatpush3.bf16.msra.mxu1 %v1697_v36  ;;  %v2267_v36 = vld [vmem:[%s2764_s1 + $0x48] sm:$0xff]  ;;  %2824 = vst [vmem:[#allocation26_spill] sm:$0xff] %v2418_v53 }
  0x68   : > { %1594 = vmatprep.subr.bf16.mxu0 %v1698_v39  ;;  %1619 = vmatprep.subr.bf16.mxu1 %v1698_v39  ;;  %2818 = vst [vmem:[#allocation20_spill] sm:$0xff] %v2267_v36 }
  0x6b   : > { %1595 = vmatpush3.bf16.msra.mxu0 %v1698_v39  ;;  %1627 = vmatpush3.bf16.msra.mxu1 %v1698_v39  ;;  %v2274_v39 = vld [vmem:[%s2764_s1 + $0x60] sm:$0xff] }
  0x6c   : > { %2819 = vst [vmem:[#allocation21_spill] sm:$0xff] %v2274_v39 }
  0x6e   : > { %1597 = vmatmul.mubr.bf16.vlgmr.msra.gmra.mrb[0].mxu0 %v482_v49  ;;  %1605 = vmatmul.mubr.bf16.vlgmr.msra.gmra.mrb[0].mxu1 %v486_v50 }
  0x6f   : > { %1600 = vmatprep.mubr.bf16.mxu0 %v483_v51  ;;  %1608 = vmatprep.mubr.bf16.mxu1 %v487_v52 }
  0x76   : > { %1601 = vmatmul.mubr.bf16.gmra.mrb[4].mxu0 %v484_v58  ;;  %1609 = vmatmul.mubr.bf16.gmra.mrb[4].mxu1 %v488_v59  ;;  %v2300_v59 = vld [vmem:[#allocation2 + $0x10] sm:$0xff] }
  0xd1   : > { %v712_v44 = vpop.permute.xlu0 %711  ;;  %v718_v46 = vpop.permute.xlu1 %717 }
  0xd2   : > { %vm758_vm1 = vcmp.eq.s32.totalorder %v2280_v43, %v712_v44  ;;  %vm760_vm2 = vcmp.eq.s32.totalorder %v2280_v43, %v718_v46  ;;  %v2348_v46 = vld [vmem:[#allocation2 + $0x8] sm:$0xff] }
  0xd5   : > { %v721_v48 = vpop.permute.xlu1 %720  ;;  %v2290_v54 = vpop.permute.xlu0 %714 }
  0xd6   : > { %vm761_vm3 = vcmp.eq.s32.totalorder %v2280_v43, %v721_v48  ;;  %v2355_v48 = vld [vmem:[#allocation2 + $0x48] sm:$0xff]  ;;  %vm759_vm9 = vcmp.eq.s32.totalorder %v2280_v43, %v2290_v54  ;;  %v2475_v54 = vld [vmem:[%s2764_s1 + $0x70] sm:$0xff] }
  0xd7   : > { %2829 = vst [vmem:[#allocation31_spill] sm:$0xff] %v2475_v54 }
  0xd9   : > { %v727_v50 = vpop.permute.xlu1 %726  ;;  %v2292_v55 = vpop.permute.xlu0 %723 }
  0xda   : > { %vm763_vm4 = vcmp.eq.s32.totalorder %v2280_v43, %v727_v50  ;;  %vm762_vm10 = vcmp.eq.s32.totalorder %v2280_v43, %v2292_v55 }
  0xdd   : > { %v2294_v56 = vpop.permute.xlu0 %729 }
  0xde   : > { %vm764_vm11 = vcmp.eq.s32.totalorder %v2280_v43, %v2294_v56 }
  0xe1   : > { %v2296_v57 = vpop.permute.xlu0 %735 }
  0xe2   : > { %vm766_vm12 = vcmp.eq.s32.totalorder %v2280_v43, %v2296_v57 }
  0xe5   : > { %v2298_v58 = vpop.permute.xlu0 %741 }
  0xe6   : > { %vm768_vm13 = vcmp.eq.s32.totalorder %v2280_v43, %v2298_v58 }
 0x141   : > { %v1598_v61 = vpop.f32.mrb[0].mxu0  ;;  %v1606_v62 = vpop.f32.mrb[0].mxu1 }
 0x142   : > { %v2173_v63 = vadd.f32 %v1598_v61, %v1547_v60  ;;  %v594_v0 = vpop.f32.mrb[1].mxu0  ;;  %v2175_v1 = vadd.f32 %v1606_v62, %v1547_v60  ;;  %v626_v2 = vpop.f32.mrb[1].mxu1 }
 0x143   : > { %v2177_v3 = vadd.f32 %v1547_v60, %v594_v0  ;;  %v1599_v4 = vpop.f32.mrb[2].mxu0  ;;  %v2179_v5 = vadd.f32 %v1547_v60, %v626_v2  ;;  %v1607_v6 = vpop.f32.mrb[2].mxu1 }
 0x144   : > { %659 = vst [vmem:[%s2007_s7 + $0x10] sm:$0xff] %v2173_v63  ;;  %v2183_v7 = vadd.f32 %v1599_v4, %v1547_v60  ;;  %875 = vmax.xlane.f32.xlu0 %v2173_v63  ;;  %v597_v8 = vpop.f32.mrb[3].mxu0  ;;  %667 = vst [vmem:[%s2007_s7 + $0x50] sm:$0xff] %v2175_v1  ;;  %v2188_v9 = vadd.f32 %v1607_v6, %v1547_v60  ;;  %v629_v10 = vpop.f32.mrb[3].mxu1  ;;  %v776_v49 = vsel %vm760_vm2, %v2173_v63, 0.0  ;;  %v2310_v4 = vld [vmem:[#allocation2 + $0x50] sm:$0xff] }
 0x145   : > { %657 = vst [vmem:[%s2007_s7] sm:$0xff] %v2177_v3  ;;  %v2192_v11 = vadd.f32 %v1547_v60, %v597_v8  ;;  %871 = vmax.xlane.f32.xlu1 %v2177_v3  ;;  %665 = vst [vmem:[%s2007_s7 + $0x40] sm:$0xff] %v2179_v5  ;;  %v2197_v12 = vadd.f32 %v1547_v60, %v629_v10  ;;  %v774_v47 = vsel %vm758_vm1, %v2177_v3, 0.0  ;;  %v2317_v8 = vld [vmem:[#allocation2 + $0x18] sm:$0xff]  ;;  %v2401_v6 = vld [vmem:[#allocation2 + $0x20] sm:$0xff] }
 0x146   : > { %660 = vst [vmem:[%s2007_s7 + $0x18] sm:$0xff] %v2183_v7  ;;  %668 = vst [vmem:[%s2007_s7 + $0x58] sm:$0xff] %v2188_v9  ;;  %v777_v51 = vsel %vm761_vm3, %v2183_v7, 0.0 }
 0x147   : > { %658 = vst [vmem:[%s2007_s7 + $0x8] sm:$0xff] %v2192_v11  ;;  %666 = vst [vmem:[%s2007_s7 + $0x48] sm:$0xff] %v2197_v12 }
 0x148   : > { %891 = vmax.xlane.f32.xlu0 %v2175_v1 }
 0x149   : > { %877 = vmax.xlane.f32.xlu1 %v2183_v7  ;;  %v1602_v13 = vpop.f32.mrb[4].mxu0  ;;  %v1610_v14 = vpop.f32.mrb[4].mxu1 }
 0x14a   : > { %v2209_v15 = vadd.f32 %v1602_v13, %v1547_v60  ;;  %v610_v16 = vpop.f32.mrb[5].mxu0  ;;  %v2211_v17 = vadd.f32 %v1610_v14, %v1547_v60  ;;  %v642_v18 = vpop.f32.mrb[5].mxu1 }
 0x14b   : > { %v2213_v19 = vadd.f32 %v1547_v60, %v610_v16  ;;  %v1603_v20 = vpop.f32.mrb[6].mxu0  ;;  %v2215_v21 = vadd.f32 %v1547_v60, %v642_v18  ;;  %v1611_v22 = vpop.f32.mrb[6].mxu1 }
 0x14c   : > { %887 = vmax.xlane.f32.xlu0 %v2179_v5  ;;  %663 = vst [vmem:[%s2007_s7 + $0x30] sm:$0xff] %v2209_v15  ;;  %v2220_v23 = vadd.f32 %v1603_v20, %v1547_v60  ;;  %v613_v24 = vpop.f32.mrb[7].mxu0  ;;  %671 = vst [vmem:[%s2007_s7 + $0x70] sm:$0xff] %v2211_v17  ;;  %v2224_v25 = vadd.f32 %v1611_v22, %v1547_v60  ;;  %v645_v26 = vpop.f32.mrb[7].mxu1  ;;  %v2329_v20 = vld [vmem:[#allocation2 + $0x40] sm:$0xff]  ;;  %v780_v55 = vsel %vm764_vm11, %v2209_v15, 0.0 }
 0x14d   : > { %893 = vmax.xlane.f32.xlu1 %v2188_v9  ;;  %661 = vst [vmem:[%s2007_s7 + $0x20] sm:$0xff] %v2213_v19  ;;  %v2229_v27 = vadd.f32 %v1547_v60, %v613_v24  ;;  %669 = vst [vmem:[%s2007_s7 + $0x60] sm:$0xff] %v2215_v21  ;;  %v2233_v28 = vadd.f32 %v1547_v60, %v645_v26  ;;  %v2302_v60 = vld [vmem:[#allocation2] sm:$0xff]  ;;  %v2336_v24 = vld [vmem:[#allocation2 + $0x58] sm:$0xff] }
 0x14e   : > { %664 = vst [vmem:[%s2007_s7 + $0x38] sm:$0xff] %v2220_v23  ;;  %672 = vst [vmem:[%s2007_s7 + $0x78] sm:$0xff] %v2224_v25  ;;  %v2408_v26 = vld [vmem:[#allocation2 + $0x28] sm:$0xff] }
 0x14f   : > { %662 = vst [vmem:[%s2007_s7 + $0x28] sm:$0xff] %v2229_v27  ;;  %670 = vst [vmem:[%s2007_s7 + $0x68] sm:$0xff] %v2233_v28  ;;  %v779_v52 = vsel %vm763_vm4, %v2229_v27, 0.0 }
 0x150   : > { %873 = vmax.xlane.f32.xlu0 %v2192_v11 }
 0x151   : > { %889 = vmax.xlane.f32.xlu1 %v2197_v12 }
 0x154   : > { %883 = vmax.xlane.f32.xlu0 %v2209_v15 }
 0x155   : > { %885 = vmax.xlane.f32.xlu1 %v2220_v23 }
 0x158   : > { %899 = vmax.xlane.f32.xlu0 %v2211_v17 }
 0x159   : > { %901 = vmax.xlane.f32.xlu1 %v2224_v25 }
 0x15c   : > { %879 = vmax.xlane.f32.xlu0 %v2213_v19 }
 0x15d   : > { %881 = vmax.xlane.f32.xlu1 %v2229_v27 }
 0x160   : > { %895 = vmax.xlane.f32.xlu0 %v2215_v21 }
 0x161   : > { %897 = vmax.xlane.f32.xlu1 %v2233_v28 }
 0x172   : > { %732 = vperm.xlu1 %1690, %v2256_v29  }
 0x176   : > { %744 = vperm.xlu0 %1689, %v2262_v33   ;;  %738 = vperm.xlu1 %1690, %v2267_v36   ;;  %v2425_v36 = vld [vmem:[#allocation2 + $0x68] sm:$0xff] }
 0x177   : > { %2825 = vst [vmem:[#allocation27_spill] sm:$0xff] %v2425_v36 }
 0x17a   : > { %747 = vperm.xlu1 %1690, %v2274_v39  }
 0x195   : > { %790 = vadd.xlane.f32.xlu0 %v774_v47  ;;  %v2384_v47 = vld [vmem:[#allocation2 + $0x70] sm:$0xff] }
 0x196   : > { %2820 = vst [vmem:[#allocation22_spill] sm:$0xff] %v2384_v47 }
 0x199   : > { %794 = vadd.xlane.f32.xlu0 %v776_v49 }
 0x19d   : > { %796 = vadd.xlane.f32.xlu0 %v777_v51 }
 0x1a1   : > { %800 = vadd.xlane.f32.xlu0 %v779_v52 }
 0x1d1   : > { %v876_v61 = vpop.xlane.xlu0 %875 }
 0x1d2   : > { %v2305_v62 = vmax.f32 %v2300_v59, %v876_v61  ;;  %v872_v0 = vpop.xlane.xlu1 %871  ;;  %v2365_v61 = vld [vmem:[#allocation2 + $0x30] sm:$0xff] }
 0x1d3   : > { %v2308_v2 = vmax.f32 %v2302_v60, %v872_v0  ;;  %v2453_v0 = vld [vmem:[%s2764_s1 + $0x78] sm:$0xff] }
 0x1d4   : > { %1193 = vst.msk [vmem:[#allocation2 + $0x10] sm:$0xff] %vm838_vm5, %v2305_v62  ;;  %1011 = vperm.xlu1 %1690, %v2305_v62   ;;  %2828 = vst [vmem:[#allocation30_spill] sm:$0xff] %v2453_v0 }
 0x1d5   : > { %1191 = vst.msk [vmem:[#allocation2] sm:$0xff] %vm838_vm5, %v2308_v2  ;;  %v892_v13 = vpop.xlane.xlu0 %891 }
 0x1d6   : > { %v2324_v14 = vmax.f32 %v2310_v4, %v892_v13  ;;  %v878_v16 = vpop.xlane.xlu1 %877  ;;  %v2372_v13 = vld [vmem:[#allocation2 + $0x38] sm:$0xff] }
 0x1d7   : > { %v2327_v18 = vmax.f32 %v2317_v8, %v878_v16  ;;  %v2391_v16 = vld [vmem:[#allocation2 + $0x78] sm:$0xff] }
 0x1d8   : > { %1201 = vst.msk [vmem:[#allocation2 + $0x50] sm:$0xff] %vm838_vm5, %v2324_v14  ;;  %1051 = vperm.xlu1 %1690, %v2324_v14   ;;  %2821 = vst [vmem:[#allocation23_spill] sm:$0xff] %v2391_v16 }
 0x1d9   : > { %1194 = vst.msk [vmem:[#allocation2 + $0x18] sm:$0xff] %vm838_vm5, %v2327_v18  ;;  %v888_v40 = vpop.xlane.xlu0 %887 }
 0x1da   : > { %v2343_v41 = vmax.f32 %v2329_v20, %v888_v40  ;;  %v894_v42 = vpop.xlane.xlu1 %893 }
 0x1db   : > { %v2346_v44 = vmax.f32 %v2336_v24, %v894_v42 }
 0x1dc   : > { %1199 = vst.msk [vmem:[#allocation2 + $0x40] sm:$0xff] %vm838_vm5, %v2343_v41  ;;  %1001 = vperm.xlu1 %1690, %v2308_v2  }
 0x1dd   : > { %1202 = vst.msk [vmem:[#allocation2 + $0x58] sm:$0xff] %vm838_vm5, %v2346_v44  ;;  %v874_v49 = vpop.xlane.xlu0 %873 }
 0x1de   : > { %v2360_v50 = vmax.f32 %v2348_v46, %v874_v49  ;;  %v890_v51 = vpop.xlane.xlu1 %889 }
 0x1df   : > { %v2363_v52 = vmax.f32 %v2355_v48, %v890_v51 }
 0x1e0   : > { %1192 = vst.msk [vmem:[#allocation2 + $0x8] sm:$0xff] %vm838_vm5, %v2360_v50  ;;  %1041 = vperm.xlu1 %1690, %v2343_v41  }
 0x1e1   : > { %1200 = vst.msk [vmem:[#allocation2 + $0x48] sm:$0xff] %vm838_vm5, %v2363_v52  ;;  %v884_v40 = vpop.xlane.xlu0 %883 }
 0x1e2   : > { %v2379_v42 = vmax.f32 %v2365_v61, %v884_v40  ;;  %v886_v49 = vpop.xlane.xlu1 %885 }
 0x1e3   : > { %v2382_v51 = vmax.f32 %v2372_v13, %v886_v49 }
 0x1e4   : > { %1197 = vst.msk [vmem:[#allocation2 + $0x30] sm:$0xff] %vm838_vm5, %v2379_v42  ;;  %1031 = vperm.xlu1 %1690, %v2379_v42  }
 0x1e5   : > { %1198 = vst.msk [vmem:[#allocation2 + $0x38] sm:$0xff] %vm838_vm5, %v2382_v51  ;;  %v900_v40 = vpop.xlane.xlu0 %899 }
 0x1e6   : > { %v2396_v10 = vmax.f32 %v2384_v47, %v900_v40  ;;  %v902_v49 = vpop.xlane.xlu1 %901 }
 0x1e7   : > { %v2399_v22 = vmax.f32 %v2391_v16, %v902_v49 }
 0x1e8   : > { %2822 = vst [vmem:[#allocation24_spill] sm:$0xff] %v2396_v10  ;;  %1205 = vst.msk [vmem:[#allocation2 + $0x70] sm:$0xff] %vm838_vm5, %v2396_v10  ;;  %1071 = vperm.xlu1 %1690, %v2396_v10   ;;  %v703_v10 = vld [vmem:[#allocation4 + $0x48] sm:$0xff] }
 0x1e9   : > { %2823 = vst [vmem:[#allocation25_spill] sm:$0xff] %v2399_v22  ;;  %1206 = vst.msk [vmem:[#allocation2 + $0x78] sm:$0xff] %vm838_vm5, %v2399_v22  ;;  %v880_v40 = vpop.xlane.xlu0 %879 }
 0x1ea   : > { %v2413_v39 = vmax.f32 %v2401_v6, %v880_v40  ;;  %v882_v49 = vpop.xlane.xlu1 %881 }
 0x1eb   : > { %v2416_v33 = vmax.f32 %v2408_v26, %v882_v49 }
 0x1ec   : > { %1195 = vst.msk [vmem:[#allocation2 + $0x20] sm:$0xff] %vm838_vm5, %v2413_v39  ;;  %1021 = vperm.xlu1 %1690, %v2413_v39  }
 0x1ed   : > { %1196 = vst.msk [vmem:[#allocation2 + $0x28] sm:$0xff] %vm838_vm5, %v2416_v33  ;;  %v896_v40 = vpop.xlane.xlu0 %895 }
 0x1ee   : > { %v2430_v45 = vmax.f32 %v2418_v53, %v896_v40  ;;  %v898_v49 = vpop.xlane.xlu1 %897  ;;  %v2445_v40 = vld [vmem:[%s2764_s1 + $0x68] sm:$0xff] }
 0x1ef   : > { %v2433_v29 = vmax.f32 %v2425_v36, %v898_v49  ;;  %2827 = vst [vmem:[#allocation29_spill] sm:$0xff] %v2445_v40 }
 0x1f0   : > { %2826 = vst [vmem:[#allocation28_spill] sm:$0xff] %v2430_v45  ;;  %1203 = vst.msk [vmem:[#allocation2 + $0x60] sm:$0xff] %vm838_vm5, %v2430_v45  ;;  %1061 = vperm.xlu1 %1690, %v2430_v45  }
 0x1f1   : > { %1204 = vst.msk [vmem:[#allocation2 + $0x68] sm:$0xff] %vm838_vm5, %v2433_v29 }
 0x1f2   : > { %v733_v38 = vpop.permute.xlu1 %732 }
 0x1f3   : > { %vm765_vm6 = vcmp.eq.s32.totalorder %v2280_v43, %v733_v38 }
 0x1f4   : > { %750 = vperm.xlu1 %1690, %v2445_v40   ;;  %v781_v49 = vsel %vm765_vm6, %v2220_v23, 0.0 }
 0x1f5   : > { %804 = vadd.xlane.f32.xlu0 %v781_v49  ;;  %v745_v37 = vpop.permute.xlu0 %744 }
 0x1f6   : > { %v739_v35 = vpop.permute.xlu1 %738  ;;  %vm769_vm8 = vcmp.eq.s32.totalorder %v2280_v43, %v745_v37  ;;  %v694_v37 = vld [vmem:[#allocation4] sm:$0xff] }
 0x1f7   : > { %vm767_vm7 = vcmp.eq.s32.totalorder %v2280_v43, %v739_v35  ;;  %v785_v38 = vsel %vm769_vm8, %v2188_v9, 0.0  ;;  %v775_v35 = vsel %vm759_vm9, %v2192_v11, 0.0 }
 0x1f8   : > { %756 = vperm.xlu1 %1690, %v2453_v0   ;;  %v783_v34 = vsel %vm767_vm7, %v2197_v12, 0.0  ;;  %v782_v0 = vsel %vm766_vm12, %v2179_v5, 0.0 }
 0x1f9   : > { %808 = vadd.xlane.f32.xlu0 %v783_v34  ;;  %v778_v34 = vsel %vm762_vm10, %v2213_v19, 0.0 }
 0x1fd   : > { %812 = vadd.xlane.f32.xlu0 %v785_v38 }
 0x213   : > { %1006 = vperm.xlu0 %1689, %v2360_v50  }
 0x217   : > { %1016 = vperm.xlu0 %1689, %v2327_v18  }
 0x21b   : > { %1046 = vperm.xlu0 %1689, %v2363_v52  }
 0x21c   : > { %792 = vadd.xlane.f32.xlu1 %v775_v35  ;;  %v696_v35 = vld [vmem:[#allocation4 + $0x10] sm:$0xff] }
 0x21f   : > { %1056 = vperm.xlu0 %1689, %v2346_v44  }
 0x220   : > { %798 = vadd.xlane.f32.xlu1 %v778_v34 }
 0x222   : > { %v791_v49 = vpop.xlane.xlu0 %790 }
 0x223   : > { %v822_v38 = vadd.f32 %v791_v49, %v694_v37  ;;  %753 = vperm.xlu0 %1689, %v2475_v54   ;;  %v697_v37 = vld [vmem:[#allocation4 + $0x18] sm:$0xff]  ;;  %v748_v49 = vpop.permute.xlu1 %747 }
 0x224   : > { %802 = vadd.xlane.f32.xlu1 %v780_v55  ;;  %vm770_vm14 = vcmp.eq.s32.totalorder %v2280_v43, %v748_v49  ;;  %v699_v55 = vld [vmem:[#allocation4 + $0x28] sm:$0xff] }
 0x225   : > { %839 = vst.msk [vmem:[#allocation4] sm:$0xff] %vm838_vm5, %v822_v38  ;;  %v784_v38 = vsel %vm768_vm13, %v2175_v1, 0.0  ;;  %v786_v58 = vsel %vm770_vm14, %v2215_v21, 0.0 }
 0x226   : > { %v795_v56 = vpop.xlane.xlu0 %794 }
 0x227   : > { %v824_v34 = vadd.f32 %v795_v56, %v696_v35  ;;  %1036 = vperm.xlu0 %1689, %v2382_v51  }
 0x228   : > { %806 = vadd.xlane.f32.xlu1 %v782_v0 }
 0x229   : > { %841 = vst.msk [vmem:[#allocation4 + $0x10] sm:$0xff] %vm838_vm5, %v824_v34 }
 0x22a   : > { %v797_v54 = vpop.xlane.xlu0 %796 }
 0x22b   : > { %v825_v57 = vadd.f32 %v797_v54, %v697_v37  ;;  %1076 = vperm.xlu0 %1689, %v2399_v22   ;;  %v705_v22 = vld [vmem:[#allocation4 + $0x58] sm:$0xff] }
 0x22c   : > { %810 = vadd.xlane.f32.xlu1 %v784_v38 }
 0x22d   : > { %842 = vst.msk [vmem:[#allocation4 + $0x18] sm:$0xff] %vm838_vm5, %v825_v57 }
 0x22e   : > { %v801_v35 = vpop.xlane.xlu0 %800 }
 0x22f   : > { %v827_v56 = vadd.f32 %v801_v35, %v699_v55  ;;  %1026 = vperm.xlu0 %1689, %v2416_v33  }
 0x230   : > { %814 = vadd.xlane.f32.xlu1 %v786_v58 }
 0x231   : > { %844 = vst.msk [vmem:[#allocation4 + $0x28] sm:$0xff] %vm838_vm5, %v827_v56 }
 0x233   : > { %1066 = vperm.xlu0 %1689, %v2433_v29  }
 0x253   : > { %v1012_v0 = vpop.permute.xlu1 %1011 }
 0x257   : > { %v1052_v54 = vpop.permute.xlu1 %1051 }
 0x25b   : > { %v1002_v34 = vpop.permute.xlu1 %1001 }
 0x25f   : > { %v1042_v37 = vpop.permute.xlu1 %1041 }
 0x263   : > { %v2495_v49 = vpop.permute.xlu1 %1031 }
 0x267   : > { %v2497_v38 = vpop.permute.xlu1 %1071 }
 0x26b   : > { %v2499_v57 = vpop.permute.xlu1 %1021 }
 0x26f   : > { %v2501_v55 = vpop.permute.xlu1 %1061 }
 0x273   : > { %v751_v35 = vpop.permute.xlu1 %750 }
 0x274   : > { %vm771_vm15 = vcmp.eq.s32.totalorder %v2280_v43, %v751_v35 }
 0x275   : > { %v787_v58 = vsel %vm771_vm15, %v2233_v28, 0.0 }
 0x276   : > { %816 = vadd.xlane.f32.xlu0 %v787_v58 }
 0x277   : > { %v757_v56 = vpop.permute.xlu1 %756 }
 0x278   : > { %vm773_vm0 = vcmp.eq.s32.totalorder %v2280_v43, %v757_v56  ;;  %v1081_v56 = vsub.f32 %v2173_v63, %v1012_v0 }
 0x279   : > { %v789_v40 = vsel %vm773_vm0, %v2224_v25, 0.0 }
 0x27a   : > { %820 = vadd.xlane.f32.xlu0 %v789_v40 }
 0x282   : > { %v805_v32 = vpop.xlane.xlu0 %804 }
 0x283   : > { %v829_v30 = vadd.f32 %v805_v32, %v701_v31  ;;  %v1099_v31 = vmul.f32 1.442695, %v1081_v56  ;;  %v1089_v32 = vsub.f32 %v2175_v1, %v1052_v54  ;;  %v1083_v56 = vsub.f32 %v2213_v19, %v2499_v57  ;;  %v700_v57 = vld [vmem:[#allocation4 + $0x30] sm:$0xff] }
 0x285   : > { %846 = vst.msk [vmem:[#allocation4 + $0x38] sm:$0xff] %vm838_vm5, %v829_v30 }
 0x286   : > { %v809_v47 = vpop.xlane.xlu0 %808 }
 0x287   : > { %v831_v16 = vadd.f32 %v809_v47, %v703_v10  ;;  %v1115_v10 = vmul.f32 1.442695, %v1089_v32  ;;  %v1079_v47 = vsub.f32 %v2177_v3, %v1002_v34 }
 0x289   : > { %848 = vst.msk [vmem:[#allocation4 + $0x48] sm:$0xff] %vm838_vm5, %v831_v16  ;;  %v1095_v63 = vmul.f32 1.442695, %v1079_v47  ;;  %v1091_v47 = vsub.f32 %v2215_v21, %v2501_v55 }
 0x28a   : > { %v813_v35 = vpop.xlane.xlu0 %812 }
 0x28b   : > { %v833_v45 = vadd.f32 %v813_v35, %v705_v22 }
 0x28d   : > { %850 = vst.msk [vmem:[#allocation4 + $0x58] sm:$0xff] %vm838_vm5, %v833_v45 }
 0x292   : > { %v1007_v58 = vpop.permute.xlu0 %1006 }
 0x293   : > { %v1080_v22 = vsub.f32 %v2192_v11, %v1007_v58 }
 0x295   : > { %v1097_v0 = vmul.f32 1.442695, %v1080_v22 }
 0x296   : > { %v1017_v53 = vpop.permute.xlu0 %1016 }
 0x297   : > { %v1082_v40 = vsub.f32 %v2183_v7, %v1017_v53  ;;  %v1087_v53 = vsub.f32 %v2179_v5, %v1042_v37  ;;  %v695_v37 = vld [vmem:[#allocation4 + $0x8] sm:$0xff] }
 0x299   : > { %v1101_v36 = vmul.f32 1.442695, %v1082_v40  ;;  %v1111_v11 = vmul.f32 1.442695, %v1087_v53 }
 0x29a   : > { %v1047_v30 = vpop.permute.xlu0 %1046 }
 0x29b   : > { %1699 = vpow2.f32 %v1101_v36  ;;  %v1088_v1 = vsub.f32 %v2197_v12, %v1047_v30 }
 0x29c   : > { %1701 = vpow2.f32 %v1099_v31 }
 0x29d   : > { %1703 = vpow2.f32 %v1115_v10  ;;  %v1113_v5 = vmul.f32 1.442695, %v1088_v1 }
 0x29e   : > { %v1057_v16 = vpop.permute.xlu0 %1056 }
 0x29f   : > { %v1090_v45 = vsub.f32 %v2188_v9, %v1057_v16  ;;  %v1085_v9 = vsub.f32 %v2209_v15, %v2495_v49  ;;  %v698_v15 = vld [vmem:[#allocation4 + $0x20] sm:$0xff] }
 0x2a1   : > { %v1117_v35 = vmul.f32 1.442695, %v1090_v45 }
 0x2a2   : > { %v754_v7 = vpop.permute.xlu0 %753 }
 0x2a3   : > { %1705 = vpow2.f32 %v1117_v35  ;;  %vm772_vm1 = vcmp.eq.s32.totalorder %v2280_v43, %v754_v7  ;;  %v1107_v43 = vmul.f32 1.442695, %v1085_v9  ;;  %v1093_v7 = vsub.f32 %v2211_v17, %v2497_v38 }
 0x2a4   : > { %v788_v36 = vsel %vm772_vm1, %v2211_v17, 0.0  ;;  %1707 = vpow2.f32 %v1095_v63 }
 0x2a5   : > { %v1700_v3 = vpop.eup %1699  ;;  %818 = vadd.xlane.f32.xlu1 %v788_v36  ;;  %1709 = vpow2.f32 %v1097_v0  ;;  %v1119_v0 = vmul.f32 1.442695, %v1091_v47  ;;  %v702_v36 = vld [vmem:[#allocation4 + $0x40] sm:$0xff] }
 0x2a6   : > { %1133 = vadd.xlane.f32.xlu0 %v1700_v3  ;;  %v1037_v54 = vpop.permute.xlu0 %1036  ;;  %v1702_v12 = vpop.eup %1701  ;;  %1711 = vpow2.f32 %v1111_v11 }
 0x2a7   : > { %v1086_v34 = vsub.f32 %v2220_v23, %v1037_v54  ;;  %1713 = vpow2.f32 %v1113_v5  ;;  %v1704_v49 = vpop.eup %1703  ;;  %v1103_v23 = vmul.f32 1.442695, %v1083_v56  ;;  %v1123_v5 = vmul.f32 1.442695, %v1093_v7 }
 0x2a8   : > { %1715 = vpow2.f32 %v1107_v43  ;;  %v2832_v7 = vsub.f32 %v2310_v4, %v2324_v14  ;;  %v708_v4 = vld [vmem:[#allocation4 + $0x70] sm:$0xff]  ;;  %v2836_v14 = vsub.f32 %v2355_v48, %v2363_v52  ;;  %v940_v48 = vsub.f32 %v2408_v26, %v2416_v33 }
 0x2a9   : > { %v793_v58 = vpop.xlane.xlu1 %792  ;;  %1131 = vadd.xlane.f32.xlu1 %v1702_v12  ;;  %v1109_v32 = vmul.f32 1.442695, %v1086_v34  ;;  %v704_v34 = vld [vmem:[#allocation4 + $0x50] sm:$0xff] }
 0x2aa   : > { %v823_v40 = vadd.f32 %v793_v58, %v695_v37  ;;  %v1077_v31 = vpop.permute.xlu0 %1076  ;;  %v706_v58 = vld [vmem:[#allocation4 + $0x60] sm:$0xff]  ;;  %v2839_v33 = vld [vmem:[#allocation27_spill] sm:$0xff] }
 0x2ab   : > { %1717 = vpow2.f32 %v1109_v32  ;;  %v1094_v1 = vsub.f32 %v2224_v25, %v1077_v31  ;;  %v948_v26 = vsub.f32 %v2839_v33, %v2433_v29 }
 0x2ac   : > { %840 = vst.msk [vmem:[#allocation4 + $0x8] sm:$0xff] %vm838_vm5, %v823_v40  ;;  %1719 = vpow2.f32 %v1103_v23 }
 0x2ad   : > { %v1706_v30 = vpop.eup %1705  ;;  %v799_v10 = vpop.xlane.xlu1 %798  ;;  %1147 = vadd.xlane.f32.xlu1 %v1704_v49  ;;  %v1125_v38 = vmul.f32 1.442695, %v1094_v1 }
 0x2ae   : > { %v826_v16 = vadd.f32 %v799_v10, %v698_v15  ;;  %1149 = vadd.xlane.f32.xlu0 %v1706_v30  ;;  %v1027_v22 = vpop.permute.xlu0 %1026  ;;  %v1708_v45 = vpop.eup %1707  ;;  %v707_v10 = vld [vmem:[#allocation4 + $0x68] sm:$0xff] }
 0x2af   : > { %v1084_v19 = vsub.f32 %v2229_v27, %v1027_v22  ;;  %v1710_v35 = vpop.eup %1709 }
 0x2b0   : > { %843 = vst.msk [vmem:[#allocation4 + $0x20] sm:$0xff] %vm838_vm5, %v826_v16  ;;  %v1712_v3 = vpop.eup %1711  ;;  %v709_v16 = vld [vmem:[#allocation4 + $0x78] sm:$0xff] }
 0x2b1   : > { %v1105_v63 = vmul.f32 1.442695, %v1084_v19  ;;  %v803_v53 = vpop.xlane.xlu1 %802  ;;  %1127 = vadd.xlane.f32.xlu1 %v1708_v45  ;;  %v1714_v11 = vpop.eup %1713 }
 0x2b2   : > { %v828_v21 = vadd.f32 %v803_v53, %v700_v57  ;;  %1129 = vadd.xlane.f32.xlu0 %v1710_v35  ;;  %v1067_v55 = vpop.permute.xlu0 %1066  ;;  %v1716_v37 = vpop.eup %1715  ;;  %v2830_v57 = vsub.f32 %v2317_v8, %v2327_v18  ;;  %v2831_v35 = vsub.f32 %v2300_v59, %v2305_v62  ;;  %v946_v53 = vsub.f32 %v2336_v24, %v2346_v44  ;;  %v922_v18 = vld [vmem:[#allocation3 + $0x18] sm:$0xff] }
 0x2b3   : > { %1721 = vpow2.f32 %v1105_v63  ;;  %v1092_v27 = vsub.f32 %v2233_v28, %v1067_v55  ;;  %v2833_v55 = vsub.f32 %v2302_v60, %v2308_v2  ;;  %v2834_v59 = vsub.f32 %v2348_v46, %v2360_v50  ;;  %v921_v50 = vld [vmem:[#allocation3 + $0x10] sm:$0xff] }
 0x2b4   : > { %845 = vst.msk [vmem:[#allocation4 + $0x30] sm:$0xff] %vm838_vm5, %v828_v21  ;;  %1723 = vpow2.f32 %v1119_v0  ;;  %v957_v45 = vmul.f32 1.442695, %v2830_v57  ;;  %v955_v63 = vmul.f32 1.442695, %v2831_v35  ;;  %v2835_v24 = vsub.f32 %v2329_v20, %v2343_v41 }
 0x2b5   : > { %v1121_v9 = vmul.f32 1.442695, %v1092_v27  ;;  %v807_v54 = vpop.xlane.xlu1 %806  ;;  %1143 = vadd.xlane.f32.xlu1 %v1712_v3  ;;  %v1718_v25 = vpop.eup %1717  ;;  %v971_v0 = vmul.f32 1.442695, %v2832_v7  ;;  %v973_v21 = vmul.f32 1.442695, %v946_v53  ;;  %v942_v2 = vsub.f32 %v2372_v13, %v2382_v51 }
 0x2b6   : > { %v830_v17 = vadd.f32 %v807_v54, %v702_v36  ;;  %1145 = vadd.xlane.f32.xlu0 %v1714_v11  ;;  %v1720_v43 = vpop.eup %1719  ;;  %v951_v1 = vmul.f32 1.442695, %v2833_v55  ;;  %v953_v62 = vmul.f32 1.442695, %v2834_v59  ;;  %v967_v44 = vmul.f32 1.442695, %v2835_v24 }
 0x2b7   : > { %1725 = vpow2.f32 %v1121_v9  ;;  %v969_v60 = vmul.f32 1.442695, %v2836_v14  ;;  %v2837_v20 = vsub.f32 %v2365_v61, %v2379_v42  ;;  %v965_v54 = vmul.f32 1.442695, %v942_v2  ;;  %v928_v7 = vld [vmem:[#allocation3 + $0x48] sm:$0xff] }
 0x2b8   : > { %847 = vst.msk [vmem:[#allocation4 + $0x40] sm:$0xff] %vm838_vm5, %v830_v17  ;;  %1727 = vpow2.f32 %v1123_v5  ;;  %v929_v5 = vld [vmem:[#allocation3 + $0x50] sm:$0xff]  ;;  %v2838_v61 = vsub.f32 %v2401_v6, %v2413_v39  ;;  %v2841_v39 = vld [vmem:[#allocation28_spill] sm:$0xff] }
 0x2b9   : > { %v811_v28 = vpop.xlane.xlu1 %810  ;;  %1139 = vadd.xlane.f32.xlu1 %v1716_v37  ;;  %1729 = vpow2.f32 %v1125_v38  ;;  %v963_v41 = vmul.f32 1.442695, %v2837_v20  ;;  %v961_v37 = vmul.f32 1.442695, %v940_v48  ;;  %v923_v20 = vld [vmem:[#allocation3 + $0x20] sm:$0xff]  ;;  %v924_v48 = vld [vmem:[#allocation3 + $0x28] sm:$0xff] }
 0x2ba   : > { %v832_v12 = vadd.f32 %v811_v28, %v704_v34  ;;  %1141 = vadd.xlane.f32.xlu0 %v1718_v25  ;;  %1731 = vpow2.f32 %v957_v45  ;;  %v930_v34 = vld [vmem:[#allocation3 + $0x58] sm:$0xff]  ;;  %v959_v42 = vmul.f32 1.442695, %v2838_v61  ;;  %v927_v45 = vld [vmem:[#allocation3 + $0x40] sm:$0xff] }
 0x2bb   : > { %1733 = vpow2.f32 %v955_v63 }
 0x2bc   : > { %849 = vst.msk [vmem:[#allocation4 + $0x50] sm:$0xff] %vm838_vm5, %v832_v12  ;;  %1735 = vpow2.f32 %v971_v0  ;;  %v2845_v0 = vld [vmem:[#allocation22_spill] sm:$0xff] }
 0x2bd   : > { %v1722_v56 = vpop.eup %1721  ;;  %v815_v40 = vpop.xlane.xlu1 %814  ;;  %1135 = vadd.xlane.f32.xlu1 %v1720_v43  ;;  %1737 = vpow2.f32 %v973_v21  ;;  %v919_v43 = vld [vmem:[#allocation3] sm:$0xff]  ;;  %v2846_v21 = vld [vmem:[#allocation24_spill] sm:$0xff] }
 0x2be   : > { %v834_v31 = vadd.f32 %v815_v40, %v706_v58  ;;  %1137 = vadd.xlane.f32.xlu0 %v1722_v56  ;;  %v1724_v32 = vpop.eup %1723  ;;  %1739 = vpow2.f32 %v951_v1  ;;  %v2847_v55 = vsub.f32 %v2845_v0, %v2846_v21  ;;  %v1211_v0 = vld [vmem:[#allocation2] sm:$0xff] (!%p1557_p2) }
 0x2bf   : > { %1741 = vpow2.f32 %v953_v62  ;;  %v2848_v21 = vld [vmem:[#allocation9_spill] sm:$0xff] (!%p1557_p2) }
 0x2c0   : > { %851 = vst.msk [vmem:[#allocation4 + $0x60] sm:$0xff] %vm838_vm5, %v834_v31  ;;  %1743 = vpow2.f32 %v967_v44  ;;  %v979_v1 = vmul.f32 1.442695, %v2847_v55  ;;  %vm1291_vm2 = vcmp.eq.s32.totalorder (!%p1557_p2), %v2848_v21, 0  ;;  %v1307_v55 = vld [vmem:[#allocation4] sm:$0xff] (!%p1557_p2) }
 0x2c1   : > { %v1726_v15 = vpop.eup %1725  ;;  %1151 = vadd.xlane.f32.xlu1 %v1724_v32  ;;  %1745 = vpow2.f32 %v969_v60  ;;  %v920_v32 = vld [vmem:[#allocation3 + $0x8] sm:$0xff] }
 0x2c2   : > { %1153 = vadd.xlane.f32.xlu0 %v1726_v15  ;;  %v1728_v49 = vpop.eup %1727  ;;  %1747 = vpow2.f32 %v963_v41  ;;  %v2840_v15 = vld [vmem:[#allocation26_spill] sm:$0xff] }
 0x2c3   : > { %v1730_v30 = vpop.eup %1729  ;;  %1749 = vpow2.f32 %v965_v54  ;;  %v2842_v6 = vsub.f32 %v2840_v15, %v2841_v39 }
 0x2c4   : > { %v1732_v8 = vpop.eup %1731  ;;  %1751 = vpow2.f32 %v959_v42 }
 0x2c5   : > { %1155 = vadd.xlane.f32.xlu1 %v1728_v49  ;;  %v1734_v27 = vpop.eup %1733  ;;  %v986_v46 = vmul.f32 %v1732_v8, %v922_v18  ;;  %v975_v49 = vmul.f32 1.442695, %v2842_v6  ;;  %1753 = vpow2.f32 %v961_v37  ;;  %v932_v37 = vld [vmem:[#allocation3 + $0x68] sm:$0xff] }
 0x2c6   : > { %1157 = vadd.xlane.f32.xlu0 %v1730_v30  ;;  %v985_v52 = vmul.f32 %v1734_v27, %v921_v50  ;;  %v1736_v13 = vpop.eup %1735  ;;  %v926_v27 = vld [vmem:[#allocation3 + $0x38] sm:$0xff] }
 0x2c7   : > { %v1738_v17 = vpop.eup %1737  ;;  %v993_v25 = vmul.f32 %v1736_v13, %v929_v5  ;;  %1755 = vpow2.f32 %v975_v49 }
 0x2c8   : > { %v1740_v28 = vpop.eup %1739  ;;  %v994_v58 = vmul.f32 %v1738_v17, %v930_v34 }
 0x2c9   : > { %v1742_v56 = vpop.eup %1741 }
 0x2ca   : > { %v984_v57 = vmul.f32 %v1742_v56, %v920_v32 }
 0x303   : > { %v817_v23 = vpop.xlane.xlu0 %816 }
 0x304   : > { %v835_v47 = vadd.f32 %v817_v23, %v707_v10  ;;  %v2843_v10 = vld [vmem:[#allocation25_spill] sm:$0xff]  ;;  %v2844_v23 = vld [vmem:[#allocation23_spill] sm:$0xff] }
 0x305   : > { %v950_v29 = vsub.f32 %v2844_v23, %v2843_v10 }
 0x306   : > { %852 = vst.msk [vmem:[#allocation4 + $0x68] sm:$0xff] %vm838_vm5, %v835_v47  ;;  %v977_v47 = vmul.f32 1.442695, %v948_v26 }
 0x307   : > { %v821_v22 = vpop.xlane.xlu0 %820  ;;  %v981_v62 = vmul.f32 1.442695, %v950_v29 }
 0x308   : > { %v837_v19 = vadd.f32 %v821_v22, %v709_v16  ;;  %v983_v16 = vmul.f32 %v1740_v28, %v919_v43  ;;  %v1744_v22 = vpop.eup %1743  ;;  %1757 = vpow2.f32 %v977_v47 }
 0x309   : > { %v1746_v35 = vpop.eup %1745  ;;  %v991_v8 = vmul.f32 %v1744_v22, %v927_v45  ;;  %1759 = vpow2.f32 %v979_v1  ;;  %v2849_v1 = vld [vmem:[#allocation11_spill] sm:$0xff] (!%p1557_p2) }
 0x30a   : > { %854 = vst.msk [vmem:[#allocation4 + $0x78] sm:$0xff] %vm838_vm5, %v837_v19  ;;  %v1748_v18 = vpop.eup %1747  ;;  %v992_v44 = vmul.f32 %v1746_v35, %v928_v7  ;;  %1761 = vpow2.f32 %v981_v62  ;;  %vm1292_vm3 = vcmp.eq.s32.totalorder (!%p1557_p2), %v2849_v1, 0 }
 0x30b   : > { %v1750_v14 = vpop.eup %1749 }
 0x30c   : > { %v1752_v50 = vpop.eup %1751 }
 0x30d   : > { %v1754_v41 = vpop.eup %1753  ;;  %v987_v13 = vmul.f32 %v1752_v50, %v923_v20  ;;  %v1308_v20 = vld [vmem:[#allocation4 + $0x8] sm:$0xff] (!%p1557_p2) }
 0x30e   : > { %v988_v17 = vmul.f32 %v1754_v41, %v924_v48 }
 0x332   : > { %v819_v36 = vpop.xlane.xlu1 %818 }
 0x333   : > { %v836_v3 = vadd.f32 %v819_v36, %v708_v4  ;;  %v1134_v11 = vpop.xlane.xlu0 %1133  ;;  %v925_v4 = vld [vmem:[#allocation3 + $0x30] sm:$0xff] }
 0x334   : > { %v1162_v9 = vadd.f32 %v1134_v11, %v986_v46  ;;  %v989_v46 = vmul.f32 %v1748_v18, %v925_v4  ;;  %v990_v11 = vmul.f32 %v1750_v14, %v926_v27  ;;  %v2852_v4 = vld [vmem:[#allocation13_spill] sm:$0xff] (!%p1557_p2)  ;;  %v1213_v27 = vld [vmem:[#allocation2 + $0x10] sm:$0xff] (!%p1557_p2) }
 0x335   : > { %853 = vst.msk [vmem:[#allocation4 + $0x70] sm:$0xff] %vm838_vm5, %v836_v3  ;;  %vm1295_vm7 = vcmp.eq.s32.totalorder (!%p1557_p2), %v2852_v4, 0  ;;  %v1223_v4 = vld [vmem:[#allocation2 + $0x60] sm:$0xff] (!%p1557_p2) }
 0x336   : > { %1178 = vst.msk [vmem:[#allocation3 + $0x18] sm:$0xff] %vm838_vm5, %v1162_v9  ;;  %v1132_v51 = vpop.xlane.xlu1 %1131 }
 0x337   : > { %v1161_v38 = vadd.f32 %v1132_v51, %v985_v52  ;;  %v1756_v51 = vpop.eup %1755 }
 0x338   : > { %v1758_v34 = vpop.eup %1757 }
 0x339   : > { %1177 = vst.msk [vmem:[#allocation3 + $0x10] sm:$0xff] %vm838_vm5, %v1161_v38  ;;  %v931_v38 = vld [vmem:[#allocation3 + $0x60] sm:$0xff] }
 0x33a   : > { %v1148_v12 = vpop.xlane.xlu1 %1147  ;;  %v995_v26 = vmul.f32 %v1756_v51, %v931_v38  ;;  %v1309_v51 = vld [vmem:[#allocation4 + $0x10] sm:$0xff] (!%p1557_p2)  ;;  %v2856_v38 = vld [vmem:[#allocation16_spill] sm:$0xff] (!%p1557_p2) }
 0x33b   : > { %v1169_v40 = vadd.f32 %v1148_v12, %v993_v25  ;;  %v1150_v31 = vpop.xlane.xlu0 %1149  ;;  %v1760_v25 = vpop.eup %1759  ;;  %v996_v12 = vmul.f32 %v1758_v34, %v932_v37  ;;  %vm1299_vm11 = vcmp.eq.s32.totalorder (!%p1557_p2), %v2856_v38, 0 }
 0x33c   : > { %v1170_v30 = vadd.f32 %v1150_v31, %v994_v58  ;;  %v933_v58 = vld [vmem:[#allocation3 + $0x70] sm:$0xff]  ;;  %v1762_v43 = vpop.eup %1761  ;;  %v934_v31 = vld [vmem:[#allocation3 + $0x78] sm:$0xff] }
 0x33d   : > { %1185 = vst.msk [vmem:[#allocation3 + $0x50] sm:$0xff] %vm838_vm5, %v1169_v40  ;;  %v997_v15 = vmul.f32 %v1760_v25, %v933_v58  ;;  %v998_v6 = vmul.f32 %v1762_v43, %v934_v31  ;;  %v1216_v25 = vld [vmem:[#allocation2 + $0x28] sm:$0xff] (!%p1557_p2)  ;;  %v1217_v31 = vld [vmem:[#allocation2 + $0x30] sm:$0xff] (!%p1557_p2) }
 0x33e   : > { %1186 = vst.msk [vmem:[#allocation3 + $0x58] sm:$0xff] %vm838_vm5, %v1170_v30  ;;  %v1128_v19 = vpop.xlane.xlu1 %1127 }
 0x33f   : > { %v1159_v63 = vadd.f32 %v1128_v19, %v983_v16  ;;  %v1130_v53 = vpop.xlane.xlu0 %1129  ;;  %v1230_v16 = vld [vmem:[#allocation3 + $0x18] sm:$0xff] (!%p1557_p2) }
 0x340   : > { %v1160_v59 = vadd.f32 %v1130_v53, %v984_v57  ;;  %v1229_v47 = vld [vmem:[#allocation3 + $0x10] sm:$0xff] (!%p1557_p2) }
 0x341   : > { %1175 = vst.msk [vmem:[#allocation3] sm:$0xff] %vm838_vm5, %v1159_v63 }
 0x342   : > { %1176 = vst.msk [vmem:[#allocation3 + $0x8] sm:$0xff] %vm838_vm5, %v1160_v59  ;;  %v1144_v24 = vpop.xlane.xlu1 %1143  ;;  %v2850_v59 = vld [vmem:[#allocation10_spill] sm:$0xff] (!%p1557_p2) }
 0x343   : > { %v1167_v60 = vadd.f32 %v1144_v24, %v991_v8  ;;  %v1146_v2 = vpop.xlane.xlu0 %1145  ;;  %vm1293_vm4 = vcmp.eq.s32.totalorder (!%p1557_p2), %v2850_v59, 0  ;;  %v1212_v24 = vld [vmem:[#allocation2 + $0x8] sm:$0xff] (!%p1557_p2)  ;;  %v1221_v59 = vld [vmem:[#allocation2 + $0x50] sm:$0xff] (!%p1557_p2) }
 0x344   : > { %v1168_v36 = vadd.f32 %v1146_v2, %v992_v44  ;;  %v1237_v53 = vld [vmem:[#allocation3 + $0x50] sm:$0xff] (!%p1557_p2)  ;;  %v2851_v44 = vld [vmem:[#allocation12_spill] sm:$0xff] (!%p1557_p2) }
 0x345   : > { %1183 = vst.msk [vmem:[#allocation3 + $0x40] sm:$0xff] %vm838_vm5, %v1167_v60  ;;  %v1238_v62 = vld [vmem:[#allocation3 + $0x58] sm:$0xff] (!%p1557_p2)  ;;  %vm1294_vm6 = vcmp.eq.s32.totalorder (!%p1557_p2), %v2851_v44, 0 }
 0x346   : > { %1184 = vst.msk [vmem:[#allocation3 + $0x48] sm:$0xff] %vm838_vm5, %v1168_v36  ;;  %v1140_v3 = vpop.xlane.xlu1 %1139  ;;  %v2853_v36 = vld [vmem:[#allocation14_spill] sm:$0xff] (!%p1557_p2)  ;;  %v1222_v44 = vld [vmem:[#allocation2 + $0x58] sm:$0xff] (!%p1557_p2) }
 0x347   : > { %v1165_v9 = vadd.f32 %v1140_v3, %v989_v46  ;;  %v1142_v54 = vpop.xlane.xlu0 %1141  ;;  %vm1296_vm8 = vcmp.eq.s32.totalorder (!%p1557_p2), %v2853_v36, 0  ;;  %v2854_v46 = vld [vmem:[#allocation15_spill] sm:$0xff] (!%p1557_p2)  ;;  %v1224_v36 = vld [vmem:[#allocation2 + $0x68] sm:$0xff] (!%p1557_p2) }
 0x348   : > { %v1166_v52 = vadd.f32 %v1142_v54, %v990_v11  ;;  %v1227_v23 = vld [vmem:[#allocation3] sm:$0xff] (!%p1557_p2)  ;;  %vm1297_vm9 = vcmp.eq.s32.totalorder (!%p1557_p2), %v2854_v46, 0  ;;  %v2855_v54 = vld [vmem:[#allocation18_spill] sm:$0xff] (!%p1557_p2)  ;;  %v1225_v46 = vld [vmem:[#allocation2 + $0x70] sm:$0xff] (!%p1557_p2) }
 0x349   : > { %1181 = vst.msk [vmem:[#allocation3 + $0x30] sm:$0xff] %vm838_vm5, %v1165_v9  ;;  %1763 = vlog2.f32 (!%p1557_p2), %v1227_v23  ;;  %v1228_v29 = vld [vmem:[#allocation3 + $0x8] sm:$0xff] (!%p1557_p2)  ;;  %v1214_v9 = vld [vmem:[#allocation2 + $0x18] sm:$0xff] (!%p1557_p2)  ;;  %vm1298_vm10 = vcmp.eq.s32.totalorder (!%p1557_p2), %v2855_v54, 0 }
 0x34a   : > { %1182 = vst.msk [vmem:[#allocation3 + $0x38] sm:$0xff] %vm838_vm5, %v1166_v52  ;;  %v1136_v5 = vpop.xlane.xlu1 %1135  ;;  %1765 = vlog2.f32 (!%p1557_p2), %v1228_v29  ;;  %v1218_v23 = vld [vmem:[#allocation2 + $0x38] sm:$0xff] (!%p1557_p2)  ;;  %v2859_v29 = vld [vmem:[#allocation19_spill] sm:$0xff] (!%p1557_p2) }
 0x34b   : > { %v1163_v61 = vadd.f32 %v1136_v5, %v987_v13  ;;  %v1138_v42 = vpop.xlane.xlu0 %1137  ;;  %1767 = vlog2.f32 (!%p1557_p2), %v1229_v47  ;;  %vm1302_vm14 = vcmp.eq.s32.totalorder (!%p1557_p2), %v2859_v29, 0  ;;  %v1226_v54 = vld [vmem:[#allocation2 + $0x78] sm:$0xff] (!%p1557_p2) }
 0x34c   : > { %v1164_v33 = vadd.f32 %v1138_v42, %v988_v17  ;;  %1769 = vlog2.f32 (!%p1557_p2), %v1230_v16  ;;  %v1235_v35 = vld [vmem:[#allocation3 + $0x40] sm:$0xff] (!%p1557_p2) }
 0x34d   : > { %1179 = vst.msk [vmem:[#allocation3 + $0x20] sm:$0xff] %vm838_vm5, %v1163_v61  ;;  %v1236_v63 = vld [vmem:[#allocation3 + $0x48] sm:$0xff] (!%p1557_p2)  ;;  %v1215_v17 = vld [vmem:[#allocation2 + $0x20] sm:$0xff] (!%p1557_p2) }
 0x34e   : > { %1180 = vst.msk [vmem:[#allocation3 + $0x28] sm:$0xff] %vm838_vm5, %v1164_v33  ;;  %v1152_v28 = vpop.xlane.xlu1 %1151  ;;  %v1310_v33 = vld [vmem:[#allocation4 + $0x18] sm:$0xff] (!%p1557_p2) }
 0x34f   : > { %v1171_v56 = vadd.f32 %v1152_v28, %v995_v26  ;;  %v1154_v40 = vpop.xlane.xlu0 %1153  ;;  %v2857_v28 = vld [vmem:[#allocation20_spill] sm:$0xff] (!%p1557_p2) }
 0x350   : > { %v1172_v32 = vadd.f32 %v1154_v40, %v996_v12  ;;  %1210 = sbr.rel (%p1557_p2) target bundleno = 883 (0x373), region = 85  ;;  %v1233_v57 = vld [vmem:[#allocation3 + $0x30] sm:$0xff] (!%p1557_p2)  ;;  %vm1300_vm12 = vcmp.eq.s32.totalorder (!%p1557_p2), %v2857_v28, 0 }
 0x351   : > { %1187 = vst.msk [vmem:[#allocation3 + $0x60] sm:$0xff] %vm838_vm5, %v1171_v56  ;;  %v1234_v45 = vld [vmem:[#allocation3 + $0x38] sm:$0xff] (!%p1557_p2)  ;;  %v1311_v56 = vld [vmem:[#allocation4 + $0x20] sm:$0xff] (!%p1557_p2) }
 0x352   : > { %1188 = vst.msk [vmem:[#allocation3 + $0x68] sm:$0xff] %vm838_vm5, %v1172_v32  ;;  %v1156_v39 = vpop.xlane.xlu1 %1155  ;;  %v2858_v32 = vld [vmem:[#allocation17_spill] sm:$0xff] (!%p1557_p2) }
 0x353   : > { %v1173_v49 = vadd.f32 %v1156_v39, %v997_v15  ;;  %v1158_v30 = vpop.xlane.xlu0 %1157  ;;  %v1764_v7 = vpop.eup (!%p1557_p2), %1763  ;;  %vm1301_vm13 = vcmp.eq.s32.totalorder (!%p1557_p2), %v2858_v32, 0 }
 0x354   : > { %v1174_v10 = vadd.f32 %v1158_v30, %v998_v6  ;;  %v1231_v22 = vld [vmem:[#allocation3 + $0x20] sm:$0xff] (!%p1557_p2)  ;;  %v1766_v8 = vpop.eup (!%p1557_p2), %1765  ;;  %v1244_v18 = vmul.f32 (!%p1557_p2), 0.6931472, %v1764_v7  ;;  %v1312_v30 = vld [vmem:[#allocation4 + $0x28] sm:$0xff] (!%p1557_p2) }
 0x355   : > { %1189 = vst.msk [vmem:[#allocation3 + $0x70] sm:$0xff] %vm838_vm5, %v1173_v49  ;;  %1771 = vlog2.f32 (!%p1557_p2), %v1231_v22  ;;  %v1232_v19 = vld [vmem:[#allocation3 + $0x28] sm:$0xff] (!%p1557_p2)  ;;  %v1768_v60 = vpop.eup (!%p1557_p2), %1767  ;;  %v1246_v2 = vmul.f32 (!%p1557_p2), 0.6931472, %v1766_v8 }
 0x356   : > { %1190 = vst.msk [vmem:[#allocation3 + $0x78] sm:$0xff] %vm838_vm5, %v1174_v10  ;;  %1773 = vlog2.f32 (!%p1557_p2), %v1232_v19  ;;  %v1770_v3 = vpop.eup (!%p1557_p2), %1769  ;;  %v1275_v11 = vadd.f32 (!%p1557_p2), %v1244_v18, %v1211_v0  ;;  %v1248_v41 = vmul.f32 (!%p1557_p2), 0.6931472, %v1768_v60  ;;  %v1315_v60 = vld [vmem:[#allocation4 + $0x40] sm:$0xff] (!%p1557_p2) }
 0x357   : > { %1775 = vlog2.f32 %v1233_v57  ;;  %v1276_v13 = vadd.f32 %v1246_v2, %v1212_v24  ;;  %v1250_v5 = vmul.f32 0.6931472, %v1770_v3  ;;  %v1313_v57 = vld [vmem:[#allocation4 + $0x30] sm:$0xff] }
 0x358   : > { %1777 = vlog2.f32 %v1234_v45  ;;  %v1239_v14 = vld [vmem:[#allocation3 + $0x60] sm:$0xff]  ;;  %v1323_v42 = vsub.f32 %v1275_v11, %v1307_v55  ;;  %v1277_v37 = vadd.f32 %v1248_v41, %v1213_v27  ;;  %v1314_v55 = vld [vmem:[#allocation4 + $0x38] sm:$0xff] }
 0x359   : > { %1779 = vlog2.f32 %v1235_v35  ;;  %v1240_v50 = vld [vmem:[#allocation3 + $0x68] sm:$0xff]  ;;  %v1324_v58 = vsub.f32 %v1276_v13, %v1308_v20  ;;  %v1278_v43 = vadd.f32 %v1250_v5, %v1214_v9  ;;  %v1219_v35 = vld [vmem:[#allocation2 + $0x40] sm:$0xff] }
 0x35a   : > { %1781 = vlog2.f32 %v1236_v63  ;;  %v1339_v39 = vsel %vm1291_vm2, 0.0, %v1323_v42  ;;  %v1325_v6 = vsub.f32 %v1277_v37, %v1309_v51  ;;  %v2860_v63 = vld [vmem:[#allocation21_spill] sm:$0xff]  ;;  %v1316_v20 = vld [vmem:[#allocation4 + $0x48] sm:$0xff]  ;;  %v1317_v51 = vld [vmem:[#allocation4 + $0x50] sm:$0xff] }
 0x35b   : > { %1783 = vlog2.f32 %v1237_v53  ;;  %1355 = vst.msk [vmem:[%s2768_s5] sm:$0xff] %vm838_vm5, %v1339_v39  ;;  %v1340_v16 = vsel %vm1292_vm3, 0.0, %v1324_v58  ;;  %v1326_v22 = vsub.f32 %v1278_v43, %v1310_v33  ;;  %vm1303_vm15 = vcmp.eq.s32.totalorder %v2860_v63, 0  ;;  %v1318_v37 = vld [vmem:[#allocation4 + $0x58] sm:$0xff]  ;;  %v1319_v43 = vld [vmem:[#allocation4 + $0x60] sm:$0xff] }
 0x35c   : > { %1785 = vlog2.f32 %v1238_v62  ;;  %v1241_v48 = vld [vmem:[#allocation3 + $0x70] sm:$0xff]  ;;  %1356 = vst.msk [vmem:[%s2768_s5 + $0x8] sm:$0xff] %vm838_vm5, %v1340_v16  ;;  %v1341_v7 = vsel %vm1293_vm4, 0.0, %v1325_v6  ;;  %v1220_v62 = vld [vmem:[#allocation2 + $0x48] sm:$0xff] }
 0x35d   : > { %1787 = vlog2.f32 %v1239_v14  ;;  %v1242_v34 = vld [vmem:[#allocation3 + $0x78] sm:$0xff]  ;;  %1357 = vst.msk [vmem:[%s2768_s5 + $0x10] sm:$0xff] %vm838_vm5, %v1341_v7  ;;  %v1342_v18 = vsel %vm1294_vm6, 0.0, %v1326_v22  ;;  %v1320_v6 = vld [vmem:[#allocation4 + $0x68] sm:$0xff] }
 0x35e   : > { %1789 = vlog2.f32 %v1240_v50  ;;  %1358 = vst.msk [vmem:[%s2768_s5 + $0x18] sm:$0xff] %vm838_vm5, %v1342_v18 }
 0x35f   : > { %v1772_v52 = vpop.eup %1771  ;;  %1791 = vlog2.f32 %v1241_v48 }
 0x360   : > { %v1774_v61 = vpop.eup %1773  ;;  %v1252_v26 = vmul.f32 0.6931472, %v1772_v52  ;;  %1793 = vlog2.f32 %v1242_v34 }
 0x361   : > { %v1776_v12 = vpop.eup %1775  ;;  %v1254_v40 = vmul.f32 0.6931472, %v1774_v61 }
 0x362   : > { %v1778_v15 = vpop.eup %1777  ;;  %v1279_v49 = vadd.f32 %v1252_v26, %v1215_v17  ;;  %v1256_v10 = vmul.f32 0.6931472, %v1776_v12 }
 0x363   : > { %v1780_v47 = vpop.eup %1779  ;;  %v1280_v19 = vadd.f32 %v1254_v40, %v1216_v25  ;;  %v1258_v45 = vmul.f32 0.6931472, %v1778_v15 }
 0x364   : > { %v1782_v53 = vpop.eup %1781  ;;  %v1327_v0 = vsub.f32 %v1279_v49, %v1311_v56  ;;  %v1281_v21 = vadd.f32 %v1256_v10, %v1217_v31  ;;  %v1260_v1 = vmul.f32 0.6931472, %v1780_v47  ;;  %v1321_v47 = vld [vmem:[#allocation4 + $0x70] sm:$0xff] }
 0x365   : > { %v1784_v8 = vpop.eup %1783  ;;  %v1328_v24 = vsub.f32 %v1280_v19, %v1312_v30  ;;  %v1282_v14 = vadd.f32 %v1258_v45, %v1218_v23  ;;  %v1262_v2 = vmul.f32 0.6931472, %v1782_v53  ;;  %v2861_v19 = vld [vmem:[#allocation29_spill] sm:$0xff]  ;;  %v1322_v45 = vld [vmem:[#allocation4 + $0x78] sm:$0xff]  ;;  %v2862_v53 = vld [vmem:[#allocation31_spill] sm:$0xff] }
 0x366   : > { %v1786_v27 = vpop.eup %1785  ;;  %v1343_v50 = vsel %vm1295_vm7, 0.0, %v1327_v0  ;;  %v1329_v3 = vsub.f32 %v1281_v21, %v1313_v57  ;;  %v1283_v11 = vadd.f32 %v1260_v1, %v1219_v35  ;;  %v1264_v41 = vmul.f32 0.6931472, %v1784_v8  ;;  %v2863_v21 = vld [vmem:[#allocation30_spill] sm:$0xff] }
 0x367   : > { %v1788_v9 = vpop.eup %1787  ;;  %1359 = vst.msk [vmem:[%s2768_s5 + $0x20] sm:$0xff] %vm838_vm5, %v1343_v50  ;;  %v1344_v48 = vsel %vm1296_vm8, 0.0, %v1328_v24  ;;  %v1330_v52 = vsub.f32 %v1282_v14, %v1314_v55  ;;  %v1284_v13 = vadd.f32 %v1262_v2, %v1220_v62  ;;  %v1266_v5 = vmul.f32 0.6931472, %v1786_v27 }
 0x368   : > { %v1790_v17 = vpop.eup %1789  ;;  %1360 = vst.msk [vmem:[%s2768_s5 + $0x28] sm:$0xff] %vm838_vm5, %v1344_v48  ;;  %v1345_v34 = vsel %vm1297_vm9, 0.0, %v1329_v3  ;;  %v1331_v61 = vsub.f32 %v1283_v11, %v1315_v60  ;;  %v1285_v42 = vadd.f32 %v1264_v41, %v1221_v59  ;;  %v1268_v33 = vmul.f32 0.6931472, %v1788_v9 }
 0x369   : > { %v1792_v26 = vpop.eup %1791  ;;  %1361 = vst.msk [vmem:[%s2768_s5 + $0x30] sm:$0xff] %vm838_vm5, %v1345_v34  ;;  %v1346_v25 = vsel %vm1298_vm10, 0.0, %v1330_v52  ;;  %v1332_v12 = vsub.f32 %v1284_v13, %v1316_v20  ;;  %v1286_v58 = vadd.f32 %v1266_v5, %v1222_v44  ;;  %v1270_v56 = vmul.f32 0.6931472, %v1790_v17 }
 0x36a   : > { %v1794_v40 = vpop.eup %1793  ;;  %1362 = vst.msk [vmem:[%s2768_s5 + $0x38] sm:$0xff] %vm838_vm5, %v1346_v25  ;;  %v1347_v31 = vsel %vm1299_vm11, 0.0, %v1331_v61  ;;  %v1333_v15 = vsub.f32 %v1285_v42, %v1317_v51  ;;  %v1287_v39 = vadd.f32 %v1268_v33, %v1223_v4  ;;  %v1272_v49 = vmul.f32 0.6931472, %v1792_v26 }
 0x36b   : > { %1363 = vst.msk [vmem:[%s2768_s5 + $0x40] sm:$0xff] %vm838_vm5, %v1347_v31  ;;  %v1348_v30 = vsel %vm1300_vm12, 0.0, %v1332_v12  ;;  %v1334_v10 = vsub.f32 %v1286_v58, %v1318_v37  ;;  %v1288_v23 = vadd.f32 %v1270_v56, %v1224_v36  ;;  %v1274_v16 = vmul.f32 0.6931472, %v1794_v40 }
 0x36c   : > { %1364 = vst.msk [vmem:[%s2768_s5 + $0x48] sm:$0xff] %vm838_vm5, %v1348_v30  ;;  %v1349_v38 = vsel %vm1301_vm13, 0.0, %v1333_v15  ;;  %v1335_v22 = vsub.f32 %v1287_v39, %v1319_v43  ;;  %vm1304_vm0 = vcmp.eq.s32.totalorder %v2861_v19, 0  ;;  %v1289_v57 = vadd.f32 %v1272_v49, %v1225_v46 }
 0x36d   : > { %1365 = vst.msk [vmem:[%s2768_s5 + $0x50] sm:$0xff] %vm838_vm5, %v1349_v38  ;;  %v1350_v28 = vsel %vm1302_vm14, 0.0, %v1334_v10  ;;  %v1336_v35 = vsub.f32 %v1288_v23, %v1320_v6  ;;  %vm1305_vm1 = vcmp.eq.s32.totalorder %v2862_v53, 0  ;;  %v1290_v7 = vadd.f32 %v1274_v16, %v1226_v54 }
 0x36e   : > { %1366 = vst.msk [vmem:[%s2768_s5 + $0x58] sm:$0xff] %vm838_vm5, %v1350_v28  ;;  %v1351_v32 = vsel %vm1303_vm15, 0.0, %v1335_v22  ;;  %v1337_v0 = vsub.f32 %v1289_v57, %v1321_v47  ;;  %vm1306_vm2 = vcmp.eq.s32.totalorder %v2863_v21, 0 }
 0x36f   : > { %1367 = vst.msk [vmem:[%s2768_s5 + $0x60] sm:$0xff] %vm838_vm5, %v1351_v32  ;;  %v1352_v29 = vsel %vm1304_vm0, 0.0, %v1336_v35  ;;  %v1338_v55 = vsub.f32 %v1290_v7, %v1322_v45 }
 0x370   : > { %1368 = vst.msk [vmem:[%s2768_s5 + $0x68] sm:$0xff] %vm838_vm5, %v1352_v29  ;;  %v1353_v1 = vsel %vm1305_vm1, 0.0, %v1337_v0 }
 0x371   : > { %1369 = vst.msk [vmem:[%s2768_s5 + $0x70] sm:$0xff] %vm838_vm5, %v1353_v1  ;;  %v1354_v63 = vsel %vm1306_vm2, 0.0, %v1338_v55 }
 0x372   : > { %1370 = vst.msk [vmem:[%s2768_s5 + $0x78] sm:$0xff] %vm838_vm5, %v1354_v63 }
 0x373 PF: > { %s2712_s17 = scalar_lea.hbm %s2767_s4, %s1556_s13  ;;  %s1392_s27 = sshll.u32 %s2007_s7, 4  ;;  %s2715_s27 = int_to_ptr.vmem [resolvable:$true] %s1392_s27 }
 0x374   : > { %s1372_s25 = scalar_lea.sflag [#allocation7], %s1993_s14  ;;  %s1795_s8 = scalar_lea.vmem %s2715_s27, 2048 }
 0x375   : > { %p1796_p3 = scmp.ne.s32.totalorder %s2715_s27, %s1795_s8  ;;  %s1878_s21 = smov [#allocation6]  }
 0x376   : > { %s1799_s9 = sshll.u32 %s1878_s21, 4  ;;  %s1800_s9 = int_to_ptr.vmem [resolvable:$false] %s1799_s9 }
 0x377   : > { %p1797_p4 = pnand %p1796_p3, %p1951_p5  ;;  %s1801_s10 = scalar_lea.vmem %s1800_s9, 4096 }
 0x378   : > { %p1802_p7 = scmp.lt.s32.totalorder %s2715_s27, %s1800_s9  ;;  %p1803_p8 = scmp.lt.s32.totalorder %s1801_s10, %s1795_s8 }
 0x379   : > { %p1798_p6 = pneg %p1797_p4 }
 0x37a   : > { %p1804_p10 = por %p1803_p8, %p1802_p7 }
 0x37c   : > { %p1805_p11 = pnand %p1804_p10, %p1798_p6 }
 0x37e   : > { %1808 = shalt.err (!%p1805_p11)
}
 0x37f   : > { %s1809_s7 = scalar_lea.hbm %s2712_s17, 2048  ;;  %s1813_s12 = scalar_lea.hbm %s2767_s4, 6144 }
 0x380   : > { %p1810_p12 = scmp.ne.s32.totalorder %s2712_s17, %s1809_s7  ;;  %p1814_p1 = scmp.lt.u32.totalorder %s2712_s17, %s2767_s4 }
 0x381   : > { %p1815_p2 = scmp.lt.u32.totalorder %s1813_s12, %s1809_s7  ;;  %p1817_p4 = scmp.lt.u32.totalorder %s1809_s7, %s2712_s17 }
 0x382   : > { %p1811_p13 = pnand %p1810_p12, %p1951_p5 }
 0x383   : > { %p1816_p3 = por %p1815_p2, %p1814_p1 }
 0x384   : > { %p1812_p0 = pneg %p1811_p13 }
 0x385   : > { %p1818_p6 = por %p1817_p4, %p1816_p3 }
 0x387   : > { %p1819_p7 = pnand %p1818_p6, %p1812_p0 }
 0x389   : > { %1822 = shalt.err (!%p1819_p7)
}
 0x38a   : > { %s1879_s24 = smov 128   ;;  %s1880_s29 = smov 384  }
 0x38b   : > { %s1881_s8 = smov 8  }
 0x38c   : > { %1628 = dma.vmem_to_hbm [thread:$0]  (%p1951_p5), %s2715_s27, 2048, %s2712_s17, %s1372_s25, %s1879_s24, %s1880_s29, %s1881_s8  }
 0x38d PF: > { %p1634_p8 = scmp.ge.s32.totalorder %s1873_s23, 2  ;;  %s1419_s21 = sand.u32 1, %s1853_s18  }
 0x38e   : > { %s1420_s9 = scalar_lea.sflag [#allocation7], %s1419_s21 }
 0x38f   : > { %p1631_p10 = pnand %p1634_p8, %p1962_p9 }
 0x391   : > { %1848 = dma.done.wait (!%p1631_p10), %s1420_s9, 2048  }
 0x392   : > { %1850 = vsyncadd (!%p1631_p10), %s1420_s9, 4294965248  ;;  %s19_s23 = sadd.s32 1, %s1873_s23   ;;  %s2864_s18 = smov %s1857_s19 }
 0x393   : > { %p16_p11 = scmp.ge.s32.totalorder %s19_s23, 5   ;;  %s2865_s19 = smov %s1861_s20 }
 0x394   : > { %s2866_s20 = smov %s1960_s30  ;;  %s2867_s21 = smov %s1869_s22 }
 0x395   : > { %s2868_s22 = smov %s2870_s26  ;;  %18 = sbr.rel (!%p16_p11) target bundleno = 4 (0x4), region = 146 }
 0x39c   :  { %1425 = vsyncpa [#allocation7], 1 }
 0x39d   :  { %1427 = vsyncpa [#allocation7 + $0x1], 1 }

</bundles_post_ra>
